<compile_context>
chip_gen: v7x
topology: tpu7x:2x2x1
jax: 0.10.0
libtpu: 0.0.40
codegen_flags: <defaults>
</compile_context>

<pallas_src>
import functools

import jax
import jax.numpy as jnp
from jax.experimental import pallas as pl
from jax.experimental.pallas import tpu as pltpu


# ----------------------------------------------------------------------------
# Fused per-sample kernel: conv1 (GEMM+bias+ReLU) -> conv2 (gather-matmul
# accumulation + bias + ReLU). Everything stays in VMEM between layers.
# ----------------------------------------------------------------------------
def _qnet_fused_kernel(p1_ref, w1_ref, b1_ref, w2_ref, b2_ref, g_ref, o_ref):
    # conv1: [16, 256] @ [256, 400] -> [16, 400]  (channel-major, lane-dense)
    p1 = p1_ref[0]                                          # [256, 400] bf16
    y1 = jnp.dot(w1_ref[...], p1, preferred_element_type=jnp.float32)
    y1 = jnp.maximum(y1 + b1_ref[...], 0.0)                 # +bias, ReLU (f32)
    y1b = y1.astype(jnp.bfloat16)                           # [16, 400]

    # conv2: sum over the 16 (kh, kw) taps.
    #   patch_ij[cin, r] = y1[cin, (2*ho+i)*20 + (2*wo+j)]  via 0/1 gather matrix
    #   y2 += W2[:, :, i, j] @ patch_ij
    acc = None
    for ij in range(16):                                    # static unroll
        patch = jnp.dot(y1b, g_ref[ij],
                        preferred_element_type=jnp.float32)     # [16, 81]
        term = jnp.dot(w2_ref[ij], patch.astype(jnp.bfloat16),
                       preferred_element_type=jnp.float32)      # [32, 81]
        acc = term if acc is None else acc + term

    y2 = jnp.maximum(acc + b2_ref[...], 0.0)                # [32, 81] f32
    o_ref[0] = y2.astype(o_ref.dtype)


# ----------------------------------------------------------------------------
# Wrapper-side glue (plain JAX, layout prep only)
# ----------------------------------------------------------------------------
def im2col_T(x, kh, kw, stride):
    """NCHW -> K-major patch tensor [B, C*kh*kw, Ho*Wo].

    Row order (C slowest, then kh, then kw) matches torch weight.reshape(Cout,-1).
    """
    B, C, H, W = x.shape
    Ho = (H - kh) // stride + 1
    Wo = (W - kw) // stride + 1
    cols = []
    for i in range(kh):
        for j in range(kw):
            cols.append(x[:, :, i:i + stride * Ho:stride, j:j + stride * Wo:stride])
    p = jnp.stack(cols, axis=2)                 # [B, C, kh*kw, Ho, Wo]
    p = p.reshape(B, C * kh * kw, Ho * Wo)      # K-major, spatial in lanes
    return p, Ho, Wo


def _conv2_gather_mats():
    """0/1 selection matrices G[ij] s.t. (y1 @ G[ij])[c, r] = conv2 patch value.

    conv2: 20x20 input, k=4, stride=2, 9x9 output.  Shape [16, 400, 81] bf16.
    """
    kh = kw = 4
    stride = 2
    hin = win = 20
    ho = wo = 9
    s_in = jnp.arange(hin * win)
    oh = jnp.arange(ho)
    ow = jnp.arange(wo)
    mats = []
    for i in range(kh):
        for j in range(kw):
            src = ((stride * oh[:, None] + i) * win
                   + (stride * ow[None, :] + j)).reshape(-1)        # [81]
            mats.append(s_in[:, None] == src[None, :])               # [400, 81]
    return jnp.stack(mats, 0).astype(jnp.bfloat16)                   # [16,400,81]


def prepare_params(params):
    """One-time conversion of PyTorch-shaped params into matmul-ready layout."""
    w1, b1, w2, b2, wf, bfv = (params["w1"], params["b1"], params["w2"],
                               params["b2"], params["wf"], params["bf"])
    return {
        "w1m": w1.reshape(16, 256).astype(jnp.bfloat16),             # [Cout, K]
        "b1c": b1.reshape(16, 1).astype(jnp.float32),
        # [kh*kw, Cout, Cin]
        "w2s": w2.transpose(2, 3, 0, 1).reshape(16, 32, 16).astype(jnp.bfloat16),
        "b2c": b2.reshape(32, 1).astype(jnp.float32),
        "gmats": _conv2_gather_mats(),                               # [16,400,81]
        "wfT": wf.T.astype(jnp.float32),                             # [2592, A]
        "bf": bfv.astype(jnp.float32),
    }


# ----------------------------------------------------------------------------
# QNetwork forward
# ----------------------------------------------------------------------------
def qnetwork_forward(x, prep):
    """x: [B, 4, 84, 84] float32 (NCHW). Returns [B, n_actions] float32."""
    B = x.shape[0]

    # conv1 im2col emitted directly in the kernel's bf16, K-major layout.
    p1, _, _ = im2col_T(x, 8, 8, 4)                  # [B, 256, 400]
    p1 = p1.astype(jnp.bfloat16)

    y2 = pl.pallas_call(
        _qnet_fused_kernel,
        out_shape=jax.ShapeDtypeStruct((B, 32, 81), jnp.float32),
        grid_spec=pltpu.PrefetchScalarGridSpec(
            num_scalar_prefetch=0,
            grid=(B,),                                # one sample per step
            in_specs=[
                pl.BlockSpec((1, 256, 400), lambda b: (b, 0, 0)),   # patches
                pl.BlockSpec((16, 256), lambda b: (0, 0)),          # W1 (resident)
                pl.BlockSpec((16, 1), lambda b: (0, 0)),            # b1
                pl.BlockSpec((16, 32, 16), lambda b: (0, 0, 0)),    # W2 taps
                pl.BlockSpec((32, 1), lambda b: (0, 0)),            # b2
                pl.BlockSpec((16, 400, 81), lambda b: (0, 0, 0)),   # gather mats
            ],
            out_specs=pl.BlockSpec((1, 32, 81), lambda b: (b, 0, 0)),
        ),
        compiler_params=pltpu.CompilerParams(
            dimension_semantics=("parallel",),        # 2x on v7x megacore
            vmem_limit_bytes=32 * 1024 * 1024,        # ~2.6 MB actual footprint
        ),
    )(p1, prep["w1m"], prep["b1c"], prep["w2s"], prep["b2c"], prep["gmats"])

    # Flatten is already in torch's (C, H, W) order: y2 is [B, 32, 9*9].
    flat = y2.reshape(B, 32 * 81)
    # fc: tiny (B x 2592 x n_actions) GEMM — intentionally left to XLA.
    return flat @ prep["wfT"] + prep["bf"]


# ----------------------------------------------------------------------------
# Deterministic synthetic parameter init (PyTorch-shaped)
# ----------------------------------------------------------------------------
def init_params(n_actions, key):
    ks = jax.random.split(key, 6)

    def u(k, shape, fan_in):
        bound = 1.0 / jnp.sqrt(fan_in)
        return jax.random.uniform(k, shape, jnp.float32, -bound, bound)

    return {
        "w1": u(ks[0], (16, 4, 8, 8), 4 * 8 * 8),
        "b1": u(ks[1], (16,), 4 * 8 * 8),
        "w2": u(ks[2], (32, 16, 4, 4), 16 * 4 * 4),
        "b2": u(ks[3], (32,), 16 * 4 * 4),
        "wf": u(ks[4], (n_actions, 32 * 9 * 9), 32 * 9 * 9),
        "bf": u(ks[5], (n_actions,), 32 * 9 * 9),
    }


def qnetwork_reference(x, params):
    """Pure-JAX reference (lax.conv) for a sanity check."""
    y = jax.lax.conv_general_dilated(
        x, params["w1"], (4, 4), "VALID",
        dimension_numbers=("NCHW", "OIHW", "NCHW"))
    y = jnp.maximum(y + params["b1"][None, :, None, None], 0.0)
    y = jax.lax.conv_general_dilated(
        y, params["w2"], (2, 2), "VALID",
        dimension_numbers=("NCHW", "OIHW", "NCHW"))
    y = jnp.maximum(y + params["b2"][None, :, None, None], 0.0)
    y = y.reshape(y.shape[0], -1)
    return y @ params["wf"].T + params["bf"]


if __name__ == "__main__":
    key = jax.random.PRNGKey(0)
    k_x, k_p = jax.random.split(key)

    batch, n_actions = 2, 6
    # Spatial size 84 is forced by fc's 32*9*9 input (standard Atari DQN).
    x = jax.random.uniform(k_x, (batch, 4, 84, 84), jnp.float32)
    params = init_params(n_actions, k_p)
    prep = prepare_params(params)

    fwd = jax.jit(qnetwork_forward)
    q = jax.block_until_ready(fwd(x, prep))
    assert q.shape == (batch, n_actions) and q.dtype == jnp.float32

    q_ref = jax.block_until_ready(qnetwork_reference(x, params))
    assert jnp.allclose(q, q_ref, rtol=1e-2, atol=1e-2), "mismatch vs reference"

    print("KERNEL_OK")
</pallas_src>

<mosaic_0001>
module attributes {stable_mosaic.version = 11 : i64} {
  func.func @_qnet_fused_kernel(%arg0: i32, %arg1: memref<1x256x400xbf16, #tpu.memory_space<vmem>>, %arg2: memref<16x256xbf16, #tpu.memory_space<vmem>>, %arg3: memref<16x1xf32, #tpu.memory_space<vmem>>, %arg4: memref<16x32x16xbf16, #tpu.memory_space<vmem>>, %arg5: memref<32x1xf32, #tpu.memory_space<vmem>>, %arg6: memref<16x400x81xbf16, #tpu.memory_space<vmem>>, %arg7: memref<1x32x81xf32, #tpu.memory_space<vmem>>) attributes {dimension_semantics = [#tpu.dimension_semantics<parallel>], iteration_bounds = array<i64: 2>, scalar_prefetch = 0 : i64, scratch_operands = 0 : i64, tpu.core_type = #tpu.core_type<tc>, window_params = [{transform_indices = @transform_0, window_bounds = array<i64: 1, 256, 400>}, {pipeline_mode = #tpu.pipeline_mode<synchronous>, transform_indices = @transform_1, window_bounds = array<i64: 16, 256>}, {pipeline_mode = #tpu.pipeline_mode<synchronous>, transform_indices = @transform_2, window_bounds = array<i64: 16, 1>}, {pipeline_mode = #tpu.pipeline_mode<synchronous>, transform_indices = @transform_3, window_bounds = array<i64: 16, 32, 16>}, {pipeline_mode = #tpu.pipeline_mode<synchronous>, transform_indices = @transform_4, window_bounds = array<i64: 32, 1>}, {pipeline_mode = #tpu.pipeline_mode<synchronous>, transform_indices = @transform_5, window_bounds = array<i64: 16, 400, 81>}, {transform_indices = @transform_6, window_bounds = array<i64: 1, 32, 81>}]} {
    %c0 = arith.constant 0 : index
    %c0_0 = arith.constant 0 : index
    %c0_1 = arith.constant 0 : index
    %0 = vector.load %arg1[%c0, %c0_0, %c0_1] : memref<1x256x400xbf16, #tpu.memory_space<vmem>>, vector<1x256x400xbf16>
    %1 = vector.shape_cast %0 : vector<1x256x400xbf16> to vector<256x400xbf16>
    %c0_2 = arith.constant 0 : index
    %c0_3 = arith.constant 0 : index
    %2 = vector.load %arg2[%c0_2, %c0_3] : memref<16x256xbf16, #tpu.memory_space<vmem>>, vector<16x256xbf16>
    %cst = arith.constant dense<0.000000e+00> : vector<16x400xf32>
    %3 = tpu.matmul %2, %1, %cst {dimension_numbers = #tpu.dot_dimension_numbers<[1], [0], [0], [1], [0, 0, 1, 1], [], []>} : vector<16x256xbf16>, vector<256x400xbf16>, vector<16x400xf32> -> vector<16x400xf32>
    %c0_4 = arith.constant 0 : index
    %c0_5 = arith.constant 0 : index
    %4 = vector.load %arg3[%c0_4, %c0_5] : memref<16x1xf32, #tpu.memory_space<vmem>>, vector<16x1xf32>
    %5 = vector.broadcast %4 : vector<16x1xf32> to vector<16x400xf32>
    %6 = arith.addf %3, %5 : vector<16x400xf32>
    %cst_6 = arith.constant 0.000000e+00 : f32
    %7 = vector.broadcast %cst_6 : f32 to vector<16x400xf32>
    %8 = arith.maximumf %6, %7 : vector<16x400xf32>
    %9 = arith.truncf %8 : vector<16x400xf32> to vector<16x400xbf16>
    %c0_7 = arith.constant 0 : index
    %c0_8 = arith.constant 0 : index
    %c0_9 = arith.constant 0 : index
    %10 = vector.load %arg6[%c0_7, %c0_8, %c0_9] : memref<16x400x81xbf16, #tpu.memory_space<vmem>>, vector<1x400x81xbf16>
    %11 = vector.shape_cast %10 : vector<1x400x81xbf16> to vector<400x81xbf16>
    %cst_10 = arith.constant dense<0.000000e+00> : vector<16x81xf32>
    %12 = tpu.matmul %9, %11, %cst_10 {dimension_numbers = #tpu.dot_dimension_numbers<[1], [0], [0], [1], [0, 0, 1, 1], [], []>} : vector<16x400xbf16>, vector<400x81xbf16>, vector<16x81xf32> -> vector<16x81xf32>
    %c0_11 = arith.constant 0 : index
    %c0_12 = arith.constant 0 : index
    %c0_13 = arith.constant 0 : index
    %13 = vector.load %arg4[%c0_11, %c0_12, %c0_13] : memref<16x32x16xbf16, #tpu.memory_space<vmem>>, vector<1x32x16xbf16>
    %14 = vector.shape_cast %13 : vector<1x32x16xbf16> to vector<32x16xbf16>
    %15 = arith.truncf %12 : vector<16x81xf32> to vector<16x81xbf16>
    %cst_14 = arith.constant dense<0.000000e+00> : vector<32x81xf32>
    %16 = tpu.matmul %14, %15, %cst_14 {dimension_numbers = #tpu.dot_dimension_numbers<[1], [0], [0], [1], [0, 0, 1, 1], [], []>} : vector<32x16xbf16>, vector<16x81xbf16>, vector<32x81xf32> -> vector<32x81xf32>
    %c1 = arith.constant 1 : index
    %c0_15 = arith.constant 0 : index
    %c0_16 = arith.constant 0 : index
    %17 = vector.load %arg6[%c1, %c0_15, %c0_16] : memref<16x400x81xbf16, #tpu.memory_space<vmem>>, vector<1x400x81xbf16>
    %18 = vector.shape_cast %17 : vector<1x400x81xbf16> to vector<400x81xbf16>
    %cst_17 = arith.constant dense<0.000000e+00> : vector<16x81xf32>
    %19 = tpu.matmul %9, %18, %cst_17 {dimension_numbers = #tpu.dot_dimension_numbers<[1], [0], [0], [1], [0, 0, 1, 1], [], []>} : vector<16x400xbf16>, vector<400x81xbf16>, vector<16x81xf32> -> vector<16x81xf32>
    %c1_18 = arith.constant 1 : index
    %c0_19 = arith.constant 0 : index
    %c0_20 = arith.constant 0 : index
    %20 = vector.load %arg4[%c1_18, %c0_19, %c0_20] : memref<16x32x16xbf16, #tpu.memory_space<vmem>>, vector<1x32x16xbf16>
    %21 = vector.shape_cast %20 : vector<1x32x16xbf16> to vector<32x16xbf16>
    %22 = arith.truncf %19 : vector<16x81xf32> to vector<16x81xbf16>
    %cst_21 = arith.constant dense<0.000000e+00> : vector<32x81xf32>
    %23 = tpu.matmul %21, %22, %cst_21 {dimension_numbers = #tpu.dot_dimension_numbers<[1], [0], [0], [1], [0, 0, 1, 1], [], []>} : vector<32x16xbf16>, vector<16x81xbf16>, vector<32x81xf32> -> vector<32x81xf32>
    %24 = arith.addf %16, %23 : vector<32x81xf32>
    %c2 = arith.constant 2 : index
    %c0_22 = arith.constant 0 : index
    %c0_23 = arith.constant 0 : index
    %25 = vector.load %arg6[%c2, %c0_22, %c0_23] : memref<16x400x81xbf16, #tpu.memory_space<vmem>>, vector<1x400x81xbf16>
    %26 = vector.shape_cast %25 : vector<1x400x81xbf16> to vector<400x81xbf16>
    %cst_24 = arith.constant dense<0.000000e+00> : vector<16x81xf32>
    %27 = tpu.matmul %9, %26, %cst_24 {dimension_numbers = #tpu.dot_dimension_numbers<[1], [0], [0], [1], [0, 0, 1, 1], [], []>} : vector<16x400xbf16>, vector<400x81xbf16>, vector<16x81xf32> -> vector<16x81xf32>
    %c2_25 = arith.constant 2 : index
    %c0_26 = arith.constant 0 : index
    %c0_27 = arith.constant 0 : index
    %28 = vector.load %arg4[%c2_25, %c0_26, %c0_27] : memref<16x32x16xbf16, #tpu.memory_space<vmem>>, vector<1x32x16xbf16>
    %29 = vector.shape_cast %28 : vector<1x32x16xbf16> to vector<32x16xbf16>
    %30 = arith.truncf %27 : vector<16x81xf32> to vector<16x81xbf16>
    %cst_28 = arith.constant dense<0.000000e+00> : vector<32x81xf32>
    %31 = tpu.matmul %29, %30, %cst_28 {dimension_numbers = #tpu.dot_dimension_numbers<[1], [0], [0], [1], [0, 0, 1, 1], [], []>} : vector<32x16xbf16>, vector<16x81xbf16>, vector<32x81xf32> -> vector<32x81xf32>
    %32 = arith.addf %24, %31 : vector<32x81xf32>
    %c3 = arith.constant 3 : index
    %c0_29 = arith.constant 0 : index
    %c0_30 = arith.constant 0 : index
    %33 = vector.load %arg6[%c3, %c0_29, %c0_30] : memref<16x400x81xbf16, #tpu.memory_space<vmem>>, vector<1x400x81xbf16>
    %34 = vector.shape_cast %33 : vector<1x400x81xbf16> to vector<400x81xbf16>
    %cst_31 = arith.constant dense<0.000000e+00> : vector<16x81xf32>
    %35 = tpu.matmul %9, %34, %cst_31 {dimension_numbers = #tpu.dot_dimension_numbers<[1], [0], [0], [1], [0, 0, 1, 1], [], []>} : vector<16x400xbf16>, vector<400x81xbf16>, vector<16x81xf32> -> vector<16x81xf32>
    %c3_32 = arith.constant 3 : index
    %c0_33 = arith.constant 0 : index
    %c0_34 = arith.constant 0 : index
    %36 = vector.load %arg4[%c3_32, %c0_33, %c0_34] : memref<16x32x16xbf16, #tpu.memory_space<vmem>>, vector<1x32x16xbf16>
    %37 = vector.shape_cast %36 : vector<1x32x16xbf16> to vector<32x16xbf16>
    %38 = arith.truncf %35 : vector<16x81xf32> to vector<16x81xbf16>
    %cst_35 = arith.constant dense<0.000000e+00> : vector<32x81xf32>
    %39 = tpu.matmul %37, %38, %cst_35 {dimension_numbers = #tpu.dot_dimension_numbers<[1], [0], [0], [1], [0, 0, 1, 1], [], []>} : vector<32x16xbf16>, vector<16x81xbf16>, vector<32x81xf32> -> vector<32x81xf32>
    %40 = arith.addf %32, %39 : vector<32x81xf32>
    %c4 = arith.constant 4 : index
    %c0_36 = arith.constant 0 : index
    %c0_37 = arith.constant 0 : index
    %41 = vector.load %arg6[%c4, %c0_36, %c0_37] : memref<16x400x81xbf16, #tpu.memory_space<vmem>>, vector<1x400x81xbf16>
    %42 = vector.shape_cast %41 : vector<1x400x81xbf16> to vector<400x81xbf16>
    %cst_38 = arith.constant dense<0.000000e+00> : vector<16x81xf32>
    %43 = tpu.matmul %9, %42, %cst_38 {dimension_numbers = #tpu.dot_dimension_numbers<[1], [0], [0], [1], [0, 0, 1, 1], [], []>} : vector<16x400xbf16>, vector<400x81xbf16>, vector<16x81xf32> -> vector<16x81xf32>
    %c4_39 = arith.constant 4 : index
    %c0_40 = arith.constant 0 : index
    %c0_41 = arith.constant 0 : index
    %44 = vector.load %arg4[%c4_39, %c0_40, %c0_41] : memref<16x32x16xbf16, #tpu.memory_space<vmem>>, vector<1x32x16xbf16>
    %45 = vector.shape_cast %44 : vector<1x32x16xbf16> to vector<32x16xbf16>
    %46 = arith.truncf %43 : vector<16x81xf32> to vector<16x81xbf16>
    %cst_42 = arith.constant dense<0.000000e+00> : vector<32x81xf32>
    %47 = tpu.matmul %45, %46, %cst_42 {dimension_numbers = #tpu.dot_dimension_numbers<[1], [0], [0], [1], [0, 0, 1, 1], [], []>} : vector<32x16xbf16>, vector<16x81xbf16>, vector<32x81xf32> -> vector<32x81xf32>
    %48 = arith.addf %40, %47 : vector<32x81xf32>
    %c5 = arith.constant 5 : index
    %c0_43 = arith.constant 0 : index
    %c0_44 = arith.constant 0 : index
    %49 = vector.load %arg6[%c5, %c0_43, %c0_44] : memref<16x400x81xbf16, #tpu.memory_space<vmem>>, vector<1x400x81xbf16>
    %50 = vector.shape_cast %49 : vector<1x400x81xbf16> to vector<400x81xbf16>
    %cst_45 = arith.constant dense<0.000000e+00> : vector<16x81xf32>
    %51 = tpu.matmul %9, %50, %cst_45 {dimension_numbers = #tpu.dot_dimension_numbers<[1], [0], [0], [1], [0, 0, 1, 1], [], []>} : vector<16x400xbf16>, vector<400x81xbf16>, vector<16x81xf32> -> vector<16x81xf32>
    %c5_46 = arith.constant 5 : index
    %c0_47 = arith.constant 0 : index
    %c0_48 = arith.constant 0 : index
    %52 = vector.load %arg4[%c5_46, %c0_47, %c0_48] : memref<16x32x16xbf16, #tpu.memory_space<vmem>>, vector<1x32x16xbf16>
    %53 = vector.shape_cast %52 : vector<1x32x16xbf16> to vector<32x16xbf16>
    %54 = arith.truncf %51 : vector<16x81xf32> to vector<16x81xbf16>
    %cst_49 = arith.constant dense<0.000000e+00> : vector<32x81xf32>
    %55 = tpu.matmul %53, %54, %cst_49 {dimension_numbers = #tpu.dot_dimension_numbers<[1], [0], [0], [1], [0, 0, 1, 1], [], []>} : vector<32x16xbf16>, vector<16x81xbf16>, vector<32x81xf32> -> vector<32x81xf32>
    %56 = arith.addf %48, %55 : vector<32x81xf32>
    %c6 = arith.constant 6 : index
    %c0_50 = arith.constant 0 : index
    %c0_51 = arith.constant 0 : index
    %57 = vector.load %arg6[%c6, %c0_50, %c0_51] : memref<16x400x81xbf16, #tpu.memory_space<vmem>>, vector<1x400x81xbf16>
    %58 = vector.shape_cast %57 : vector<1x400x81xbf16> to vector<400x81xbf16>
    %cst_52 = arith.constant dense<0.000000e+00> : vector<16x81xf32>
    %59 = tpu.matmul %9, %58, %cst_52 {dimension_numbers = #tpu.dot_dimension_numbers<[1], [0], [0], [1], [0, 0, 1, 1], [], []>} : vector<16x400xbf16>, vector<400x81xbf16>, vector<16x81xf32> -> vector<16x81xf32>
    %c6_53 = arith.constant 6 : index
    %c0_54 = arith.constant 0 : index
    %c0_55 = arith.constant 0 : index
    %60 = vector.load %arg4[%c6_53, %c0_54, %c0_55] : memref<16x32x16xbf16, #tpu.memory_space<vmem>>, vector<1x32x16xbf16>
    %61 = vector.shape_cast %60 : vector<1x32x16xbf16> to vector<32x16xbf16>
    %62 = arith.truncf %59 : vector<16x81xf32> to vector<16x81xbf16>
    %cst_56 = arith.constant dense<0.000000e+00> : vector<32x81xf32>
    %63 = tpu.matmul %61, %62, %cst_56 {dimension_numbers = #tpu.dot_dimension_numbers<[1], [0], [0], [1], [0, 0, 1, 1], [], []>} : vector<32x16xbf16>, vector<16x81xbf16>, vector<32x81xf32> -> vector<32x81xf32>
    %64 = arith.addf %56, %63 : vector<32x81xf32>
    %c7 = arith.constant 7 : index
    %c0_57 = arith.constant 0 : index
    %c0_58 = arith.constant 0 : index
    %65 = vector.load %arg6[%c7, %c0_57, %c0_58] : memref<16x400x81xbf16, #tpu.memory_space<vmem>>, vector<1x400x81xbf16>
    %66 = vector.shape_cast %65 : vector<1x400x81xbf16> to vector<400x81xbf16>
    %cst_59 = arith.constant dense<0.000000e+00> : vector<16x81xf32>
    %67 = tpu.matmul %9, %66, %cst_59 {dimension_numbers = #tpu.dot_dimension_numbers<[1], [0], [0], [1], [0, 0, 1, 1], [], []>} : vector<16x400xbf16>, vector<400x81xbf16>, vector<16x81xf32> -> vector<16x81xf32>
    %c7_60 = arith.constant 7 : index
    %c0_61 = arith.constant 0 : index
    %c0_62 = arith.constant 0 : index
    %68 = vector.load %arg4[%c7_60, %c0_61, %c0_62] : memref<16x32x16xbf16, #tpu.memory_space<vmem>>, vector<1x32x16xbf16>
    %69 = vector.shape_cast %68 : vector<1x32x16xbf16> to vector<32x16xbf16>
    %70 = arith.truncf %67 : vector<16x81xf32> to vector<16x81xbf16>
    %cst_63 = arith.constant dense<0.000000e+00> : vector<32x81xf32>
    %71 = tpu.matmul %69, %70, %cst_63 {dimension_numbers = #tpu.dot_dimension_numbers<[1], [0], [0], [1], [0, 0, 1, 1], [], []>} : vector<32x16xbf16>, vector<16x81xbf16>, vector<32x81xf32> -> vector<32x81xf32>
    %72 = arith.addf %64, %71 : vector<32x81xf32>
    %c8 = arith.constant 8 : index
    %c0_64 = arith.constant 0 : index
    %c0_65 = arith.constant 0 : index
    %73 = vector.load %arg6[%c8, %c0_64, %c0_65] : memref<16x400x81xbf16, #tpu.memory_space<vmem>>, vector<1x400x81xbf16>
    %74 = vector.shape_cast %73 : vector<1x400x81xbf16> to vector<400x81xbf16>
    %cst_66 = arith.constant dense<0.000000e+00> : vector<16x81xf32>
    %75 = tpu.matmul %9, %74, %cst_66 {dimension_numbers = #tpu.dot_dimension_numbers<[1], [0], [0], [1], [0, 0, 1, 1], [], []>} : vector<16x400xbf16>, vector<400x81xbf16>, vector<16x81xf32> -> vector<16x81xf32>
    %c8_67 = arith.constant 8 : index
    %c0_68 = arith.constant 0 : index
    %c0_69 = arith.constant 0 : index
    %76 = vector.load %arg4[%c8_67, %c0_68, %c0_69] : memref<16x32x16xbf16, #tpu.memory_space<vmem>>, vector<1x32x16xbf16>
    %77 = vector.shape_cast %76 : vector<1x32x16xbf16> to vector<32x16xbf16>
    %78 = arith.truncf %75 : vector<16x81xf32> to vector<16x81xbf16>
    %cst_70 = arith.constant dense<0.000000e+00> : vector<32x81xf32>
    %79 = tpu.matmul %77, %78, %cst_70 {dimension_numbers = #tpu.dot_dimension_numbers<[1], [0], [0], [1], [0, 0, 1, 1], [], []>} : vector<32x16xbf16>, vector<16x81xbf16>, vector<32x81xf32> -> vector<32x81xf32>
    %80 = arith.addf %72, %79 : vector<32x81xf32>
    %c9 = arith.constant 9 : index
    %c0_71 = arith.constant 0 : index
    %c0_72 = arith.constant 0 : index
    %81 = vector.load %arg6[%c9, %c0_71, %c0_72] : memref<16x400x81xbf16, #tpu.memory_space<vmem>>, vector<1x400x81xbf16>
    %82 = vector.shape_cast %81 : vector<1x400x81xbf16> to vector<400x81xbf16>
    %cst_73 = arith.constant dense<0.000000e+00> : vector<16x81xf32>
    %83 = tpu.matmul %9, %82, %cst_73 {dimension_numbers = #tpu.dot_dimension_numbers<[1], [0], [0], [1], [0, 0, 1, 1], [], []>} : vector<16x400xbf16>, vector<400x81xbf16>, vector<16x81xf32> -> vector<16x81xf32>
    %c9_74 = arith.constant 9 : index
    %c0_75 = arith.constant 0 : index
    %c0_76 = arith.constant 0 : index
    %84 = vector.load %arg4[%c9_74, %c0_75, %c0_76] : memref<16x32x16xbf16, #tpu.memory_space<vmem>>, vector<1x32x16xbf16>
    %85 = vector.shape_cast %84 : vector<1x32x16xbf16> to vector<32x16xbf16>
    %86 = arith.truncf %83 : vector<16x81xf32> to vector<16x81xbf16>
    %cst_77 = arith.constant dense<0.000000e+00> : vector<32x81xf32>
    %87 = tpu.matmul %85, %86, %cst_77 {dimension_numbers = #tpu.dot_dimension_numbers<[1], [0], [0], [1], [0, 0, 1, 1], [], []>} : vector<32x16xbf16>, vector<16x81xbf16>, vector<32x81xf32> -> vector<32x81xf32>
    %88 = arith.addf %80, %87 : vector<32x81xf32>
    %c10 = arith.constant 10 : index
    %c0_78 = arith.constant 0 : index
    %c0_79 = arith.constant 0 : index
    %89 = vector.load %arg6[%c10, %c0_78, %c0_79] : memref<16x400x81xbf16, #tpu.memory_space<vmem>>, vector<1x400x81xbf16>
    %90 = vector.shape_cast %89 : vector<1x400x81xbf16> to vector<400x81xbf16>
    %cst_80 = arith.constant dense<0.000000e+00> : vector<16x81xf32>
    %91 = tpu.matmul %9, %90, %cst_80 {dimension_numbers = #tpu.dot_dimension_numbers<[1], [0], [0], [1], [0, 0, 1, 1], [], []>} : vector<16x400xbf16>, vector<400x81xbf16>, vector<16x81xf32> -> vector<16x81xf32>
    %c10_81 = arith.constant 10 : index
    %c0_82 = arith.constant 0 : index
    %c0_83 = arith.constant 0 : index
    %92 = vector.load %arg4[%c10_81, %c0_82, %c0_83] : memref<16x32x16xbf16, #tpu.memory_space<vmem>>, vector<1x32x16xbf16>
    %93 = vector.shape_cast %92 : vector<1x32x16xbf16> to vector<32x16xbf16>
    %94 = arith.truncf %91 : vector<16x81xf32> to vector<16x81xbf16>
    %cst_84 = arith.constant dense<0.000000e+00> : vector<32x81xf32>
    %95 = tpu.matmul %93, %94, %cst_84 {dimension_numbers = #tpu.dot_dimension_numbers<[1], [0], [0], [1], [0, 0, 1, 1], [], []>} : vector<32x16xbf16>, vector<16x81xbf16>, vector<32x81xf32> -> vector<32x81xf32>
    %96 = arith.addf %88, %95 : vector<32x81xf32>
    %c11 = arith.constant 11 : index
    %c0_85 = arith.constant 0 : index
    %c0_86 = arith.constant 0 : index
    %97 = vector.load %arg6[%c11, %c0_85, %c0_86] : memref<16x400x81xbf16, #tpu.memory_space<vmem>>, vector<1x400x81xbf16>
    %98 = vector.shape_cast %97 : vector<1x400x81xbf16> to vector<400x81xbf16>
    %cst_87 = arith.constant dense<0.000000e+00> : vector<16x81xf32>
    %99 = tpu.matmul %9, %98, %cst_87 {dimension_numbers = #tpu.dot_dimension_numbers<[1], [0], [0], [1], [0, 0, 1, 1], [], []>} : vector<16x400xbf16>, vector<400x81xbf16>, vector<16x81xf32> -> vector<16x81xf32>
    %c11_88 = arith.constant 11 : index
    %c0_89 = arith.constant 0 : index
    %c0_90 = arith.constant 0 : index
    %100 = vector.load %arg4[%c11_88, %c0_89, %c0_90] : memref<16x32x16xbf16, #tpu.memory_space<vmem>>, vector<1x32x16xbf16>
    %101 = vector.shape_cast %100 : vector<1x32x16xbf16> to vector<32x16xbf16>
    %102 = arith.truncf %99 : vector<16x81xf32> to vector<16x81xbf16>
    %cst_91 = arith.constant dense<0.000000e+00> : vector<32x81xf32>
    %103 = tpu.matmul %101, %102, %cst_91 {dimension_numbers = #tpu.dot_dimension_numbers<[1], [0], [0], [1], [0, 0, 1, 1], [], []>} : vector<32x16xbf16>, vector<16x81xbf16>, vector<32x81xf32> -> vector<32x81xf32>
    %104 = arith.addf %96, %103 : vector<32x81xf32>
    %c12 = arith.constant 12 : index
    %c0_92 = arith.constant 0 : index
    %c0_93 = arith.constant 0 : index
    %105 = vector.load %arg6[%c12, %c0_92, %c0_93] : memref<16x400x81xbf16, #tpu.memory_space<vmem>>, vector<1x400x81xbf16>
    %106 = vector.shape_cast %105 : vector<1x400x81xbf16> to vector<400x81xbf16>
    %cst_94 = arith.constant dense<0.000000e+00> : vector<16x81xf32>
    %107 = tpu.matmul %9, %106, %cst_94 {dimension_numbers = #tpu.dot_dimension_numbers<[1], [0], [0], [1], [0, 0, 1, 1], [], []>} : vector<16x400xbf16>, vector<400x81xbf16>, vector<16x81xf32> -> vector<16x81xf32>
    %c12_95 = arith.constant 12 : index
    %c0_96 = arith.constant 0 : index
    %c0_97 = arith.constant 0 : index
    %108 = vector.load %arg4[%c12_95, %c0_96, %c0_97] : memref<16x32x16xbf16, #tpu.memory_space<vmem>>, vector<1x32x16xbf16>
    %109 = vector.shape_cast %108 : vector<1x32x16xbf16> to vector<32x16xbf16>
    %110 = arith.truncf %107 : vector<16x81xf32> to vector<16x81xbf16>
    %cst_98 = arith.constant dense<0.000000e+00> : vector<32x81xf32>
    %111 = tpu.matmul %109, %110, %cst_98 {dimension_numbers = #tpu.dot_dimension_numbers<[1], [0], [0], [1], [0, 0, 1, 1], [], []>} : vector<32x16xbf16>, vector<16x81xbf16>, vector<32x81xf32> -> vector<32x81xf32>
    %112 = arith.addf %104, %111 : vector<32x81xf32>
    %c13 = arith.constant 13 : index
    %c0_99 = arith.constant 0 : index
    %c0_100 = arith.constant 0 : index
    %113 = vector.load %arg6[%c13, %c0_99, %c0_100] : memref<16x400x81xbf16, #tpu.memory_space<vmem>>, vector<1x400x81xbf16>
    %114 = vector.shape_cast %113 : vector<1x400x81xbf16> to vector<400x81xbf16>
    %cst_101 = arith.constant dense<0.000000e+00> : vector<16x81xf32>
    %115 = tpu.matmul %9, %114, %cst_101 {dimension_numbers = #tpu.dot_dimension_numbers<[1], [0], [0], [1], [0, 0, 1, 1], [], []>} : vector<16x400xbf16>, vector<400x81xbf16>, vector<16x81xf32> -> vector<16x81xf32>
    %c13_102 = arith.constant 13 : index
    %c0_103 = arith.constant 0 : index
    %c0_104 = arith.constant 0 : index
    %116 = vector.load %arg4[%c13_102, %c0_103, %c0_104] : memref<16x32x16xbf16, #tpu.memory_space<vmem>>, vector<1x32x16xbf16>
    %117 = vector.shape_cast %116 : vector<1x32x16xbf16> to vector<32x16xbf16>
    %118 = arith.truncf %115 : vector<16x81xf32> to vector<16x81xbf16>
    %cst_105 = arith.constant dense<0.000000e+00> : vector<32x81xf32>
    %119 = tpu.matmul %117, %118, %cst_105 {dimension_numbers = #tpu.dot_dimension_numbers<[1], [0], [0], [1], [0, 0, 1, 1], [], []>} : vector<32x16xbf16>, vector<16x81xbf16>, vector<32x81xf32> -> vector<32x81xf32>
    %120 = arith.addf %112, %119 : vector<32x81xf32>
    %c14 = arith.constant 14 : index
    %c0_106 = arith.constant 0 : index
    %c0_107 = arith.constant 0 : index
    %121 = vector.load %arg6[%c14, %c0_106, %c0_107] : memref<16x400x81xbf16, #tpu.memory_space<vmem>>, vector<1x400x81xbf16>
    %122 = vector.shape_cast %121 : vector<1x400x81xbf16> to vector<400x81xbf16>
    %cst_108 = arith.constant dense<0.000000e+00> : vector<16x81xf32>
    %123 = tpu.matmul %9, %122, %cst_108 {dimension_numbers = #tpu.dot_dimension_numbers<[1], [0], [0], [1], [0, 0, 1, 1], [], []>} : vector<16x400xbf16>, vector<400x81xbf16>, vector<16x81xf32> -> vector<16x81xf32>
    %c14_109 = arith.constant 14 : index
    %c0_110 = arith.constant 0 : index
    %c0_111 = arith.constant 0 : index
    %124 = vector.load %arg4[%c14_109, %c0_110, %c0_111] : memref<16x32x16xbf16, #tpu.memory_space<vmem>>, vector<1x32x16xbf16>
    %125 = vector.shape_cast %124 : vector<1x32x16xbf16> to vector<32x16xbf16>
    %126 = arith.truncf %123 : vector<16x81xf32> to vector<16x81xbf16>
    %cst_112 = arith.constant dense<0.000000e+00> : vector<32x81xf32>
    %127 = tpu.matmul %125, %126, %cst_112 {dimension_numbers = #tpu.dot_dimension_numbers<[1], [0], [0], [1], [0, 0, 1, 1], [], []>} : vector<32x16xbf16>, vector<16x81xbf16>, vector<32x81xf32> -> vector<32x81xf32>
    %128 = arith.addf %120, %127 : vector<32x81xf32>
    %c15 = arith.constant 15 : index
    %c0_113 = arith.constant 0 : index
    %c0_114 = arith.constant 0 : index
    %129 = vector.load %arg6[%c15, %c0_113, %c0_114] : memref<16x400x81xbf16, #tpu.memory_space<vmem>>, vector<1x400x81xbf16>
    %130 = vector.shape_cast %129 : vector<1x400x81xbf16> to vector<400x81xbf16>
    %cst_115 = arith.constant dense<0.000000e+00> : vector<16x81xf32>
    %131 = tpu.matmul %9, %130, %cst_115 {dimension_numbers = #tpu.dot_dimension_numbers<[1], [0], [0], [1], [0, 0, 1, 1], [], []>} : vector<16x400xbf16>, vector<400x81xbf16>, vector<16x81xf32> -> vector<16x81xf32>
    %c15_116 = arith.constant 15 : index
    %c0_117 = arith.constant 0 : index
    %c0_118 = arith.constant 0 : index
    %132 = vector.load %arg4[%c15_116, %c0_117, %c0_118] : memref<16x32x16xbf16, #tpu.memory_space<vmem>>, vector<1x32x16xbf16>
    %133 = vector.shape_cast %132 : vector<1x32x16xbf16> to vector<32x16xbf16>
    %134 = arith.truncf %131 : vector<16x81xf32> to vector<16x81xbf16>
    %cst_119 = arith.constant dense<0.000000e+00> : vector<32x81xf32>
    %135 = tpu.matmul %133, %134, %cst_119 {dimension_numbers = #tpu.dot_dimension_numbers<[1], [0], [0], [1], [0, 0, 1, 1], [], []>} : vector<32x16xbf16>, vector<16x81xbf16>, vector<32x81xf32> -> vector<32x81xf32>
    %136 = arith.addf %128, %135 : vector<32x81xf32>
    %c0_120 = arith.constant 0 : index
    %c0_121 = arith.constant 0 : index
    %137 = vector.load %arg5[%c0_120, %c0_121] : memref<32x1xf32, #tpu.memory_space<vmem>>, vector<32x1xf32>
    %138 = vector.broadcast %137 : vector<32x1xf32> to vector<32x81xf32>
    %139 = arith.addf %136, %138 : vector<32x81xf32>
    %cst_122 = arith.constant 0.000000e+00 : f32
    %140 = vector.broadcast %cst_122 : f32 to vector<32x81xf32>
    %141 = arith.maximumf %139, %140 : vector<32x81xf32>
    %c0_123 = arith.constant 0 : index
    %c0_124 = arith.constant 0 : index
    %c0_125 = arith.constant 0 : index
    %142 = vector.load %arg7[%c0_123, %c0_124, %c0_125] : memref<1x32x81xf32, #tpu.memory_space<vmem>>, vector<1x32x81xf32>
    %143 = vector.shape_cast %142 : vector<1x32x81xf32> to vector<32x81xf32>
    %144 = vector.shape_cast %141 : vector<32x81xf32> to vector<1x32x81xf32>
    tpu.vector_store %arg7[%c0_123, %c0_124, %c0_125], %144 {strides = array<i32>} : memref<1x32x81xf32, #tpu.memory_space<vmem>>, vector<1x32x81xf32>,
    return
  }
  func.func @transform_0(%arg0: i32) -> (i32, i32, i32) {
    %c0_i32 = arith.constant 0 : i32
    %c0_i32_0 = arith.constant 0 : i32
    %c0_i32_1 = arith.constant 0 : i32
    return %arg0, %c0_i32, %c0_i32_0 : i32, i32, i32
  }
  func.func @transform_1(%arg0: i32) -> (i32, i32) {
    %c0_i32 = arith.constant 0 : i32
    %c0_i32_0 = arith.constant 0 : i32
    %c0_i32_1 = arith.constant 0 : i32
    return %c0_i32, %c0_i32_0 : i32, i32
  }
  func.func @transform_2(%arg0: i32) -> (i32, i32) {
    %c0_i32 = arith.constant 0 : i32
    %c0_i32_0 = arith.constant 0 : i32
    %c0_i32_1 = arith.constant 0 : i32
    return %c0_i32, %c0_i32_0 : i32, i32
  }
  func.func @transform_3(%arg0: i32) -> (i32, i32, i32) {
    %c0_i32 = arith.constant 0 : i32
    %c0_i32_0 = arith.constant 0 : i32
    %c0_i32_1 = arith.constant 0 : i32
    %c0_i32_2 = arith.constant 0 : i32
    return %c0_i32, %c0_i32_0, %c0_i32_1 : i32, i32, i32
  }
  func.func @transform_4(%arg0: i32) -> (i32, i32) {
    %c0_i32 = arith.constant 0 : i32
    %c0_i32_0 = arith.constant 0 : i32
    %c0_i32_1 = arith.constant 0 : i32
    return %c0_i32, %c0_i32_0 : i32, i32
  }
  func.func @transform_5(%arg0: i32) -> (i32, i32, i32) {
    %c0_i32 = arith.constant 0 : i32
    %c0_i32_0 = arith.constant 0 : i32
    %c0_i32_1 = arith.constant 0 : i32
    %c0_i32_2 = arith.constant 0 : i32
    return %c0_i32, %c0_i32_0, %c0_i32_1 : i32, i32, i32
  }
  func.func @transform_6(%arg0: i32) -> (i32, i32, i32) {
    %c0_i32 = arith.constant 0 : i32
    %c0_i32_0 = arith.constant 0 : i32
    %c0_i32_1 = arith.constant 0 : i32
    return %arg0, %c0_i32, %c0_i32_0 : i32, i32, i32
  }
}

</mosaic_0001>

<bundles_post_ra>
// kernel: qnetwork_forward.1
= control target key start
LH: loop header
LB: loop body
LE: loop exit
PB: predicated region body
PF: predicated region fallthrough
CT: control target
= control target key end

     0   :  { %s9084_s21 = smov 0   ;;  %s10837_s0 = inlined_call_operand.vmem [shape: bf16[2,256,400], index: 0, kind: input, shape index: {}]   ;;  %s10838_s1 = inlined_call_operand.vmem [shape: bf16[16,256], index: 1, kind: input, shape index: {}]   ;;  %s10839_s2 = inlined_call_operand.vmem [shape: f32[16,1], index: 2, kind: input, shape index: {}]   ;;  %s10840_s3 = inlined_call_operand.vmem [shape: bf16[16,32,16], index: 3, kind: input, shape index: {}]   ;;  %s10841_s4 = inlined_call_operand.vmem [shape: f32[32,1], index: 4, kind: input, shape index: {}]   ;;  %s10842_s5 = inlined_call_operand.vmem [shape: bf16[16,400,81], index: 5, kind: input, shape index: {}]   ;;  %s10843_s6 = inlined_call_operand.vmem [shape: f32[2,32,81], index: 6, kind: output, shape index: {}]  }
   0x1 LB: > { %s6573_s22 = sadd.s32 4294967295, %s9046_s21   ;;  %p6577_p0 = scmp.ge.s32.totalorder %s9046_s21, 1  ;;  %s9046_s21 = sphi %s9084_s21, %s16_s21  }
   0x2   : > { %p212_p1 = scmp.lt.s32.totalorder %s9046_s21, 3 }
   0x4   : > { %p213_p2 = pnand %p6577_p0, %p212_p1 }
   0x5   : > { %p242_p3 = scmp.lt.s32.totalorder (!%p213_p2), %s6573_s22, 1  ;;  %v8607_v0 = vld [vmem:[%s10838_s1 + $0x4] ss:$8 sps:$4 sm:$0xff] (!%p213_p2)   ;;  %v9048_v1 = vmov (!%p213_p2), 0   ;;  %v6483_v5 = vld [vmem:[%s10841_s4 + $0x10] sm:$0xff] (!%p213_p2)  ;;  %vm959_vm0 = vcmask (!%p213_p2), 130048  }
   0x6   : > { %216 = sbr.rel (%p213_p2) target bundleno = 3907 (0xf43), region = 44  ;;  %8507 = vset.pattern.permute.xlu0 (!%p213_p2), %v9048_v1  ;;  %v319_v2 = vld [vmem:[%s10839_s2] sm:$0xff] (!%p213_p2)  ;;  %8508 = vset.pattern.permute.xlu1 (!%p213_p2), %v9048_v1  ;;  %v320_v3 = vld [vmem:[%s10839_s2 + $0x8] sm:$0xff] (!%p213_p2)  ;;  %vm6513_vm1 = vcmask (!%p213_p2), 662528  }
   0x7   : > { %323 = vperm.xlu0 (!%p213_p2), %8507, %v319_v2   ;;  %693 = vmatprep.mubr.bf16.mxu0 (!%p213_p2), %v8607_v0 }
   0x8   : > { %736 = vmatprep.mubr.bf16.mxu1 (!%p213_p2), %v8607_v0 }
   0xb   : > { %328 = vperm.xlu0 (!%p213_p2), %8507, %v320_v3  }
   0xd   : > { %s10845_s22 = smov (!%p242_p3, %s6573_s22), 1 }
   0xe   : > { %s7940_s29 = sshll.u32 %s10845_s22, 9  ;;  %s7941_s27 = sshll.u32 %s10845_s22, 5 }
   0xf   : > { %s9109_s8 = scalar_lea.vmem %s10837_s0, %s7940_s29  ;;  %6497 = vperm.xlu0 %8507, %v6483_v5   ;;  %s251_s30 = scalar_lea.vmem %s10843_s6, %s7941_s27 }
  0x10   : > { %v8509_v4 = vld [vmem:[%s9109_s8 + $0x4] ss:$16 sps:$4 sm:$0xff]   ;;  %v8511_v6 = vld [vmem:[%s9109_s8 + $0xc] ss:$16 sps:$4 sm:$0xff]   ;;  %v8513_v7 = vld [vmem:[%s9109_s8] ss:$16 sps:$4 sm:$0xff]  }
  0x11   : > { %661 = vmatprep.subr.bf16.mxu0 %v8509_v4  ;;  %v8514_v8 = vld [vmem:[%s9109_s8 + $0x8] ss:$16 sps:$4 sm:$0xff]   ;;  %704 = vmatprep.subr.bf16.mxu1 %v8511_v6  ;;  %v8515_v9 = vld [vmem:[%s9109_s8 + $0x24] ss:$16 sps:$4 sm:$0xff]   ;;  %v8517_v10 = vld [vmem:[%s9109_s8 + $0x2c] ss:$16 sps:$4 sm:$0xff]  }
  0x12   : > { %662 = vmatpush1.bf16.msra.mxu0 %v8513_v7  ;;  %705 = vmatpush1.bf16.msra.mxu1 %v8514_v8  ;;  %v8519_v11 = vld [vmem:[%s9109_s8 + $0x20] ss:$16 sps:$4 sm:$0xff]   ;;  %v8520_v12 = vld [vmem:[%s9109_s8 + $0x28] ss:$16 sps:$4 sm:$0xff]   ;;  %v8521_v13 = vld [vmem:[%s9109_s8 + $0x44] ss:$16 sps:$4 sm:$0xff]  }
  0x13   : > { %663 = vmatprep.subr.bf16.mxu0 %v8515_v9  ;;  %706 = vmatprep.subr.bf16.mxu1 %v8517_v10  ;;  %v8523_v14 = vld [vmem:[%s9109_s8 + $0x4c] ss:$16 sps:$4 sm:$0xff]   ;;  %v8525_v15 = vld [vmem:[%s9109_s8 + $0x40] ss:$16 sps:$4 sm:$0xff]   ;;  %v8526_v16 = vld [vmem:[%s9109_s8 + $0x48] ss:$16 sps:$4 sm:$0xff]  }
  0x14   : > { %v8527_v17 = vld [vmem:[%s9109_s8 + $0x64] ss:$16 sps:$4 sm:$0xff]   ;;  %v8529_v18 = vld [vmem:[%s9109_s8 + $0x6c] ss:$16 sps:$4 sm:$0xff]   ;;  %v8531_v19 = vld [vmem:[%s9109_s8 + $0x60] ss:$16 sps:$4 sm:$0xff]  }
  0x15   : > { %v8532_v20 = vld [vmem:[%s9109_s8 + $0x68] ss:$16 sps:$4 sm:$0xff]   ;;  %v8533_v21 = vld [vmem:[%s9109_s8 + $0x84] ss:$16 sps:$4 sm:$0xff]   ;;  %v8535_v22 = vld [vmem:[%s9109_s8 + $0x8c] ss:$16 sps:$4 sm:$0xff]  }
  0x16   : > { %664 = vmatpush1.bf16.msra.mxu0 %v8519_v11  ;;  %707 = vmatpush1.bf16.msra.mxu1 %v8520_v12  ;;  %v8537_v23 = vld [vmem:[%s9109_s8 + $0x80] ss:$16 sps:$4 sm:$0xff]   ;;  %v8538_v24 = vld [vmem:[%s9109_s8 + $0x88] ss:$16 sps:$4 sm:$0xff]   ;;  %v8539_v25 = vld [vmem:[%s9109_s8 + $0xa4] ss:$16 sps:$4 sm:$0xff]  }
  0x17   : > { %665 = vmatprep.subr.bf16.mxu0 %v8521_v13  ;;  %708 = vmatprep.subr.bf16.mxu1 %v8523_v14  ;;  %v8541_v26 = vld [vmem:[%s9109_s8 + $0xac] ss:$16 sps:$4 sm:$0xff]   ;;  %v8543_v27 = vld [vmem:[%s9109_s8 + $0xa0] ss:$16 sps:$4 sm:$0xff]   ;;  %v8544_v28 = vld [vmem:[%s9109_s8 + $0xa8] ss:$16 sps:$4 sm:$0xff]  }
  0x18   : > { %v8545_v29 = vld [vmem:[%s9109_s8 + $0xc4] ss:$16 sps:$4 sm:$0xff]   ;;  %v8547_v30 = vld [vmem:[%s9109_s8 + $0xcc] ss:$16 sps:$4 sm:$0xff]   ;;  %v8549_v31 = vld [vmem:[%s9109_s8 + $0xc0] ss:$16 sps:$4 sm:$0xff]  }
  0x19   : > { %v8550_v32 = vld [vmem:[%s9109_s8 + $0xc8] ss:$16 sps:$4 sm:$0xff]   ;;  %v8551_v33 = vld [vmem:[%s9109_s8 + $0xe4] ss:$16 sps:$4 sm:$0xff]   ;;  %v8553_v34 = vld [vmem:[%s9109_s8 + $0xec] ss:$16 sps:$4 sm:$0xff]  }
  0x1a   : > { %666 = vmatpush1.bf16.msra.mxu0 %v8525_v15  ;;  %709 = vmatpush1.bf16.msra.mxu1 %v8526_v16  ;;  %v8555_v35 = vld [vmem:[%s9109_s8 + $0xe0] ss:$16 sps:$4 sm:$0xff]   ;;  %v8556_v36 = vld [vmem:[%s9109_s8 + $0xe8] ss:$16 sps:$4 sm:$0xff]   ;;  %v8557_v37 = vld [vmem:[%s9109_s8 + $0x104] ss:$16 sps:$4 sm:$0xff]  }
  0x1b   : > { %667 = vmatprep.subr.bf16.mxu0 %v8527_v17  ;;  %710 = vmatprep.subr.bf16.mxu1 %v8529_v18  ;;  %v8559_v38 = vld [vmem:[%s9109_s8 + $0x10c] ss:$16 sps:$4 sm:$0xff]   ;;  %v8561_v39 = vld [vmem:[%s9109_s8 + $0x100] ss:$16 sps:$4 sm:$0xff]   ;;  %v8562_v40 = vld [vmem:[%s9109_s8 + $0x108] ss:$16 sps:$4 sm:$0xff]  }
  0x1c   : > { %v8563_v41 = vld [vmem:[%s9109_s8 + $0x124] ss:$16 sps:$4 sm:$0xff]   ;;  %v8565_v42 = vld [vmem:[%s9109_s8 + $0x12c] ss:$16 sps:$4 sm:$0xff]   ;;  %v8567_v43 = vld [vmem:[%s9109_s8 + $0x120] ss:$16 sps:$4 sm:$0xff]  }
  0x1d   : > { %v8568_v44 = vld [vmem:[%s9109_s8 + $0x128] ss:$16 sps:$4 sm:$0xff]   ;;  %v8569_v45 = vld [vmem:[%s9109_s8 + $0x144] ss:$16 sps:$4 sm:$0xff]   ;;  %v8571_v46 = vld [vmem:[%s9109_s8 + $0x14c] ss:$16 sps:$4 sm:$0xff]  }
  0x1e   : > { %668 = vmatpush1.bf16.msra.mxu0 %v8531_v19  ;;  %711 = vmatpush1.bf16.msra.mxu1 %v8532_v20  ;;  %v8573_v47 = vld [vmem:[%s9109_s8 + $0x140] ss:$16 sps:$4 sm:$0xff]   ;;  %v8574_v48 = vld [vmem:[%s9109_s8 + $0x148] ss:$16 sps:$4 sm:$0xff]   ;;  %v8575_v49 = vld [vmem:[%s9109_s8 + $0x164] ss:$16 sps:$4 sm:$0xff]  }
  0x1f   : > { %669 = vmatprep.subr.bf16.mxu0 %v8533_v21  ;;  %712 = vmatprep.subr.bf16.mxu1 %v8535_v22  ;;  %v8577_v50 = vld [vmem:[%s9109_s8 + $0x16c] ss:$16 sps:$4 sm:$0xff]   ;;  %v8579_v51 = vld [vmem:[%s9109_s8 + $0x160] ss:$16 sps:$4 sm:$0xff]   ;;  %v8580_v52 = vld [vmem:[%s9109_s8 + $0x168] ss:$16 sps:$4 sm:$0xff]  }
  0x20   : > { %v8581_v53 = vld [vmem:[%s9109_s8 + $0x184] ss:$16 sps:$4 sm:$0xff]   ;;  %v8583_v54 = vld [vmem:[%s9109_s8 + $0x18c] ss:$16 sps:$4 sm:$0xff]   ;;  %v8585_v55 = vld [vmem:[%s9109_s8 + $0x180] ss:$16 sps:$4 sm:$0xff]  }
  0x21   : > { %v8586_v56 = vld [vmem:[%s9109_s8 + $0x188] ss:$16 sps:$4 sm:$0xff]   ;;  %v8587_v57 = vld [vmem:[%s9109_s8 + $0x1a4] ss:$16 sps:$4 sm:$0xff]   ;;  %v8589_v58 = vld [vmem:[%s9109_s8 + $0x1ac] ss:$16 sps:$4 sm:$0xff]  }
  0x22   : > { %670 = vmatpush1.bf16.msra.mxu0 %v8537_v23  ;;  %713 = vmatpush1.bf16.msra.mxu1 %v8538_v24  ;;  %v8591_v59 = vld [vmem:[%s9109_s8 + $0x1a0] ss:$16 sps:$4 sm:$0xff]   ;;  %v8592_v60 = vld [vmem:[%s9109_s8 + $0x1a8] ss:$16 sps:$4 sm:$0xff]   ;;  %v8593_v61 = vld [vmem:[%s9109_s8 + $0x1c4] ss:$16 sps:$4 sm:$0xff]  }
  0x23   : > { %671 = vmatprep.subr.bf16.mxu0 %v8539_v25  ;;  %714 = vmatprep.subr.bf16.mxu1 %v8541_v26  ;;  %v8595_v62 = vld [vmem:[%s9109_s8 + $0x1cc] ss:$16 sps:$4 sm:$0xff]   ;;  %v8597_v63 = vld [vmem:[%s9109_s8 + $0x1c0] ss:$16 sps:$4 sm:$0xff]   ;;  %v8598_v0 = vld [vmem:[%s9109_s8 + $0x1c8] ss:$16 sps:$4 sm:$0xff]  }
  0x24   : > { %v8599_v2 = vld [vmem:[%s9109_s8 + $0x1e4] ss:$16 sps:$4 sm:$0xff]   ;;  %v8601_v3 = vld [vmem:[%s9109_s8 + $0x1ec] ss:$16 sps:$4 sm:$0xff]   ;;  %v8603_v4 = vld [vmem:[%s9109_s8 + $0x1e0] ss:$16 sps:$4 sm:$0xff]  }
  0x25   : > { %v8604_v5 = vld [vmem:[%s9109_s8 + $0x1e8] ss:$16 sps:$4 sm:$0xff]   ;;  %v8609_v6 = vld [vmem:[%s10842_s5 + $0x40] sm:$0xff]   ;;  %v8615_v13 = vld [vmem:[%s10842_s5 + $0x50] sm:$0xff]  }
  0x26   : > { %672 = vmatpush1.bf16.msra.mxu0 %v8543_v27  ;;  %715 = vmatpush1.bf16.msra.mxu1 %v8544_v28  ;;  %v8605_v7 = vld [vmem:[%s10838_s1] ss:$8 sps:$4 sm:$0xff]   ;;  %v8614_v14 = vld [vmem:[%s10842_s5 + $0x90] sm:$0xff]   ;;  %v8618_v16 = vld [vmem:[%s10842_s5 + $0x58] sm:$0xff]  }
  0x27   : > { %673 = vmatprep.subr.bf16.mxu0 %v8545_v29  ;;  %716 = vmatprep.subr.bf16.mxu1 %v8547_v30  ;;  %v8608_v8 = vld [vmem:[%s10842_s5 + $0x80] sm:$0xff]   ;;  %v8612_v10 = vld [vmem:[%s10842_s5 + $0x48] sm:$0xff]   ;;  %v8616_v15 = vld [vmem:[%s10842_s5 + $0x10] sm:$0xff]  }
  0x28   : > { %v8610_v9 = vld [vmem:[%s10842_s5] sm:$0xff]   ;;  %v8611_v11 = vld [vmem:[%s10842_s5 + $0x88] sm:$0xff]   ;;  %v8617_v17 = vld [vmem:[%s10842_s5 + $0x98] sm:$0xff]  }
  0x29   : > { %v8613_v12 = vld [vmem:[%s10842_s5 + $0x8] sm:$0xff]   ;;  %v8619_v18 = vld [vmem:[%s10842_s5 + $0x18] sm:$0xff]   ;;  %v8621_v19 = vld [vmem:[%s10842_s5 + $0x60] sm:$0xff]  }
  0x2a   : > { %674 = vmatpush1.bf16.msra.mxu0 %v8549_v31  ;;  %717 = vmatpush1.bf16.msra.mxu1 %v8550_v32  ;;  %v8620_v20 = vld [vmem:[%s10842_s5 + $0xa0] sm:$0xff]   ;;  %v8624_v22 = vld [vmem:[%s10842_s5 + $0x68] sm:$0xff]   ;;  %v8626_v25 = vld [vmem:[%s10842_s5 + $0xb0] sm:$0xff]  }
  0x2b   : > { %675 = vmatprep.subr.bf16.mxu0 %v8551_v33  ;;  %718 = vmatprep.subr.bf16.mxu1 %v8553_v34  ;;  %v8622_v21 = vld [vmem:[%s10842_s5 + $0x20] sm:$0xff]   ;;  %v8623_v23 = vld [vmem:[%s10842_s5 + $0xa8] sm:$0xff]   ;;  %v8627_v26 = vld [vmem:[%s10842_s5 + $0x70] sm:$0xff]  }
  0x2c   : > { %v8625_v24 = vld [vmem:[%s10842_s5 + $0x28] sm:$0xff]   ;;  %v8628_v27 = vld [vmem:[%s10842_s5 + $0x30] sm:$0xff]   ;;  %v8629_v28 = vld [vmem:[%s10842_s5 + $0xb8] sm:$0xff]  }
  0x2d   : > { %v8630_v29 = vld [vmem:[%s10842_s5 + $0x78] sm:$0xff]   ;;  %v8632_v31 = vld [vmem:[%s10842_s5 + $0xc0] sm:$0xff]   ;;  %v8633_v32 = vld [vmem:[%s10842_s5 + $0x108] sm:$0xff]  }
  0x2e   : > { %676 = vmatpush1.bf16.msra.mxu0 %v8555_v35  ;;  %719 = vmatpush1.bf16.msra.mxu1 %v8556_v36  ;;  %v8631_v30 = vld [vmem:[%s10842_s5 + $0x38] sm:$0xff]  }
  0x2f   : > { %677 = vmatprep.subr.bf16.mxu0 %v8557_v37  ;;  %720 = vmatprep.subr.bf16.mxu1 %v8559_v38 }
  0x32   : > { %678 = vmatpush1.bf16.msra.mxu0 %v8561_v39  ;;  %721 = vmatpush1.bf16.msra.mxu1 %v8562_v40 }
  0x33   : > { %679 = vmatprep.subr.bf16.mxu0 %v8563_v41  ;;  %722 = vmatprep.subr.bf16.mxu1 %v8565_v42 }
  0x36   : > { %680 = vmatpush1.bf16.msra.mxu0 %v8567_v43  ;;  %723 = vmatpush1.bf16.msra.mxu1 %v8568_v44 }
  0x37   : > { %681 = vmatprep.subr.bf16.mxu0 %v8569_v45  ;;  %724 = vmatprep.subr.bf16.mxu1 %v8571_v46 }
  0x3a   : > { %682 = vmatpush1.bf16.msra.mxu0 %v8573_v47  ;;  %725 = vmatpush1.bf16.msra.mxu1 %v8574_v48 }
  0x3b   : > { %683 = vmatprep.subr.bf16.mxu0 %v8575_v49  ;;  %726 = vmatprep.subr.bf16.mxu1 %v8577_v50 }
  0x3e   : > { %684 = vmatpush1.bf16.msra.mxu0 %v8579_v51  ;;  %727 = vmatpush1.bf16.msra.mxu1 %v8580_v52 }
  0x3f   : > { %685 = vmatprep.subr.bf16.mxu0 %v8581_v53  ;;  %728 = vmatprep.subr.bf16.mxu1 %v8583_v54 }
  0x42   : > { %686 = vmatpush1.bf16.msra.mxu0 %v8585_v55  ;;  %729 = vmatpush1.bf16.msra.mxu1 %v8586_v56 }
  0x43   : > { %687 = vmatprep.subr.bf16.mxu0 %v8587_v57  ;;  %730 = vmatprep.subr.bf16.mxu1 %v8589_v58 }
  0x46   : > { %688 = vmatpush1.bf16.msra.mxu0 %v8591_v59  ;;  %731 = vmatpush1.bf16.msra.mxu1 %v8592_v60  ;;  %v8634_v59 = vld [vmem:[%s10842_s5 + $0xc8] sm:$0xff]  }
  0x47   : > { %689 = vmatprep.subr.bf16.mxu0 %v8593_v61  ;;  %732 = vmatprep.subr.bf16.mxu1 %v8595_v62 }
  0x4a   : > { %690 = vmatpush1.bf16.msra.mxu0 %v8597_v63  ;;  %733 = vmatpush1.bf16.msra.mxu1 %v8598_v0  ;;  %v8635_v0 = vld [vmem:[%s10842_s5 + $0x148] sm:$0xff]  }
  0x4b   : > { %691 = vmatprep.subr.bf16.mxu0 %v8599_v2  ;;  %734 = vmatprep.subr.bf16.mxu1 %v8601_v3  ;;  %v8636_v2 = vld [vmem:[%s10842_s5 + $0x110] sm:$0xff]  }
  0x4c   : > { %v8637_v3 = vld [vmem:[%s10842_s5 + $0xd0] sm:$0xff]  }
  0x4e   : > { %692 = vmatpush1.bf16.msra.mxu0 %v8603_v4  ;;  %735 = vmatpush1.bf16.msra.mxu1 %v8604_v5  ;;  %v8638_v4 = vld [vmem:[%s10842_s5 + $0x150] sm:$0xff]   ;;  %v8639_v5 = vld [vmem:[%s10842_s5 + $0x118] sm:$0xff]  }
  0x4f   : > { %1004 = vmatprep.subr.bf16.mxu1 %v9048_v1  ;;  %7942 = vmatprep.subr.bf16.mxu0 %v8609_v6  ;;  %v8640_v6 = vld [vmem:[%s10842_s5 + $0xd8] sm:$0xff]  }
  0x51   : > { %694 = vmatmul.mubr.bf16.vlgmr.msra.gmra.mrb[0].mxu0 %v8605_v7  ;;  %737 = vmatmul.mubr.bf16.vlgmr.msra.gmra.mrb[0].mxu1 %v8605_v7  ;;  %v8641_v7 = vld [vmem:[%s10842_s5 + $0x158] sm:$0xff]  }
  0x52   : > { %1005 = vmatpush1.bf16.msra.mxu1 %v8608_v8  ;;  %7943 = vmatpush3.bf16.msra.mxu0 %v8610_v9  ;;  %v8642_v8 = vld [vmem:[%s10842_s5 + $0x120] sm:$0xff]  }
  0x53   : > { %1006 = vmatprep.subr.bf16.mxu1 %v9048_v1  ;;  %7944 = vmatprep.subr.bf16.mxu0 %v8612_v10  ;;  %v8643_v9 = vld [vmem:[%s10842_s5 + $0xe0] sm:$0xff]  }
  0x54   : > { %v8644_v10 = vld [vmem:[%s10842_s5 + $0x160] sm:$0xff]  }
  0x56   : > { %1007 = vmatpush1.bf16.msra.mxu1 %v8611_v11  ;;  %7945 = vmatpush3.bf16.msra.mxu0 %v8613_v12  ;;  %v8645_v11 = vld [vmem:[%s10842_s5 + $0x128] sm:$0xff]  }
  0x57   : > { %1008 = vmatprep.subr.bf16.mxu1 %v9048_v1  ;;  %7946 = vmatprep.subr.bf16.mxu0 %v8615_v13  ;;  %v8646_v12 = vld [vmem:[%s10842_s5 + $0xe8] sm:$0xff]  }
  0x58   : > { %v8647_v13 = vld [vmem:[%s10842_s5 + $0x168] sm:$0xff]  }
  0x5a   : > { %1009 = vmatpush1.bf16.msra.mxu1 %v8614_v14  ;;  %7947 = vmatpush3.bf16.msra.mxu0 %v8616_v15  ;;  %v8648_v14 = vld [vmem:[%s10842_s5 + $0x130] sm:$0xff]  }
  0x5b   : > { %1010 = vmatprep.subr.bf16.mxu1 %v9048_v1  ;;  %7948 = vmatprep.subr.bf16.mxu0 %v8618_v16  ;;  %v8649_v15 = vld [vmem:[%s10842_s5 + $0xf0] sm:$0xff]  }
  0x5c   : > { %v8650_v16 = vld [vmem:[%s10842_s5 + $0x170] sm:$0xff]  }
  0x5e   : > { %1011 = vmatpush1.bf16.msra.mxu1 %v8617_v17  ;;  %7949 = vmatpush3.bf16.msra.mxu0 %v8619_v18  ;;  %v8651_v17 = vld [vmem:[%s10842_s5 + $0x138] sm:$0xff]  }
  0x5f   : > { %1012 = vmatprep.subr.bf16.mxu1 %v9048_v1  ;;  %7950 = vmatprep.subr.bf16.mxu0 %v8621_v19  ;;  %v8652_v18 = vld [vmem:[%s10842_s5 + $0xf8] sm:$0xff]  }
  0x60   : > { %v8653_v19 = vld [vmem:[%s10842_s5 + $0x178] sm:$0xff]  }
  0x62   : > { %1013 = vmatpush1.bf16.msra.mxu1 %v8620_v20  ;;  %7951 = vmatpush3.bf16.msra.mxu0 %v8622_v21  ;;  %v8654_v20 = vld [vmem:[%s10842_s5 + $0x140] sm:$0xff]  }
  0x63   : > { %1014 = vmatprep.subr.bf16.mxu1 %v9048_v1  ;;  %7952 = vmatprep.subr.bf16.mxu0 %v8624_v22  ;;  %v8655_v21 = vld [vmem:[%s10842_s5 + $0x100] sm:$0xff]  }
  0x64   : > { %v8656_v22 = vld [vmem:[%s10842_s5 + $0x180] sm:$0xff]  }
  0x66   : > { %1015 = vmatpush1.bf16.msra.mxu1 %v8623_v23  ;;  %7953 = vmatpush3.bf16.msra.mxu0 %v8625_v24  ;;  %v8657_v23 = vld [vmem:[%s10842_s5 + $0x188] sm:$0xff]   ;;  %v8658_v24 = vld [vmem:[%s10842_s5 + $0x1d0] sm:$0xff]  }
  0x67   : > { %1016 = vmatprep.subr.bf16.mxu1 %v9048_v1  ;;  %7954 = vmatprep.subr.bf16.mxu0 %v8627_v26  ;;  %v8660_v26 = vld [vmem:[%s10842_s5 + $0x1d8] sm:$0xff]  }
  0x6a   : > { %1017 = vmatpush1.bf16.msra.mxu1 %v8626_v25  ;;  %7955 = vmatpush3.bf16.msra.mxu0 %v8628_v27  ;;  %v8659_v25 = vld [vmem:[%s10842_s5 + $0x190] sm:$0xff]   ;;  %v8661_v27 = vld [vmem:[%s10842_s5 + $0x198] sm:$0xff]  }
  0x6b   : > { %1018 = vmatprep.subr.bf16.mxu1 %v9048_v1  ;;  %7956 = vmatprep.subr.bf16.mxu0 %v8630_v29  ;;  %v8663_v29 = vld [vmem:[%s10842_s5 + $0x1a0] sm:$0xff]  }
  0x6e   : > { %1019 = vmatpush1.bf16.msra.mxu1 %v8629_v28  ;;  %7957 = vmatpush3.bf16.msra.mxu0 %v8631_v30  ;;  %v8662_v28 = vld [vmem:[%s10842_s5 + $0x1e0] sm:$0xff]   ;;  %v8664_v30 = vld [vmem:[%s10842_s5 + $0x1e8] sm:$0xff]  }
  0x6f   : > { %1020 = vmatprep.subr.bf16.mxu1 %v9048_v1  ;;  %7964 = vmatprep.subr.bf16.mxu0 %v8633_v32  ;;  %v8666_v32 = vld [vmem:[%s10842_s5 + $0x1f0] sm:$0xff]  }
  0x72   : > { %1021 = vmatpush1.bf16.msra.mxu1 %v8632_v31  ;;  %v8665_v31 = vld [vmem:[%s10842_s5 + $0x1a8] sm:$0xff]  }
  0x73   : > { %1292 = vmatprep.subr.bf16.mxu1 %v9048_v1 }
  0x86   : > { %v324_v33 = vpop.permute.xlu0 %323 }
  0x8a   : > { %v329_v34 = vpop.permute.xlu0 %328 }
 0x124   : > { %v695_v35 = vpop.f32.mrb[0].mxu0  ;;  %v738_v36 = vpop.f32.mrb[0].mxu1 }
 0x125   : > { %v696_v37 = vadd.f32 %v695_v35, %v324_v33  ;;  %v739_v38 = vadd.f32 %v738_v36, %v324_v33  ;;  %v697_v39 = vpop.f32.mrb[1].mxu0  ;;  %v740_v40 = vpop.f32.mrb[1].mxu1  ;;  %v8669_v35 = vld [vmem:[%s10842_s5 + $0x1b8] sm:$0xff]   ;;  %v8670_v36 = vld [vmem:[%s10842_s5 + $0x200] sm:$0xff]  }
 0x126   : > { %v698_v41 = vadd.f32 %v697_v39, %v324_v33  ;;  %v741_v42 = vadd.f32 %v740_v40, %v324_v33  ;;  %v699_v43 = vpop.f32.mrb[2].mxu0  ;;  %v742_v44 = vpop.f32.mrb[2].mxu1  ;;  %v8667_v33 = vld [vmem:[%s10842_s5 + $0x1b0] sm:$0xff]   ;;  %v8673_v39 = vld [vmem:[%s10842_s5 + $0x1c8] sm:$0xff]   ;;  %v8674_v40 = vld [vmem:[%s10842_s5 + $0x298] sm:$0xff]  }
 0x127   : > { %v700_v45 = vadd.f32 %v699_v43, %v329_v34  ;;  %v743_v46 = vadd.f32 %v742_v44, %v329_v34  ;;  %v701_v47 = vpop.f32.mrb[3].mxu0  ;;  %v744_v48 = vpop.f32.mrb[3].mxu1  ;;  %v747_v49 = vmax.f32 %v696_v37, 0.0  ;;  %v749_v50 = vmax.f32 %v739_v38, 0.0  ;;  %v8671_v37 = vld [vmem:[%s10842_s5 + $0x1c0] sm:$0xff]   ;;  %v8672_v38 = vld [vmem:[%s10842_s5 + $0x208] sm:$0xff]  }
 0x128   : > { %v702_v51 = vadd.f32 %v701_v47, %v329_v34  ;;  %v745_v52 = vadd.f32 %v744_v48, %v329_v34  ;;  %v748_v53 = vmax.f32 %v698_v41, 0.0  ;;  %v750_v54 = vmax.f32 %v741_v42, 0.0  ;;  %v8668_v34 = vld [vmem:[%s10842_s5 + $0x1f8] sm:$0xff]   ;;  %v8676_v42 = vld [vmem:[%s10842_s5 + $0x2a0] sm:$0xff]   ;;  %v8678_v44 = vld [vmem:[%s10842_s5 + $0x2a8] sm:$0xff]  }
 0x129   : > { %v751_v55 = vmax.f32 %v700_v45, 0.0  ;;  %v753_v56 = vmax.f32 %v743_v46, 0.0  ;;  %v8675_v41 = vld [vmem:[%s10842_s5 + $0x258] sm:$0xff]   ;;  %v8677_v43 = vld [vmem:[%s10842_s5 + $0x260] sm:$0xff]   ;;  %v8679_v45 = vld [vmem:[%s10842_s5 + $0x268] sm:$0xff]  }
 0x12a   : > { %v752_v57 = vmax.f32 %v702_v51, 0.0  ;;  %v754_v58 = vmax.f32 %v745_v52, 0.0  ;;  %v8680_v46 = vld [vmem:[%s10842_s5 + $0x2b0] sm:$0xff]   ;;  %v8682_v48 = vld [vmem:[%s10842_s5 + $0x2b8] sm:$0xff]   ;;  %v8685_v51 = vld [vmem:[%s10842_s5 + $0x280] sm:$0xff]  }
 0x12b   : > { %v9272_v60 = vpack.c.bf16 %v751_v55, %v747_v49  ;;  %v9274_v61 = vpack.c.bf16 %v753_v56, %v749_v50  ;;  %v8681_v47 = vld [vmem:[%s10842_s5 + $0x270] sm:$0xff]   ;;  %v8683_v49 = vld [vmem:[%s10842_s5 + $0x278] sm:$0xff]   ;;  %v8684_v50 = vld [vmem:[%s10842_s5 + $0x2c0] sm:$0xff]  }
 0x12c   : > { %v9276_v62 = vpack.c.bf16 %v752_v57, %v748_v53  ;;  %v9278_v63 = vpack.c.bf16 %v754_v58, %v750_v54  ;;  %v8686_v52 = vld [vmem:[%s10842_s5 + $0x2c8] sm:$0xff]   ;;  %v8688_v54 = vld [vmem:[%s10842_s5 + $0x2d0] sm:$0xff]   ;;  %v8690_v56 = vld [vmem:[%s10842_s5 + $0x360] sm:$0xff]  }
 0x12d   : > { %v8687_v53 = vld [vmem:[%s10842_s5 + $0x288] sm:$0xff]   ;;  %v8689_v55 = vld [vmem:[%s10842_s5 + $0x290] sm:$0xff]   ;;  %v8691_v57 = vld [vmem:[%s10842_s5 + $0x320] sm:$0xff]  }
 0x12e   : > { %995 = vmatprep.mubr.bf16.mxu0 %v9276_v62  ;;  %6673 = vmatprep.mubr.msk.bf16.mxu1 %vm959_vm0, %v9278_v63  ;;  %v8692_v58 = vld [vmem:[%s10842_s5 + $0x368] sm:$0xff]  }
 0x12f   : > { %996 = vmatmul.mubr.bf16.vlgmr.msra.gmra.mrb[4].mxu0 %v9272_v60  ;;  %1037 = vmatmul.mubr.bf16.vlgmr.msra.gmra.mrb[4].mxu1 %v9274_v61 }
 0x130   : > { %7965 = vmatpush3.bf16.msra.mxu0 %v8634_v59  ;;  %1293 = vmatpush1.bf16.msra.mxu1 %v8635_v0  ;;  %v8693_v59 = vld [vmem:[%s10842_s5 + $0x328] sm:$0xff]   ;;  %v8694_v0 = vld [vmem:[%s10842_s5 + $0x370] sm:$0xff]  }
 0x131   : > { %1283 = vmatprep.mubr.bf16.mxu0 %v9276_v62  ;;  %6749 = vmatprep.mubr.msk.bf16.mxu1 %vm959_vm0, %v9278_v63 }
 0x132   : > { %7966 = vmatprep.subr.bf16.mxu0 %v8636_v2  ;;  %1294 = vmatprep.subr.bf16.mxu1 %v9048_v1  ;;  %v8695_v2 = vld [vmem:[%s10842_s5 + $0x330] sm:$0xff]  }
 0x134   : > { %7967 = vmatpush3.bf16.msra.mxu0 %v8637_v3  ;;  %1295 = vmatpush1.bf16.msra.mxu1 %v8638_v4  ;;  %v8696_v3 = vld [vmem:[%s10842_s5 + $0x378] sm:$0xff]  }
 0x135   : > { %7968 = vmatprep.subr.bf16.mxu0 %v8639_v5  ;;  %1296 = vmatprep.subr.bf16.mxu1 %v9048_v1  ;;  %v8697_v4 = vld [vmem:[%s10842_s5 + $0x338] sm:$0xff]   ;;  %v8698_v5 = vld [vmem:[%s10842_s5 + $0x380] sm:$0xff]  }
 0x138   : > { %7969 = vmatpush3.bf16.msra.mxu0 %v8640_v6  ;;  %1297 = vmatpush1.bf16.msra.mxu1 %v8641_v7  ;;  %v8699_v6 = vld [vmem:[%s10842_s5 + $0x340] sm:$0xff]   ;;  %v8700_v7 = vld [vmem:[%s10842_s5 + $0x388] sm:$0xff]  }
 0x139   : > { %7970 = vmatprep.subr.bf16.mxu0 %v8642_v8  ;;  %1298 = vmatprep.subr.bf16.mxu1 %v9048_v1  ;;  %v8701_v8 = vld [vmem:[%s10842_s5 + $0x348] sm:$0xff]  }
 0x13c   : > { %7971 = vmatpush3.bf16.msra.mxu0 %v8643_v9  ;;  %1299 = vmatpush1.bf16.msra.mxu1 %v8644_v10  ;;  %v8702_v9 = vld [vmem:[%s10842_s5 + $0x390] sm:$0xff]  }
 0x13d   : > { %7972 = vmatprep.subr.bf16.mxu0 %v8645_v11  ;;  %1300 = vmatprep.subr.bf16.mxu1 %v9048_v1  ;;  %v8703_v10 = vld [vmem:[%s10842_s5 + $0x350] sm:$0xff]   ;;  %v8704_v11 = vld [vmem:[%s10842_s5 + $0x398] sm:$0xff]  }
 0x140   : > { %7973 = vmatpush3.bf16.msra.mxu0 %v8646_v12  ;;  %1301 = vmatpush1.bf16.msra.mxu1 %v8647_v13  ;;  %v8705_v12 = vld [vmem:[%s10842_s5 + $0x358] sm:$0xff]   ;;  %v8706_v13 = vld [vmem:[%s10842_s5 + $0x428] sm:$0xff]  }
 0x141   : > { %7974 = vmatprep.subr.bf16.mxu0 %v8648_v14  ;;  %1302 = vmatprep.subr.bf16.mxu1 %v9048_v1  ;;  %v8745_v14 = vld [vmem:[%s10840_s3 + $0x10] sm:$0xff]  }
 0x144   : > { %7975 = vmatpush3.bf16.msra.mxu0 %v8649_v15  ;;  %1303 = vmatpush1.bf16.msra.mxu1 %v8650_v16  ;;  %v8707_v15 = vld [vmem:[%s10842_s5 + $0x3e8] sm:$0xff]   ;;  %v8708_v16 = vld [vmem:[%s10842_s5 + $0x430] sm:$0xff]  }
 0x145   : > { %7976 = vmatprep.subr.bf16.mxu0 %v8651_v17  ;;  %1304 = vmatprep.subr.bf16.mxu1 %v9048_v1  ;;  %v8709_v17 = vld [vmem:[%s10842_s5 + $0x3f0] sm:$0xff]  }
 0x148   : > { %7977 = vmatpush3.bf16.msra.mxu0 %v8652_v18  ;;  %1305 = vmatpush1.bf16.msra.mxu1 %v8653_v19  ;;  %v8710_v18 = vld [vmem:[%s10842_s5 + $0x438] sm:$0xff]  }
 0x149   : > { %7978 = vmatprep.subr.bf16.mxu0 %v8654_v20  ;;  %1306 = vmatprep.subr.bf16.mxu1 %v9048_v1  ;;  %v8711_v19 = vld [vmem:[%s10842_s5 + $0x3f8] sm:$0xff]   ;;  %v8712_v20 = vld [vmem:[%s10842_s5 + $0x440] sm:$0xff]  }
 0x14c   : > { %7979 = vmatpush3.bf16.msra.mxu0 %v8655_v21  ;;  %1307 = vmatpush1.bf16.msra.mxu1 %v8656_v22  ;;  %v8713_v21 = vld [vmem:[%s10842_s5 + $0x400] sm:$0xff]   ;;  %v8714_v22 = vld [vmem:[%s10842_s5 + $0x448] sm:$0xff]  }
 0x14d   : > { %1308 = vmatprep.subr.bf16.mxu1 %v9048_v1 }
 0x14f   : > { %1284 = vmatmul.mubr.bf16.vlgmr.msra.gmra.mrb[8].mxu0 %v9272_v60 }
 0x150   : > { %1309 = vmatpush1.bf16.msra.mxu1 %v8657_v23  ;;  %8344 = vmatprep.mubr.msk.bf16.mxu0 %vm959_vm0, %v8745_v14  ;;  %v8715_v23 = vld [vmem:[%s10842_s5 + $0x408] sm:$0xff]  }
 0x151   : > { %7992 = vmatprep.subr.bf16.mxu1 %v8658_v24  ;;  %v8716_v24 = vld [vmem:[%s10842_s5 + $0x450] sm:$0xff]  }
 0x153   : > { %1325 = vmatmul.mubr.bf16.vlgmr.msra.gmra.mrb[8].mxu1 %v9274_v61 }
 0x154   : > { %7993 = vmatpush3.bf16.msra.mxu1 %v8659_v25  ;;  %1702 = vmatprep.mubr.bf16.mxu1 %v9276_v62  ;;  %v8717_v25 = vld [vmem:[%s10842_s5 + $0x410] sm:$0xff]  }
 0x155   : > { %7994 = vmatprep.subr.bf16.mxu1 %v8660_v26  ;;  %v8718_v26 = vld [vmem:[%s10842_s5 + $0x458] sm:$0xff]  }
 0x158   : > { %7995 = vmatpush3.bf16.msra.mxu1 %v8661_v27  ;;  %v8719_v27 = vld [vmem:[%s10842_s5 + $0x418] sm:$0xff]  }
 0x159   : > { %7996 = vmatprep.subr.bf16.mxu1 %v8662_v28  ;;  %v8720_v28 = vld [vmem:[%s10842_s5 + $0x460] sm:$0xff]  }
 0x15c   : > { %7997 = vmatpush3.bf16.msra.mxu1 %v8663_v29  ;;  %v8721_v29 = vld [vmem:[%s10842_s5 + $0x420] sm:$0xff]  }
 0x15d   : > { %7998 = vmatprep.subr.bf16.mxu1 %v8664_v30  ;;  %v8722_v30 = vld [vmem:[%s10842_s5 + $0x468] sm:$0xff]  }
 0x160   : > { %7999 = vmatpush3.bf16.msra.mxu1 %v8665_v31  ;;  %v8723_v31 = vld [vmem:[%s10842_s5 + $0x470] sm:$0xff]  }
 0x161   : > { %8000 = vmatprep.subr.bf16.mxu1 %v8666_v32  ;;  %v8724_v32 = vld [vmem:[%s10842_s5 + $0x478] sm:$0xff]  }
 0x164   : > { %8001 = vmatpush3.bf16.msra.mxu1 %v8667_v33  ;;  %v8725_v33 = vld [vmem:[%s10842_s5 + $0x480] sm:$0xff]  }
 0x165   : > { %8002 = vmatprep.subr.bf16.mxu1 %v8668_v34  ;;  %v8726_v34 = vld [vmem:[%s10842_s5 + $0x488] sm:$0xff]  }
 0x168   : > { %8003 = vmatpush3.bf16.msra.mxu1 %v8669_v35  ;;  %v8727_v35 = vld [vmem:[%s10842_s5 + $0x490] sm:$0xff]  }
 0x169   : > { %8004 = vmatprep.subr.bf16.mxu1 %v8670_v36  ;;  %v8728_v36 = vld [vmem:[%s10842_s5 + $0x498] sm:$0xff]  }
 0x16c   : > { %8005 = vmatpush3.bf16.msra.mxu1 %v8671_v37  ;;  %v8729_v37 = vld [vmem:[%s10842_s5 + $0x4a0] sm:$0xff]  }
 0x16d   : > { %8006 = vmatprep.subr.bf16.mxu1 %v8672_v38  ;;  %v8730_v38 = vld [vmem:[%s10842_s5 + $0x4a8] sm:$0xff]  }
 0x170   : > { %8007 = vmatpush3.bf16.msra.mxu1 %v8673_v39  ;;  %v8731_v39 = vld [vmem:[%s10842_s5 + $0x530] sm:$0xff]  }
 0x171   : > { %8017 = vmatprep.subr.bf16.mxu1 %v8674_v40  ;;  %v8732_v40 = vld [vmem:[%s10842_s5 + $0x538] sm:$0xff]  }
 0x173   : > { %1703 = vmatmul.mubr.bf16.vlgmr.msra.gmra.mrb[12].mxu1 %v9272_v60 }
 0x174   : > { %8018 = vmatpush3.bf16.msra.mxu1 %v8675_v41  ;;  %2060 = vmatprep.mubr.bf16.mxu1 %v9276_v62  ;;  %v8733_v41 = vld [vmem:[%s10842_s5 + $0x540] sm:$0xff]  }
 0x175   : > { %8019 = vmatprep.subr.bf16.mxu1 %v8676_v42  ;;  %v8734_v42 = vld [vmem:[%s10842_s5 + $0x548] sm:$0xff]  }
 0x178   : > { %8020 = vmatpush3.bf16.msra.mxu1 %v8677_v43 }
 0x179   : > { %8021 = vmatprep.subr.bf16.mxu1 %v8678_v44 }
 0x17c   : > { %8022 = vmatpush3.bf16.msra.mxu1 %v8679_v45 }
 0x17d   : > { %8023 = vmatprep.subr.bf16.mxu1 %v8680_v46 }
 0x180   : > { %8024 = vmatpush3.bf16.msra.mxu1 %v8681_v47 }
 0x181   : > { %8025 = vmatprep.subr.bf16.mxu1 %v8682_v48 }
 0x184   : > { %8026 = vmatpush3.bf16.msra.mxu1 %v8683_v49 }
 0x185   : > { %8027 = vmatprep.subr.bf16.mxu1 %v8684_v50  ;;  %v8735_v50 = vld [vmem:[%s10842_s5 + $0x550] sm:$0xff]  }
 0x188   : > { %8028 = vmatpush3.bf16.msra.mxu1 %v8685_v51 }
 0x189   : > { %8029 = vmatprep.subr.bf16.mxu1 %v8686_v52 }
 0x18c   : > { %8030 = vmatpush3.bf16.msra.mxu1 %v8687_v53 }
 0x18d   : > { %8031 = vmatprep.subr.bf16.mxu1 %v8688_v54 }
 0x190   : > { %8032 = vmatpush3.bf16.msra.mxu1 %v8689_v55 }
 0x191   : > { %8042 = vmatprep.subr.bf16.mxu1 %v8690_v56  ;;  %v8736_v56 = vld [vmem:[%s10842_s5 + $0x558] sm:$0xff]  }
 0x193   : > { %2061 = vmatmul.mubr.bf16.vlgmr.msra.gmra.mrb[16].mxu1 %v9272_v60 }
 0x194   : > { %8043 = vmatpush3.bf16.msra.mxu1 %v8691_v57  ;;  %2418 = vmatprep.mubr.bf16.mxu1 %v9276_v62 }
 0x195   : > { %8044 = vmatprep.subr.bf16.mxu1 %v8692_v58  ;;  %v8737_v58 = vld [vmem:[%s10842_s5 + $0x560] sm:$0xff]  }
 0x198   : > { %8045 = vmatpush3.bf16.msra.mxu1 %v8693_v59  ;;  %v8738_v59 = vld [vmem:[%s10842_s5 + $0x568] sm:$0xff]  }
 0x199   : > { %8046 = vmatprep.subr.bf16.mxu1 %v8694_v0  ;;  %v8739_v0 = vld [vmem:[%s10842_s5 + $0x570] sm:$0xff]  }
 0x19c   : > { %8047 = vmatpush3.bf16.msra.mxu1 %v8695_v2  ;;  %v8740_v2 = vld [vmem:[%s10842_s5 + $0x5f8] sm:$0xff]  }
 0x19d   : > { %8048 = vmatprep.subr.bf16.mxu1 %v8696_v3  ;;  %v8741_v3 = vld [vmem:[%s10842_s5 + $0x600] sm:$0xff]  }
 0x1a0   : > { %8049 = vmatpush3.bf16.msra.mxu1 %v8697_v4  ;;  %v8742_v4 = vld [vmem:[%s10842_s5 + $0x608] sm:$0xff]  }
 0x1a1   : > { %8050 = vmatprep.subr.bf16.mxu1 %v8698_v5 }
 0x1a4   : > { %8051 = vmatpush3.bf16.msra.mxu1 %v8699_v6 }
 0x1a5   : > { %8052 = vmatprep.subr.bf16.mxu1 %v8700_v7 }
 0x1a8   : > { %8053 = vmatpush3.bf16.msra.mxu1 %v8701_v8 }
 0x1a9   : > { %8054 = vmatprep.subr.bf16.mxu1 %v8702_v9  ;;  %v8743_v9 = vld [vmem:[%s10842_s5 + $0x610] sm:$0xff]  }
 0x1ac   : > { %8055 = vmatpush3.bf16.msra.mxu1 %v8703_v10 }
 0x1ad   : > { %8056 = vmatprep.subr.bf16.mxu1 %v8704_v11 }
 0x1b0   : > { %8057 = vmatpush3.bf16.msra.mxu1 %v8705_v12 }
 0x1b1   : > { %8067 = vmatprep.subr.bf16.mxu1 %v8706_v13 }
 0x1b3   : > { %2419 = vmatmul.mubr.bf16.vlgmr.msra.gmra.mrb[20].mxu1 %v9272_v60 }
 0x1b4   : > { %8068 = vmatpush3.bf16.msra.mxu1 %v8707_v15  ;;  %2776 = vmatprep.mubr.bf16.mxu1 %v9276_v62 }
 0x1b5   : > { %8069 = vmatprep.subr.bf16.mxu1 %v8708_v16  ;;  %v8744_v16 = vld [vmem:[%s10842_s5 + $0x618] sm:$0xff]  }
 0x1b8   : > { %8070 = vmatpush3.bf16.msra.mxu1 %v8709_v17 }
 0x1b9   : > { %8071 = vmatprep.subr.bf16.mxu1 %v8710_v18 }
 0x1bc   : > { %8072 = vmatpush3.bf16.msra.mxu1 %v8711_v19 }
 0x1bd   : > { %8073 = vmatprep.subr.bf16.mxu1 %v8712_v20  ;;  %v8746_v20 = vld [vmem:[%s10842_s5 + $0x620] sm:$0xff]  }
 0x1c0   : > { %8074 = vmatpush3.bf16.msra.mxu1 %v8713_v21  ;;  %v8747_v21 = vld [vmem:[%s10840_s3 + $0x18] sm:$0xff]  }
 0x1c1   : > { %8075 = vmatprep.subr.bf16.mxu1 %v8714_v22  ;;  %v8750_v22 = vld [vmem:[%s10840_s3] sm:$0xff]  }
 0x1c4   : > { %8076 = vmatpush3.bf16.msra.mxu1 %v8715_v23  ;;  %v8748_v23 = vld [vmem:[%s10842_s5 + $0x628] sm:$0xff]  }
 0x1c5   : > { %8077 = vmatprep.subr.bf16.mxu1 %v8716_v24  ;;  %v8749_v24 = vld [vmem:[%s10842_s5 + $0x630] sm:$0xff]  }
 0x1c8   : > { %8078 = vmatpush3.bf16.msra.mxu1 %v8717_v25  ;;  %v8751_v25 = vld [vmem:[%s10842_s5 + $0x638] sm:$0xff]  }
 0x1c9   : > { %8079 = vmatprep.subr.bf16.mxu1 %v8718_v26  ;;  %v8752_v26 = vld [vmem:[%s10840_s3 + $0x8] sm:$0xff]  }
 0x1cc   : > { %8080 = vmatpush3.bf16.msra.mxu1 %v8719_v27  ;;  %v8753_v27 = vld [vmem:[%s10842_s5 + $0x210] sm:$0xff]  }
 0x1cd   : > { %8081 = vmatprep.subr.bf16.mxu1 %v8720_v28  ;;  %v8754_v28 = vld [vmem:[%s10842_s5 + $0x6c0] sm:$0xff]  }
 0x1d0   : > { %8082 = vmatpush3.bf16.msra.mxu1 %v8721_v29  ;;  %v8755_v29 = vld [vmem:[%s10842_s5 + $0x218] sm:$0xff]  }
 0x1d1   : > { %2785 = vmatprep.subr.bf16.mxu1 %v9048_v1 }
 0x1d3   : > { %2777 = vmatmul.mubr.bf16.vlgmr.msra.gmra.mrb[24].mxu1 %v9272_v60 }
 0x1d4   : > { %2786 = vmatpush1.bf16.msra.mxu1 %v8722_v30  ;;  %7089 = vmatprep.mubr.msk.bf16.mxu1 %vm959_vm0, %v9278_v63  ;;  %v8756_v30 = vld [vmem:[%s10842_s5 + $0x6c8] sm:$0xff]  }
 0x1d5   : > { %2787 = vmatprep.subr.bf16.mxu1 %v9048_v1 }
 0x1d8   : > { %2788 = vmatpush1.bf16.msra.mxu1 %v8723_v31  ;;  %v8757_v31 = vld [vmem:[%s10842_s5 + $0x220] sm:$0xff]  }
 0x1d9   : > { %2789 = vmatprep.subr.bf16.mxu1 %v9048_v1 }
 0x1dc   : > { %2790 = vmatpush1.bf16.msra.mxu1 %v8724_v32  ;;  %v8758_v32 = vld [vmem:[%s10842_s5 + $0x6d0] sm:$0xff]  }
 0x1dd   : > { %2791 = vmatprep.subr.bf16.mxu1 %v9048_v1 }
 0x1e0   : > { %2792 = vmatpush1.bf16.msra.mxu1 %v8725_v33 }
 0x1e1   : > { %2793 = vmatprep.subr.bf16.mxu1 %v9048_v1 }
 0x1e4   : > { %2794 = vmatpush1.bf16.msra.mxu1 %v8726_v34  ;;  %v8759_v34 = vld [vmem:[%s10842_s5 + $0x228] sm:$0xff]  }
 0x1e5   : > { %2795 = vmatprep.subr.bf16.mxu1 %v9048_v1 }
 0x1e8   : > { %2796 = vmatpush1.bf16.msra.mxu1 %v8727_v35 }
 0x1e9   : > { %2797 = vmatprep.subr.bf16.mxu1 %v9048_v1 }
 0x1ec   : > { %2798 = vmatpush1.bf16.msra.mxu1 %v8728_v36 }
 0x1ed   : > { %2799 = vmatprep.subr.bf16.mxu1 %v9048_v1 }
 0x1f0   : > { %2800 = vmatpush1.bf16.msra.mxu1 %v8729_v37 }
 0x1f1   : > { %2801 = vmatprep.subr.bf16.mxu1 %v9048_v1 }
 0x1f4   : > { %2802 = vmatpush1.bf16.msra.mxu1 %v8730_v38  ;;  %v8760_v38 = vld [vmem:[%s10842_s5 + $0x6d8] sm:$0xff]  }
 0x1f5   : > { %3143 = vmatprep.subr.bf16.mxu1 %v9048_v1 }
 0x1f7   : > { %2818 = vmatmul.mubr.bf16.vlgmr.msra.gmra.mrb[28].mxu1 %v9274_v61 }
 0x1f8   : > { %3144 = vmatpush1.bf16.msra.mxu1 %v8731_v39  ;;  %7173 = vmatprep.mubr.msk.bf16.mxu1 %vm959_vm0, %v9278_v63 }
 0x1f9   : > { %3145 = vmatprep.subr.bf16.mxu1 %v9048_v1 }
 0x1fc   : > { %3146 = vmatpush1.bf16.msra.mxu1 %v8732_v40 }
 0x1fd   : > { %3147 = vmatprep.subr.bf16.mxu1 %v9048_v1 }
 0x200   : > { %3148 = vmatpush1.bf16.msra.mxu1 %v8733_v41  ;;  %v8761_v41 = vld [vmem:[%s10842_s5 + $0x230] sm:$0xff]  }
 0x201   : > { %3149 = vmatprep.subr.bf16.mxu1 %v9048_v1 }
 0x202   : > { %v7958_v43 = vpop.f32.mrb[4].mxu0  ;;  %v1038_v44 = vpop.f32.mrb[4].mxu1 }
 0x203   : > { %v7959_v45 = vpop.f32.mrb[5].mxu0  ;;  %v1040_v46 = vpop.f32.mrb[5].mxu1 }
 0x204   : > { %v7960_v47 = vadd.f32 %v7959_v45, %v7958_v43  ;;  %3150 = vmatpush1.bf16.msra.mxu1 %v8734_v42  ;;  %v7961_v48 = vpop.f32.mrb[6].mxu0  ;;  %v1041_v49 = vpop.f32.mrb[6].mxu1  ;;  %v8762_v42 = vld [vmem:[%s10842_s5 + $0x6e0] sm:$0xff]   ;;  %v8763_v43 = vld [vmem:[%s10842_s5 + $0x238] sm:$0xff]   ;;  %v8766_v46 = vld [vmem:[%s10842_s5 + $0x6f0] sm:$0xff]  }
 0x205   : > { %v7962_v51 = vpop.f32.mrb[7].mxu0  ;;  %v1043_v52 = vpop.f32.mrb[7].mxu1  ;;  %3151 = vmatprep.subr.bf16.mxu1 %v9048_v1  ;;  %v8765_v45 = vld [vmem:[%s10842_s5 + $0x240] sm:$0xff]  }
 0x206   : > { %v1039_v53 = vadd.f32 %v7960_v47, %v1038_v44  ;;  %v7963_v54 = vadd.f32 %v7962_v51, %v7961_v48  ;;  %v8764_v44 = vld [vmem:[%s10842_s5 + $0x6e8] sm:$0xff]   ;;  %v8768_v48 = vld [vmem:[%s10842_s5 + $0x6f8] sm:$0xff]   ;;  %v8772_v52 = vld [vmem:[%s10842_s5 + $0x790] sm:$0xff]  }
 0x207   : > { %v8767_v47 = vld [vmem:[%s10842_s5 + $0x248] sm:$0xff]  }
 0x208   : > { %v1042_v55 = vadd.f32 %v7963_v54, %v1041_v49  ;;  %3152 = vmatpush1.bf16.msra.mxu1 %v8735_v50  ;;  %v8769_v49 = vld [vmem:[%s10842_s5 + $0x250] sm:$0xff]   ;;  %v8770_v50 = vld [vmem:[%s10842_s5 + $0x700] sm:$0xff]   ;;  %v8771_v51 = vld [vmem:[%s10842_s5 + $0x788] sm:$0xff]  }
 0x209   : > { %3153 = vmatprep.subr.bf16.mxu1 %v9048_v1 }
 0x20a   : > { %v1049_v57 = vpack.c.bf16 %v1042_v55, %v1039_v53 }
 0x20c   : > { %3154 = vmatpush1.bf16.msra.mxu1 %v8736_v56 }
 0x20d   : > { %3155 = vmatprep.subr.bf16.mxu1 %v9048_v1 }
 0x210   : > { %3156 = vmatpush1.bf16.msra.mxu1 %v8737_v58 }
 0x211   : > { %3157 = vmatprep.subr.bf16.mxu1 %v9048_v1 }
 0x214   : > { %3158 = vmatpush1.bf16.msra.mxu1 %v8738_v59 }
 0x215   : > { %3159 = vmatprep.subr.bf16.mxu1 %v9048_v1 }
 0x218   : > { %3160 = vmatpush1.bf16.msra.mxu1 %v8739_v0  ;;  %v8774_v0 = vld [vmem:[%s10842_s5 + $0x7a0] sm:$0xff]  }
 0x219   : > { %3501 = vmatprep.subr.bf16.mxu1 %v9048_v1 }
 0x21b   : > { %3176 = vmatmul.mubr.bf16.vlgmr.msra.gmra.mrb[32].mxu1 %v9274_v61 }
 0x21c   : > { %3502 = vmatpush1.bf16.msra.mxu1 %v8740_v2  ;;  %7257 = vmatprep.mubr.msk.bf16.mxu1 %vm959_vm0, %v9278_v63  ;;  %v8775_v2 = vld [vmem:[%s10842_s5 + $0x7a8] sm:$0xff]  }
 0x21d   : > { %3503 = vmatprep.subr.bf16.mxu1 %v9048_v1 }
 0x220   : > { %3504 = vmatpush1.bf16.msra.mxu1 %v8741_v3  ;;  %v8776_v3 = vld [vmem:[%s10842_s5 + $0x7b0] sm:$0xff]  }
 0x221   : > { %3505 = vmatprep.subr.bf16.mxu1 %v9048_v1 }
 0x222   : > { %v7980_v5 = vpop.f32.mrb[8].mxu0 }
 0x223   : > { %v7981_v6 = vpop.f32.mrb[9].mxu0 }
 0x224   : > { %v7982_v7 = vadd.f32 %v7981_v6, %v7980_v5  ;;  %v7983_v8 = vpop.f32.mrb[10].mxu0  ;;  %3506 = vmatpush1.bf16.msra.mxu1 %v8742_v4  ;;  %v8777_v4 = vld [vmem:[%s10842_s5 + $0x7b8] sm:$0xff]   ;;  %v8778_v5 = vld [vmem:[%s10842_s5 + $0x7c0] sm:$0xff]   ;;  %v8779_v6 = vld [vmem:[%s10842_s5 + $0x7c8] sm:$0xff]  }
 0x225   : > { %v7984_v10 = vpop.f32.mrb[11].mxu0  ;;  %3507 = vmatprep.subr.bf16.mxu1 %v9048_v1 }
 0x226   : > { %v7985_v11 = vadd.f32 %v7984_v10, %v7983_v8  ;;  %v1326_v12 = vpop.f32.mrb[8].mxu1 }
 0x227   : > { %v1327_v13 = vadd.f32 %v7982_v7, %v1326_v12  ;;  %v1328_v14 = vpop.f32.mrb[9].mxu1  ;;  %v8780_v7 = vld [vmem:[%s10842_s5 + $0x850] sm:$0xff]   ;;  %v8781_v12 = vld [vmem:[%s10842_s5 + $0x858] sm:$0xff]  }
 0x228   : > { %v1329_v15 = vpop.f32.mrb[10].mxu1  ;;  %3508 = vmatpush1.bf16.msra.mxu1 %v8743_v9 }
 0x229   : > { %v1330_v17 = vadd.f32 %v7985_v11, %v1329_v15  ;;  %v1331_v18 = vpop.f32.mrb[11].mxu1  ;;  %3509 = vmatprep.subr.bf16.mxu1 %v9048_v1  ;;  %v8782_v15 = vld [vmem:[%s10842_s5 + $0x860] sm:$0xff]  }
 0x22a   : > { %v8785_v18 = vld [vmem:[%s10842_s5 + $0x878] sm:$0xff]  }
 0x22b   : > { %v1338_v19 = vpack.c.bf16 %v1330_v17, %v1327_v13  ;;  %v8784_v17 = vld [vmem:[%s10842_s5 + $0x870] sm:$0xff]  }
 0x22c   : > { %3510 = vmatpush1.bf16.msra.mxu1 %v8744_v16  ;;  %v8783_v16 = vld [vmem:[%s10842_s5 + $0x868] sm:$0xff]  }
 0x22d   : > { %8342 = vmatprep.subr.bf16.mxu0 %v1338_v19  ;;  %3511 = vmatprep.subr.bf16.mxu1 %v9048_v1 }
 0x22e   : > { %8343 = vmatpush3.bf16.msra.mxu0 %v1338_v19  ;;  %v8786_v19 = vld [vmem:[%s10842_s5 + $0x880] sm:$0xff]  }
 0x22f   : > { %8348 = vmatprep.subr.bf16.mxu0 %v1049_v57 }
 0x230   : > { %3512 = vmatpush1.bf16.msra.mxu1 %v8746_v20  ;;  %v8787_v20 = vld [vmem:[%s10842_s5 + $0x888] sm:$0xff]  }
 0x231   : > { %8345 = vmatmul.mubr.msk.bf16.vlgmr.msra.gmra.mrb[12].mxu0 %vm959_vm0, %v8747_v21  ;;  %3513 = vmatprep.subr.bf16.mxu1 %v9048_v1  ;;  %v8788_v21 = vld [vmem:[%s10842_s5 + $0x890] sm:$0xff]  }
 0x232   : > { %8349 = vmatpush3.bf16.msra.mxu0 %v1049_v57  ;;  %8350 = vmatprep.mubr.msk.bf16.mxu0 %vm959_vm0, %v8750_v22  ;;  %v8773_v57 = vld [vmem:[%s10842_s5 + $0x798] sm:$0xff]  }
 0x233   : > { %1711 = vmatprep.subr.bf16.mxu0 %v9048_v1  ;;  %v8789_v22 = vld [vmem:[%s10842_s5 + $0x8d8] sm:$0xff]  }
 0x234   : > { %3514 = vmatpush1.bf16.msra.mxu1 %v8748_v23 }
 0x235   : > { %3515 = vmatprep.subr.bf16.mxu1 %v9048_v1 }
 0x238   : > { %3516 = vmatpush1.bf16.msra.mxu1 %v8749_v24 }
 0x239   : > { %3517 = vmatprep.subr.bf16.mxu1 %v9048_v1 }
 0x23c   : > { %3518 = vmatpush1.bf16.msra.mxu1 %v8751_v25 }
 0x23d   : > { %8351 = vmatmul.mubr.msk.bf16.vlgmr.msra.gmra.mrb[12].mxu0 %vm959_vm0, %v8752_v26  ;;  %3859 = vmatprep.subr.bf16.mxu1 %v9048_v1 }
 0x23e   : > { %1712 = vmatpush1.bf16.msra.mxu0 %v8753_v27  ;;  %6837 = vmatprep.mubr.msk.bf16.mxu0 %vm959_vm0, %v9278_v63  ;;  %v8790_v27 = vld [vmem:[%s10842_s5 + $0x898] sm:$0xff]  }
 0x23f   : > { %3534 = vmatmul.mubr.bf16.vlgmr.msra.gmra.mrb[36].mxu1 %v9274_v61  ;;  %1713 = vmatprep.subr.bf16.mxu0 %v9048_v1 }
 0x240   : > { %3860 = vmatpush1.bf16.msra.mxu1 %v8754_v28  ;;  %7341 = vmatprep.mubr.msk.bf16.mxu1 %vm959_vm0, %v9278_v63 }
 0x241   : > { %3861 = vmatprep.subr.bf16.mxu1 %v9048_v1 }
 0x242   : > { %1714 = vmatpush1.bf16.msra.mxu0 %v8755_v29  ;;  %v8791_v29 = vld [vmem:[%s10842_s5 + $0x8e0] sm:$0xff]  }
 0x243   : > { %1715 = vmatprep.subr.bf16.mxu0 %v9048_v1 }
 0x244   : > { %3862 = vmatpush1.bf16.msra.mxu1 %v8756_v30 }
 0x245   : > { %3863 = vmatprep.subr.bf16.mxu1 %v9048_v1 }
 0x246   : > { %1716 = vmatpush1.bf16.msra.mxu0 %v8757_v31  ;;  %v8008_v33 = vpop.f32.mrb[12].mxu1  ;;  %v8792_v31 = vld [vmem:[%s10842_s5 + $0x8a0] sm:$0xff]  }
 0x247   : > { %v8009_v35 = vpop.f32.mrb[13].mxu1  ;;  %1717 = vmatprep.subr.bf16.mxu0 %v9048_v1 }
 0x248   : > { %v9732_v36 = vadd.f32 %v8009_v35, %v8008_v33  ;;  %v8011_v37 = vpop.f32.mrb[14].mxu1  ;;  %3864 = vmatpush1.bf16.msra.mxu1 %v8758_v32  ;;  %v8793_v32 = vld [vmem:[%s10842_s5 + $0x8e8] sm:$0xff]   ;;  %v8796_v35 = vld [vmem:[%s10842_s5 + $0x8b0] sm:$0xff]  }
 0x249   : > { %v8012_v39 = vpop.f32.mrb[15].mxu1  ;;  %3865 = vmatprep.subr.bf16.mxu1 %v9048_v1  ;;  %v8794_v33 = vld [vmem:[%s10842_s5 + $0x8a8] sm:$0xff]  }
 0x24a   : > { %v9738_v40 = vadd.f32 %v8012_v39, %v8011_v37  ;;  %1718 = vmatpush1.bf16.msra.mxu0 %v8759_v34  ;;  %v8795_v34 = vld [vmem:[%s10842_s5 + $0x8f0] sm:$0xff]   ;;  %v8797_v37 = vld [vmem:[%s10842_s5 + $0x8f8] sm:$0xff]   ;;  %v8799_v39 = vld [vmem:[%s10842_s5 + $0x900] sm:$0xff]  }
 0x24b   : > { %1719 = vmatprep.subr.bf16.mxu0 %v9048_v1 }
 0x24c   : > { %3866 = vmatpush1.bf16.msra.mxu1 %v8760_v38  ;;  %v8798_v38 = vld [vmem:[%s10842_s5 + $0x8b8] sm:$0xff]  }
 0x24d   : > { %3867 = vmatprep.subr.bf16.mxu1 %v9048_v1 }
 0x24e   : > { %1720 = vmatpush1.bf16.msra.mxu0 %v8761_v41  ;;  %v8800_v41 = vld [vmem:[%s10842_s5 + $0x8c0] sm:$0xff]  }
 0x24f   : > { %1721 = vmatprep.subr.bf16.mxu0 %v9048_v1 }
 0x250   : > { %3868 = vmatpush1.bf16.msra.mxu1 %v8762_v42  ;;  %v8858_v42 = vld [vmem:[%s10840_s3 + $0x20] sm:$0xff]  }
 0x251   : > { %3869 = vmatprep.subr.bf16.mxu1 %v9048_v1 }
 0x252   : > { %1722 = vmatpush1.bf16.msra.mxu0 %v8763_v43  ;;  %v8801_v43 = vld [vmem:[%s10842_s5 + $0x908] sm:$0xff]  }
 0x253   : > { %1723 = vmatprep.subr.bf16.mxu0 %v9048_v1 }
 0x254   : > { %3870 = vmatpush1.bf16.msra.mxu1 %v8764_v44  ;;  %v8802_v44 = vld [vmem:[%s10842_s5 + $0x8c8] sm:$0xff]  }
 0x255   : > { %3871 = vmatprep.subr.bf16.mxu1 %v9048_v1 }
 0x256   : > { %1724 = vmatpush1.bf16.msra.mxu0 %v8765_v45  ;;  %v8803_v45 = vld [vmem:[%s10842_s5 + $0x910] sm:$0xff]  }
 0x257   : > { %1725 = vmatprep.subr.bf16.mxu0 %v9048_v1 }
 0x258   : > { %3872 = vmatpush1.bf16.msra.mxu1 %v8766_v46  ;;  %v8804_v46 = vld [vmem:[%s10842_s5 + $0x8d0] sm:$0xff]  }
 0x259   : > { %3873 = vmatprep.subr.bf16.mxu1 %v9048_v1 }
 0x25a   : > { %1726 = vmatpush1.bf16.msra.mxu0 %v8767_v47  ;;  %v8805_v47 = vld [vmem:[%s10842_s5 + $0x9a0] sm:$0xff]  }
 0x25b   : > { %1727 = vmatprep.subr.bf16.mxu0 %v9048_v1 }
 0x25c   : > { %3874 = vmatpush1.bf16.msra.mxu1 %v8768_v48  ;;  %v8806_v48 = vld [vmem:[%s10842_s5 + $0x960] sm:$0xff]  }
 0x25d   : > { %3875 = vmatprep.subr.bf16.mxu1 %v9048_v1 }
 0x25e   : > { %1728 = vmatpush1.bf16.msra.mxu0 %v8769_v49  ;;  %v8807_v49 = vld [vmem:[%s10842_s5 + $0x9a8] sm:$0xff]  }
 0x260   : > { %3876 = vmatpush1.bf16.msra.mxu1 %v8770_v50 }
 0x261   : > { %1744 = vmatmul.mubr.bf16.vlgmr.msra.gmra.mrb[16].mxu0 %v9274_v61  ;;  %4217 = vmatprep.subr.bf16.mxu1 %v9048_v1 }
 0x262   : > { %8356 = vmatprep.mubr.msk.bf16.mxu0 %vm959_vm0, %v8858_v42  ;;  %v8842_v42 = vld [vmem:[%s10842_s5 + $0xb00] sm:$0xff]  }
 0x263   : > { %3892 = vmatmul.mubr.bf16.vlgmr.msra.gmra.mrb[40].mxu1 %v9274_v61 }
 0x264   : > { %4218 = vmatpush1.bf16.msra.mxu1 %v8771_v51  ;;  %7425 = vmatprep.mubr.msk.bf16.mxu1 %vm959_vm0, %v9278_v63 }
 0x265   : > { %4219 = vmatprep.subr.bf16.mxu1 %v9048_v1 }
 0x266   : > { %v8033_v53 = vpop.f32.mrb[16].mxu1 }
 0x267   : > { %v8034_v54 = vpop.f32.mrb[17].mxu1 }
 0x268   : > { %v9792_v55 = vadd.f32 %v8034_v54, %v8033_v53  ;;  %v8036_v56 = vpop.f32.mrb[18].mxu1  ;;  %4220 = vmatpush1.bf16.msra.mxu1 %v8772_v52  ;;  %v8808_v54 = vld [vmem:[%s10842_s5 + $0x968] sm:$0xff]  }
 0x269   : > { %v8037_v58 = vpop.f32.mrb[19].mxu1  ;;  %4221 = vmatprep.subr.bf16.mxu1 %v9048_v1 }
 0x26a   : > { %v9798_v59 = vadd.f32 %v8037_v58, %v8036_v56  ;;  %v8809_v58 = vld [vmem:[%s10842_s5 + $0x9b0] sm:$0xff]  }
 0x26c   : > { %4222 = vmatpush1.bf16.msra.mxu1 %v8773_v57 }
 0x26d   : > { %4223 = vmatprep.subr.bf16.mxu1 %v9048_v1 }
 0x270   : > { %4224 = vmatpush1.bf16.msra.mxu1 %v8774_v0 }
 0x271   : > { %4225 = vmatprep.subr.bf16.mxu1 %v9048_v1 }
 0x274   : > { %4226 = vmatpush1.bf16.msra.mxu1 %v8775_v2  ;;  %v8810_v2 = vld [vmem:[%s10842_s5 + $0x970] sm:$0xff]  }
 0x275   : > { %4227 = vmatprep.subr.bf16.mxu1 %v9048_v1 }
 0x278   : > { %4228 = vmatpush1.bf16.msra.mxu1 %v8776_v3  ;;  %v8811_v3 = vld [vmem:[%s10842_s5 + $0x9b8] sm:$0xff]  }
 0x279   : > { %4229 = vmatprep.subr.bf16.mxu1 %v9048_v1 }
 0x27c   : > { %4230 = vmatpush1.bf16.msra.mxu1 %v8777_v4  ;;  %v8812_v4 = vld [vmem:[%s10842_s5 + $0x978] sm:$0xff]  }
 0x27d   : > { %4231 = vmatprep.subr.bf16.mxu1 %v9048_v1 }
 0x280   : > { %4232 = vmatpush1.bf16.msra.mxu1 %v8778_v5  ;;  %v8813_v5 = vld [vmem:[%s10842_s5 + $0x9c0] sm:$0xff]  }
 0x281   : > { %4233 = vmatprep.subr.bf16.mxu1 %v9048_v1 }
 0x284   : > { %4234 = vmatpush1.bf16.msra.mxu1 %v8779_v6  ;;  %v8814_v6 = vld [vmem:[%s10842_s5 + $0x980] sm:$0xff]  }
 0x285   : > { %4575 = vmatprep.subr.bf16.mxu1 %v9048_v1 }
 0x286   : > { %v8058_v8 = vpop.f32.mrb[20].mxu1 }
 0x287   : > { %v8059_v9 = vpop.f32.mrb[21].mxu1  ;;  %4250 = vmatmul.mubr.bf16.vlgmr.msra.gmra.mrb[44].mxu1 %v9274_v61 }
 0x288   : > { %v9829_v10 = vadd.f32 %v8059_v9, %v8058_v8  ;;  %v8061_v11 = vpop.f32.mrb[22].mxu1  ;;  %4576 = vmatpush1.bf16.msra.mxu1 %v8780_v7  ;;  %7509 = vmatprep.mubr.msk.bf16.mxu1 %vm959_vm0, %v9278_v63  ;;  %v8815_v7 = vld [vmem:[%s10842_s5 + $0x9c8] sm:$0xff]   ;;  %v8817_v9 = vld [vmem:[%s10842_s5 + $0x9d0] sm:$0xff]  }
 0x289   : > { %v8062_v13 = vpop.f32.mrb[23].mxu1  ;;  %4577 = vmatprep.subr.bf16.mxu1 %v9048_v1  ;;  %v8816_v8 = vld [vmem:[%s10842_s5 + $0x988] sm:$0xff]  }
 0x28a   : > { %v9837_v14 = vadd.f32 %v8062_v13, %v8061_v11  ;;  %v8818_v11 = vld [vmem:[%s10842_s5 + $0x990] sm:$0xff]   ;;  %v8820_v13 = vld [vmem:[%s10842_s5 + $0x998] sm:$0xff]  }
 0x28c   : > { %4578 = vmatpush1.bf16.msra.mxu1 %v8781_v12  ;;  %v8819_v12 = vld [vmem:[%s10842_s5 + $0x9d8] sm:$0xff]  }
 0x28d   : > { %4579 = vmatprep.subr.bf16.mxu1 %v9048_v1 }
 0x290   : > { %4580 = vmatpush1.bf16.msra.mxu1 %v8782_v15  ;;  %v8821_v15 = vld [vmem:[%s10842_s5 + $0xa68] sm:$0xff]  }
 0x291   : > { %4581 = vmatprep.subr.bf16.mxu1 %v9048_v1 }
 0x294   : > { %4582 = vmatpush1.bf16.msra.mxu1 %v8783_v16  ;;  %v8822_v16 = vld [vmem:[%s10842_s5 + $0xa28] sm:$0xff]  }
 0x295   : > { %4583 = vmatprep.subr.bf16.mxu1 %v9048_v1 }
 0x298   : > { %4584 = vmatpush1.bf16.msra.mxu1 %v8784_v17  ;;  %v8823_v17 = vld [vmem:[%s10842_s5 + $0xa70] sm:$0xff]  }
 0x299   : > { %4585 = vmatprep.subr.bf16.mxu1 %v9048_v1 }
 0x29c   : > { %4586 = vmatpush1.bf16.msra.mxu1 %v8785_v18  ;;  %v8824_v18 = vld [vmem:[%s10842_s5 + $0xa30] sm:$0xff]  }
 0x29d   : > { %4587 = vmatprep.subr.bf16.mxu1 %v9048_v1 }
 0x2a0   : > { %4588 = vmatpush1.bf16.msra.mxu1 %v8786_v19  ;;  %v8825_v19 = vld [vmem:[%s10842_s5 + $0xa78] sm:$0xff]  }
 0x2a1   : > { %4589 = vmatprep.subr.bf16.mxu1 %v9048_v1 }
 0x2a4   : > { %4590 = vmatpush1.bf16.msra.mxu1 %v8787_v20 }
 0x2a5   : > { %4591 = vmatprep.subr.bf16.mxu1 %v9048_v1 }
 0x2a6   : > { %v8083_v23 = vpop.f32.mrb[24].mxu1 }
 0x2a7   : > { %v8084_v24 = vpop.f32.mrb[25].mxu1 }
 0x2a8   : > { %v8085_v25 = vadd.f32 %v8084_v24, %v8083_v23  ;;  %v8086_v26 = vpop.f32.mrb[26].mxu1  ;;  %4592 = vmatpush1.bf16.msra.mxu1 %v8788_v21  ;;  %v8826_v23 = vld [vmem:[%s10842_s5 + $0xa38] sm:$0xff]  }
 0x2a9   : > { %v8087_v28 = vpop.f32.mrb[27].mxu1  ;;  %8217 = vmatprep.subr.bf16.mxu1 %v8789_v22 }
 0x2aa   : > { %v8088_v30 = vadd.f32 %v8087_v28, %v8086_v26  ;;  %v8828_v26 = vld [vmem:[%s10842_s5 + $0xa40] sm:$0xff]   ;;  %v8830_v28 = vld [vmem:[%s10842_s5 + $0xa48] sm:$0xff]  }
 0x2ab   : > { %4608 = vmatmul.mubr.bf16.vlgmr.msra.gmra.mrb[48].mxu1 %v9274_v61 }
 0x2ac   : > { %8218 = vmatpush3.bf16.msra.mxu1 %v8790_v27  ;;  %4924 = vmatprep.mubr.bf16.mxu1 %v9276_v62  ;;  %v8829_v27 = vld [vmem:[%s10842_s5 + $0xa88] sm:$0xff]  }
 0x2ad   : > { %8219 = vmatprep.subr.bf16.mxu1 %v8791_v29  ;;  %v8831_v29 = vld [vmem:[%s10842_s5 + $0xa90] sm:$0xff]  }
 0x2b0   : > { %8220 = vmatpush3.bf16.msra.mxu1 %v8792_v31  ;;  %v8833_v31 = vld [vmem:[%s10842_s5 + $0xa98] sm:$0xff]  }
 0x2b1   : > { %8221 = vmatprep.subr.bf16.mxu1 %v8793_v32  ;;  %v8834_v32 = vld [vmem:[%s10842_s5 + $0xa58] sm:$0xff]  }
 0x2b4   : > { %8222 = vmatpush3.bf16.msra.mxu1 %v8794_v33  ;;  %v8835_v33 = vld [vmem:[%s10842_s5 + $0xaa0] sm:$0xff]  }
 0x2b5   : > { %8223 = vmatprep.subr.bf16.mxu1 %v8795_v34  ;;  %v8836_v34 = vld [vmem:[%s10842_s5 + $0xa60] sm:$0xff]  }
 0x2b8   : > { %8224 = vmatpush3.bf16.msra.mxu1 %v8796_v35  ;;  %v8837_v35 = vld [vmem:[%s10842_s5 + $0xb30] sm:$0xff]  }
 0x2b9   : > { %8225 = vmatprep.subr.bf16.mxu1 %v8797_v37  ;;  %v8838_v37 = vld [vmem:[%s10842_s5 + $0xaf0] sm:$0xff]  }
 0x2bc   : > { %8226 = vmatpush3.bf16.msra.mxu1 %v8798_v38  ;;  %v8839_v38 = vld [vmem:[%s10842_s5 + $0xb38] sm:$0xff]  }
 0x2bd   : > { %8227 = vmatprep.subr.bf16.mxu1 %v8799_v39  ;;  %v8840_v39 = vld [vmem:[%s10842_s5 + $0xaf8] sm:$0xff]  }
 0x2c0   : > { %8228 = vmatpush3.bf16.msra.mxu1 %v8800_v41  ;;  %v8841_v41 = vld [vmem:[%s10842_s5 + $0xb40] sm:$0xff]  }
 0x2c1   : > { %8229 = vmatprep.subr.bf16.mxu1 %v8801_v43  ;;  %v8843_v43 = vld [vmem:[%s10842_s5 + $0xb48] sm:$0xff]  }
 0x2c4   : > { %8230 = vmatpush3.bf16.msra.mxu1 %v8802_v44 }
 0x2c5   : > { %8231 = vmatprep.subr.bf16.mxu1 %v8803_v45 }
 0x2c8   : > { %8232 = vmatpush3.bf16.msra.mxu1 %v8804_v46 }
 0x2c9   : > { %8242 = vmatprep.subr.bf16.mxu1 %v8805_v47  ;;  %v8844_v47 = vld [vmem:[%s10842_s5 + $0xb08] sm:$0xff]  }
 0x2ca   : > { %v2819_v50 = vpop.f32.mrb[28].mxu1 }
 0x2cb   : > { %v2820_v51 = vadd.f32 %v8085_v25, %v2819_v50  ;;  %v2821_v52 = vpop.f32.mrb[29].mxu1  ;;  %4925 = vmatmul.mubr.bf16.vlgmr.msra.gmra.mrb[52].mxu1 %v9272_v60  ;;  %v8827_v25 = vld [vmem:[%s10842_s5 + $0xa80] sm:$0xff]   ;;  %v8846_v50 = vld [vmem:[%s10842_s5 + $0xb10] sm:$0xff]  }
 0x2cc   : > { %v2822_v53 = vpop.f32.mrb[30].mxu1  ;;  %8243 = vmatpush3.bf16.msra.mxu1 %v8806_v48  ;;  %5282 = vmatprep.mubr.bf16.mxu1 %v9276_v62  ;;  %v8848_v52 = vld [vmem:[%s10842_s5 + $0xb18] sm:$0xff]  }
 0x2cd   : > { %v2823_v56 = vadd.f32 %v8088_v30, %v2822_v53  ;;  %v2824_v57 = vpop.f32.mrb[31].mxu1  ;;  %8244 = vmatprep.subr.bf16.mxu1 %v8807_v49  ;;  %v8832_v30 = vld [vmem:[%s10842_s5 + $0xa50] sm:$0xff]   ;;  %v8849_v53 = vld [vmem:[%s10842_s5 + $0xb60] sm:$0xff]  }
 0x2ce   : > { %v8845_v49 = vld [vmem:[%s10842_s5 + $0xb50] sm:$0xff]   ;;  %v8852_v57 = vld [vmem:[%s10842_s5 + $0xb28] sm:$0xff]  }
 0x2cf   : > { %v9938_v0 = vpack.c.bf16 %v2823_v56, %v2820_v51  ;;  %v8847_v51 = vld [vmem:[%s10842_s5 + $0xb58] sm:$0xff]   ;;  %v8851_v56 = vld [vmem:[%s10842_s5 + $0xb68] sm:$0xff]  }
 0x2d0   : > { %8245 = vmatpush3.bf16.msra.mxu1 %v8808_v54  ;;  %v8850_v54 = vld [vmem:[%s10842_s5 + $0xb20] sm:$0xff]  }
 0x2d1   : > { %8246 = vmatprep.subr.bf16.mxu1 %v8809_v58  ;;  %v8853_v58 = vld [vmem:[%s10842_s5 + $0xb70] sm:$0xff]  }
 0x2d4   : > { %8247 = vmatpush3.bf16.msra.mxu1 %v8810_v2  ;;  %v8854_v2 = vld [vmem:[%s10842_s5 + $0xb78] sm:$0xff]  }
 0x2d5   : > { %8248 = vmatprep.subr.bf16.mxu1 %v8811_v3  ;;  %v8855_v3 = vld [vmem:[%s10842_s5 + $0xb80] sm:$0xff]  }
 0x2d8   : > { %8249 = vmatpush3.bf16.msra.mxu1 %v8812_v4 }
 0x2d9   : > { %8250 = vmatprep.subr.bf16.mxu1 %v8813_v5  ;;  %v8856_v5 = vld [vmem:[%s10842_s5 + $0xb88] sm:$0xff]  }
 0x2dc   : > { %8251 = vmatpush3.bf16.msra.mxu1 %v8814_v6 }
 0x2dd   : > { %8252 = vmatprep.subr.bf16.mxu1 %v8815_v7 }
 0x2e0   : > { %8253 = vmatpush3.bf16.msra.mxu1 %v8816_v8 }
 0x2e1   : > { %8254 = vmatprep.subr.bf16.mxu1 %v8817_v9 }
 0x2e4   : > { %8255 = vmatpush3.bf16.msra.mxu1 %v8818_v11 }
 0x2e5   : > { %8256 = vmatprep.subr.bf16.mxu1 %v8819_v12 }
 0x2e8   : > { %8257 = vmatpush3.bf16.msra.mxu1 %v8820_v13 }
 0x2e9   : > { %8267 = vmatprep.subr.bf16.mxu1 %v8821_v15 }
 0x2eb   : > { %5283 = vmatmul.mubr.bf16.vlgmr.msra.gmra.mrb[56].mxu1 %v9272_v60 }
 0x2ec   : > { %8268 = vmatpush3.bf16.msra.mxu1 %v8822_v16  ;;  %5640 = vmatprep.mubr.bf16.mxu1 %v9276_v62  ;;  %v8857_v16 = vld [vmem:[%s10842_s5 + $0xb90] sm:$0xff]  }
 0x2ed   : > { %8269 = vmatprep.subr.bf16.mxu1 %v8823_v17 }
 0x2ee   : > { %v9990_v20 = vpop.f32.mrb[32].mxu1 }
 0x2ef   : > { %v3179_v21 = vpop.f32.mrb[33].mxu1 }
 0x2f0   : > { %v9992_v22 = vpop.f32.mrb[34].mxu1  ;;  %8270 = vmatpush3.bf16.msra.mxu1 %v8824_v18  ;;  %v8862_v21 = vld [vmem:[%s10842_s5 + $0x2e0] sm:$0xff]  }
 0x2f1   : > { %v3182_v24 = vpop.f32.mrb[35].mxu1  ;;  %8271 = vmatprep.subr.bf16.mxu1 %v8825_v19  ;;  %v8861_v19 = vld [vmem:[%s10842_s5 + $0xb98] sm:$0xff]  }
 0x2f2   : > { %v8864_v24 = vld [vmem:[%s10842_s5 + $0x2e8] sm:$0xff]  }
 0x2f4   : > { %8272 = vmatpush3.bf16.msra.mxu1 %v8826_v23  ;;  %v8863_v23 = vld [vmem:[%s10842_s5 + $0xba0] sm:$0xff]  }
 0x2f5   : > { %8273 = vmatprep.subr.bf16.mxu1 %v8827_v25  ;;  %v8865_v25 = vld [vmem:[%s10842_s5 + $0xba8] sm:$0xff]  }
 0x2f8   : > { %8274 = vmatpush3.bf16.msra.mxu1 %v8828_v26  ;;  %v8866_v26 = vld [vmem:[%s10842_s5 + $0x2f0] sm:$0xff]  }
 0x2f9   : > { %8275 = vmatprep.subr.bf16.mxu1 %v8829_v27  ;;  %v8867_v27 = vld [vmem:[%s10842_s5 + $0xbb0] sm:$0xff]  }
 0x2fc   : > { %8276 = vmatpush3.bf16.msra.mxu1 %v8830_v28  ;;  %v8868_v28 = vld [vmem:[%s10842_s5 + $0x2f8] sm:$0xff]  }
 0x2fd   : > { %8277 = vmatprep.subr.bf16.mxu1 %v8831_v29  ;;  %v8869_v29 = vld [vmem:[%s10842_s5 + $0xc38] sm:$0xff]  }
 0x300   : > { %8278 = vmatpush3.bf16.msra.mxu1 %v8832_v30  ;;  %v8870_v30 = vld [vmem:[%s10842_s5 + $0x300] sm:$0xff]  }
 0x301   : > { %8279 = vmatprep.subr.bf16.mxu1 %v8833_v31  ;;  %v8871_v31 = vld [vmem:[%s10842_s5 + $0xc40] sm:$0xff]  }
 0x304   : > { %8280 = vmatpush3.bf16.msra.mxu1 %v8834_v32  ;;  %v8872_v32 = vld [vmem:[%s10842_s5 + $0x308] sm:$0xff]  }
 0x305   : > { %8281 = vmatprep.subr.bf16.mxu1 %v8835_v33  ;;  %v8873_v33 = vld [vmem:[%s10842_s5 + $0xc48] sm:$0xff]  }
 0x308   : > { %8282 = vmatpush3.bf16.msra.mxu1 %v8836_v34  ;;  %v8874_v34 = vld [vmem:[%s10842_s5 + $0x310] sm:$0xff]  }
 0x309   : > { %8292 = vmatprep.subr.bf16.mxu1 %v8837_v35  ;;  %v8875_v35 = vld [vmem:[%s10842_s5 + $0xc50] sm:$0xff]  }
 0x30b   : > { %5641 = vmatmul.mubr.bf16.vlgmr.msra.gmra.mrb[60].mxu1 %v9272_v60 }
 0x30c   : > { %8293 = vmatpush3.bf16.msra.mxu1 %v8838_v37  ;;  %5998 = vmatprep.mubr.bf16.mxu1 %v9276_v62 }
 0x30d   : > { %8294 = vmatprep.subr.bf16.mxu1 %v8839_v38 }
 0x310   : > { %8295 = vmatpush3.bf16.msra.mxu1 %v8840_v39 }
 0x311   : > { %8296 = vmatprep.subr.bf16.mxu1 %v8841_v41  ;;  %v8876_v41 = vld [vmem:[%s10842_s5 + $0x318] sm:$0xff]  }
 0x312   : > { %v10050_v44 = vpop.f32.mrb[36].mxu1 }
 0x313   : > { %v3537_v45 = vpop.f32.mrb[37].mxu1 }
 0x314   : > { %v10052_v46 = vpop.f32.mrb[38].mxu1  ;;  %8297 = vmatpush3.bf16.msra.mxu1 %v8842_v42  ;;  %v8878_v45 = vld [vmem:[%s10842_s5 + $0xc60] sm:$0xff]  }
 0x315   : > { %v3540_v48 = vpop.f32.mrb[39].mxu1  ;;  %8298 = vmatprep.subr.bf16.mxu1 %v8843_v43  ;;  %v8877_v43 = vld [vmem:[%s10842_s5 + $0xc58] sm:$0xff]  }
 0x316   : > { %v8880_v48 = vld [vmem:[%s10842_s5 + $0xc70] sm:$0xff]  }
 0x318   : > { %8299 = vmatpush3.bf16.msra.mxu1 %v8844_v47  ;;  %v8879_v47 = vld [vmem:[%s10842_s5 + $0xc68] sm:$0xff]  }
 0x319   : > { %8300 = vmatprep.subr.bf16.mxu1 %v8845_v49  ;;  %v8881_v49 = vld [vmem:[%s10842_s5 + $0xc78] sm:$0xff]  }
 0x31c   : > { %8301 = vmatpush3.bf16.msra.mxu1 %v8846_v50 }
 0x31d   : > { %8302 = vmatprep.subr.bf16.mxu1 %v8847_v51 }
 0x320   : > { %8303 = vmatpush3.bf16.msra.mxu1 %v8848_v52 }
 0x321   : > { %8304 = vmatprep.subr.bf16.mxu1 %v8849_v53 }
 0x324   : > { %8305 = vmatpush3.bf16.msra.mxu1 %v8850_v54 }
 0x325   : > { %8306 = vmatprep.subr.bf16.mxu1 %v8851_v56 }
 0x328   : > { %8307 = vmatpush3.bf16.msra.mxu1 %v8852_v57 }
 0x329   : > { %6007 = vmatprep.subr.bf16.mxu1 %v9048_v1 }
 0x32b   : > { %5999 = vmatmul.mubr.bf16.vlgmr.msra.gmra.mrb[64].mxu1 %v9272_v60 }
 0x32c   : > { %6008 = vmatpush1.bf16.msra.mxu1 %v8853_v58  ;;  %7845 = vmatprep.mubr.msk.bf16.mxu1 %vm959_vm0, %v9278_v63 }
 0x32d   : > { %6009 = vmatprep.subr.bf16.mxu1 %v9048_v1 }
 0x330   : > { %6010 = vmatpush1.bf16.msra.mxu1 %v8854_v2 }
 0x331   : > { %6011 = vmatprep.subr.bf16.mxu1 %v9048_v1 }
 0x334   : > { %v1745_v4 = vpop.f32.mrb[16].mxu0  ;;  %6012 = vmatpush1.bf16.msra.mxu1 %v8855_v3 }
 0x335   : > { %v1746_v6 = vadd.f32 %v9732_v36, %v1745_v4  ;;  %v1747_v7 = vpop.f32.mrb[17].mxu0  ;;  %6013 = vmatprep.subr.bf16.mxu1 %v9048_v1  ;;  %v8859_v36 = vld [vmem:[%s10840_s3 + $0x28] sm:$0xff]  }
 0x336   : > { %v1748_v8 = vpop.f32.mrb[18].mxu0  ;;  %v10101_v9 = vpop.f32.mrb[40].mxu1 }
 0x337   : > { %v1749_v11 = vadd.f32 %v9738_v40, %v1748_v8  ;;  %v1750_v12 = vpop.f32.mrb[19].mxu0  ;;  %v3895_v13 = vpop.f32.mrb[41].mxu1  ;;  %v8860_v40 = vld [vmem:[%s10842_s5 + $0x2d8] sm:$0xff]  }
 0x338   : > { %v10104_v15 = vpop.f32.mrb[42].mxu1  ;;  %6014 = vmatpush1.bf16.msra.mxu1 %v8856_v5  ;;  %v8882_v5 = vld [vmem:[%s10840_s3 + $0x30] sm:$0xff]  }
 0x339   : > { %v1757_v17 = vpack.c.bf16 %v1749_v11, %v1746_v6  ;;  %v3898_v18 = vpop.f32.mrb[43].mxu1  ;;  %6015 = vmatprep.subr.bf16.mxu1 %v9048_v1 }
 0x33b   : > { %8354 = vmatprep.subr.bf16.mxu0 %v1757_v17 }
 0x33c   : > { %8355 = vmatpush3.bf16.msra.mxu0 %v1757_v17  ;;  %6016 = vmatpush1.bf16.msra.mxu1 %v8857_v16 }
 0x33d   : > { %2069 = vmatprep.subr.bf16.mxu0 %v9048_v1  ;;  %6017 = vmatprep.subr.bf16.mxu1 %v9048_v1 }
 0x33f   : > { %8357 = vmatmul.mubr.msk.bf16.vlgmr.msra.gmra.mrb[12].mxu0 %vm959_vm0, %v8859_v36 }
 0x340   : > { %2070 = vmatpush1.bf16.msra.mxu0 %v8860_v40  ;;  %6921 = vmatprep.mubr.msk.bf16.mxu0 %vm959_vm0, %v9278_v63 }
 0x341   : > { %6018 = vmatpush1.bf16.msra.mxu1 %v8861_v19  ;;  %2071 = vmatprep.subr.bf16.mxu0 %v9048_v1 }
 0x342   : > { %6019 = vmatprep.subr.bf16.mxu1 %v9048_v1 }
 0x344   : > { %2072 = vmatpush1.bf16.msra.mxu0 %v8862_v21 }
 0x345   : > { %6020 = vmatpush1.bf16.msra.mxu1 %v8863_v23  ;;  %2073 = vmatprep.subr.bf16.mxu0 %v9048_v1 }
 0x346   : > { %6021 = vmatprep.subr.bf16.mxu1 %v9048_v1 }
 0x348   : > { %2074 = vmatpush1.bf16.msra.mxu0 %v8864_v24 }
 0x349   : > { %6022 = vmatpush1.bf16.msra.mxu1 %v8865_v25  ;;  %2075 = vmatprep.subr.bf16.mxu0 %v9048_v1 }
 0x34a   : > { %6023 = vmatprep.subr.bf16.mxu1 %v9048_v1 }
 0x34c   : > { %2076 = vmatpush1.bf16.msra.mxu0 %v8866_v26 }
 0x34d   : > { %6024 = vmatpush1.bf16.msra.mxu1 %v8867_v27  ;;  %2077 = vmatprep.subr.bf16.mxu0 %v9048_v1 }
 0x34e   : > { %6365 = vmatprep.subr.bf16.mxu1 %v9048_v1 }
 0x350   : > { %2078 = vmatpush1.bf16.msra.mxu0 %v8868_v28  ;;  %6040 = vmatmul.mubr.bf16.vlgmr.msra.gmra.mrb[68].mxu1 %v9274_v61 }
 0x351   : > { %6366 = vmatpush1.bf16.msra.mxu1 %v8869_v29  ;;  %7929 = vmatprep.mubr.msk.bf16.mxu1 %vm959_vm0, %v9278_v63 }
 0x352   : > { %2079 = vmatprep.subr.bf16.mxu0 %v9048_v1  ;;  %6367 = vmatprep.subr.bf16.mxu1 %v9048_v1 }
 0x354   : > { %2080 = vmatpush1.bf16.msra.mxu0 %v8870_v30 }
 0x355   : > { %6368 = vmatpush1.bf16.msra.mxu1 %v8871_v31  ;;  %2081 = vmatprep.subr.bf16.mxu0 %v9048_v1 }
 0x356   : > { %6369 = vmatprep.subr.bf16.mxu1 %v9048_v1 }
 0x358   : > { %2082 = vmatpush1.bf16.msra.mxu0 %v8872_v32 }
 0x359   : > { %6370 = vmatpush1.bf16.msra.mxu1 %v8873_v33  ;;  %2083 = vmatprep.subr.bf16.mxu0 %v9048_v1 }
 0x35a   : > { %v10182_v37 = vpop.f32.mrb[44].mxu1  ;;  %6371 = vmatprep.subr.bf16.mxu1 %v9048_v1 }
 0x35b   : > { %v4253_v38 = vpop.f32.mrb[45].mxu1 }
 0x35c   : > { %2084 = vmatpush1.bf16.msra.mxu0 %v8874_v34  ;;  %v10185_v39 = vpop.f32.mrb[46].mxu1 }
 0x35d   : > { %6372 = vmatpush1.bf16.msra.mxu1 %v8875_v35  ;;  %v4256_v42 = vpop.f32.mrb[47].mxu1  ;;  %2085 = vmatprep.subr.bf16.mxu0 %v9048_v1 }
 0x35e   : > { %6373 = vmatprep.subr.bf16.mxu1 %v9048_v1 }
 0x360   : > { %2086 = vmatpush1.bf16.msra.mxu0 %v8876_v41 }
 0x361   : > { %6374 = vmatpush1.bf16.msra.mxu1 %v8877_v43 }
 0x362   : > { %6375 = vmatprep.subr.bf16.mxu1 %v9048_v1 }
 0x363   : > { %2102 = vmatmul.mubr.bf16.vlgmr.msra.gmra.mrb[20].mxu0 %v9274_v61 }
 0x364   : > { %8362 = vmatprep.mubr.msk.bf16.mxu0 %vm959_vm0, %v8882_v5  ;;  %v8891_v5 = vld [vmem:[%s10842_s5 + $0x3d8] sm:$0xff]  }
 0x365   : > { %6376 = vmatpush1.bf16.msra.mxu1 %v8878_v45 }
 0x366   : > { %6377 = vmatprep.subr.bf16.mxu1 %v9048_v1 }
 0x369   : > { %6378 = vmatpush1.bf16.msra.mxu1 %v8879_v47  ;;  %v8883_v47 = vld [vmem:[%s10840_s3 + $0x38] sm:$0xff]  }
 0x36a   : > { %6379 = vmatprep.subr.bf16.mxu1 %v9048_v1 }
 0x36d   : > { %6380 = vmatpush1.bf16.msra.mxu1 %v8880_v48  ;;  %v8884_v48 = vld [vmem:[%s10842_s5 + $0x3a0] sm:$0xff]  }
 0x36e   : > { %6381 = vmatprep.subr.bf16.mxu1 %v9048_v1 }
 0x371   : > { %6382 = vmatpush1.bf16.msra.mxu1 %v8881_v49 }
 0x374   : > { %6398 = vmatmul.mubr.bf16.vlgmr.msra.gmra.mrb[72].mxu1 %v9274_v61 }
 0x37e   : > { %v10213_v50 = vpop.f32.mrb[48].mxu1 }
 0x37f   : > { %v4611_v51 = vpop.f32.mrb[49].mxu1 }
 0x380   : > { %v10215_v52 = vpop.f32.mrb[50].mxu1 }
 0x381   : > { %v4614_v53 = vpop.f32.mrb[51].mxu1 }
 0x39e   : > { %v8233_v54 = vpop.f32.mrb[52].mxu1 }
 0x39f   : > { %v8234_v56 = vpop.f32.mrb[53].mxu1 }
 0x3a0   : > { %v10217_v57 = vadd.f32 %v8234_v56, %v8233_v54  ;;  %v8236_v58 = vpop.f32.mrb[54].mxu1  ;;  %v8887_v56 = vld [vmem:[%s10842_s5 + $0x3b8] sm:$0xff]  }
 0x3a1   : > { %v8237_v2 = vpop.f32.mrb[55].mxu1 }
 0x3a2   : > { %v10219_v3 = vadd.f32 %v8237_v2, %v8236_v58  ;;  %v8888_v58 = vld [vmem:[%s10842_s5 + $0x3c0] sm:$0xff]   ;;  %v8889_v2 = vld [vmem:[%s10842_s5 + $0x3c8] sm:$0xff]  }
 0x3be   : > { %v8258_v4 = vpop.f32.mrb[56].mxu1 }
 0x3bf   : > { %v8259_v6 = vpop.f32.mrb[57].mxu1 }
 0x3c0   : > { %v10224_v7 = vadd.f32 %v8259_v6, %v8258_v4  ;;  %v8261_v8 = vpop.f32.mrb[58].mxu1  ;;  %v8890_v4 = vld [vmem:[%s10842_s5 + $0x3d0] sm:$0xff]   ;;  %v8892_v6 = vld [vmem:[%s10842_s5 + $0x3e0] sm:$0xff]  }
 0x3c1   : > { %v8262_v11 = vpop.f32.mrb[59].mxu1 }
 0x3c2   : > { %v10227_v12 = vadd.f32 %v8262_v11, %v8261_v8  ;;  %v8893_v8 = vld [vmem:[%s10840_s3 + $0x40] sm:$0xff]  }
 0x3de   : > { %v8283_v13 = vpop.f32.mrb[60].mxu1 }
 0x3df   : > { %v8284_v16 = vpop.f32.mrb[61].mxu1 }
 0x3e0   : > { %v10229_v17 = vadd.f32 %v8284_v16, %v8283_v13  ;;  %v8286_v18 = vpop.f32.mrb[62].mxu1 }
 0x3e1   : > { %v8287_v36 = vpop.f32.mrb[63].mxu1 }
 0x3e2   : > { %v10231_v40 = vadd.f32 %v8287_v36, %v8286_v18 }
 0x3fe   : > { %v8308_v19 = vpop.f32.mrb[64].mxu1 }
 0x3ff   : > { %v8309_v21 = vpop.f32.mrb[65].mxu1 }
 0x400   : > { %v8310_v23 = vadd.f32 %v8309_v21, %v8308_v19  ;;  %v8311_v24 = vpop.f32.mrb[66].mxu1 }
 0x401   : > { %v8312_v25 = vpop.f32.mrb[67].mxu1 }
 0x402   : > { %v8313_v26 = vadd.f32 %v8312_v25, %v8311_v24  ;;  %v8895_v24 = vld [vmem:[%s10840_s3 + $0x50] sm:$0xff]  }
 0x403   : > { %v8898_v25 = vld [vmem:[%s10842_s5 + $0x4b0] sm:$0xff]  }
 0x423   : > { %v6041_v27 = vpop.f32.mrb[68].mxu1 }
 0x424   : > { %v6042_v28 = vadd.f32 %v8310_v23, %v6041_v27  ;;  %v6043_v29 = vpop.f32.mrb[69].mxu1  ;;  %v8894_v23 = vld [vmem:[%s10840_s3 + $0x48] sm:$0xff]   ;;  %v8901_v27 = vld [vmem:[%s10842_s5 + $0x500] sm:$0xff]  }
 0x425   : > { %v6044_v30 = vpop.f32.mrb[70].mxu1  ;;  %v8903_v29 = vld [vmem:[%s10842_s5 + $0x508] sm:$0xff]  }
 0x426   : > { %v6045_v31 = vadd.f32 %v8313_v26, %v6044_v30  ;;  %v6046_v32 = vpop.f32.mrb[71].mxu1  ;;  %v8899_v26 = vld [vmem:[%s10842_s5 + $0x4f8] sm:$0xff]   ;;  %v8904_v30 = vld [vmem:[%s10842_s5 + $0x4c8] sm:$0xff]  }
 0x427   : > { %v8906_v32 = vld [vmem:[%s10842_s5 + $0x4d0] sm:$0xff]  }
 0x428   : > { %v10233_v33 = vpack.c.bf16 %v6045_v31, %v6042_v28  ;;  %v8902_v28 = vld [vmem:[%s10842_s5 + $0x4c0] sm:$0xff]   ;;  %v8905_v31 = vld [vmem:[%s10842_s5 + $0x510] sm:$0xff]  }
 0x436   : > { %v2103_v34 = vpop.f32.mrb[20].mxu0 }
 0x437   : > { %v2104_v35 = vadd.f32 %v9792_v55, %v2103_v34  ;;  %v2105_v38 = vpop.f32.mrb[21].mxu0  ;;  %v8885_v55 = vld [vmem:[%s10842_s5 + $0x3a8] sm:$0xff]   ;;  %v8907_v34 = vld [vmem:[%s10842_s5 + $0x518] sm:$0xff]  }
 0x438   : > { %v2106_v41 = vpop.f32.mrb[22].mxu0  ;;  %v8909_v38 = vld [vmem:[%s10842_s5 + $0x520] sm:$0xff]  }
 0x439   : > { %v2107_v42 = vadd.f32 %v9798_v59, %v2106_v41  ;;  %v2108_v43 = vpop.f32.mrb[23].mxu0  ;;  %v8886_v59 = vld [vmem:[%s10842_s5 + $0x3b0] sm:$0xff]   ;;  %v8910_v41 = vld [vmem:[%s10842_s5 + $0x4e0] sm:$0xff]  }
 0x43a   : > { %v8912_v43 = vld [vmem:[%s10842_s5 + $0x4e8] sm:$0xff]  }
 0x43b   : > { %v2115_v45 = vpack.c.bf16 %v2107_v42, %v2104_v35  ;;  %v8908_v35 = vld [vmem:[%s10842_s5 + $0x4d8] sm:$0xff]   ;;  %v8911_v42 = vld [vmem:[%s10842_s5 + $0x528] sm:$0xff]  }
 0x43d   : > { %8360 = vmatprep.subr.bf16.mxu0 %v2115_v45 }
 0x43e   : > { %8361 = vmatpush3.bf16.msra.mxu0 %v2115_v45  ;;  %v8913_v45 = vld [vmem:[%s10840_s3 + $0x60] sm:$0xff]  }
 0x43f   : > { %2427 = vmatprep.subr.bf16.mxu0 %v9048_v1 }
 0x441   : > { %8363 = vmatmul.mubr.msk.bf16.vlgmr.msra.gmra.mrb[12].mxu0 %vm959_vm0, %v8883_v47 }
 0x442   : > { %2428 = vmatpush1.bf16.msra.mxu0 %v8884_v48  ;;  %7005 = vmatprep.mubr.msk.bf16.mxu0 %vm959_vm0, %v9278_v63 }
 0x443   : > { %2429 = vmatprep.subr.bf16.mxu0 %v9048_v1 }
 0x446   : > { %2430 = vmatpush1.bf16.msra.mxu0 %v8885_v55 }
 0x447   : > { %v10254_v49 = vpop.f32.mrb[72].mxu1  ;;  %2431 = vmatprep.subr.bf16.mxu0 %v9048_v1 }
 0x448   : > { %v6401_v51 = vpop.f32.mrb[73].mxu1 }
 0x449   : > { %v10257_v53 = vpop.f32.mrb[74].mxu1 }
 0x44a   : > { %2432 = vmatpush1.bf16.msra.mxu0 %v8886_v59  ;;  %v6404_v54 = vpop.f32.mrb[75].mxu1 }
 0x44b   : > { %2433 = vmatprep.subr.bf16.mxu0 %v9048_v1 }
 0x44e   : > { %2434 = vmatpush1.bf16.msra.mxu0 %v8887_v56 }
 0x44f   : > { %2435 = vmatprep.subr.bf16.mxu0 %v9048_v1 }
 0x452   : > { %2436 = vmatpush1.bf16.msra.mxu0 %v8888_v58 }
 0x453   : > { %2437 = vmatprep.subr.bf16.mxu0 %v9048_v1 }
 0x456   : > { %2438 = vmatpush1.bf16.msra.mxu0 %v8889_v2 }
 0x457   : > { %2439 = vmatprep.subr.bf16.mxu0 %v9048_v1 }
 0x45a   : > { %2440 = vmatpush1.bf16.msra.mxu0 %v8890_v4  ;;  %v8915_v4 = vld [vmem:[%s10842_s5 + $0x5b8] sm:$0xff]  }
 0x45b   : > { %2441 = vmatprep.subr.bf16.mxu0 %v9048_v1 }
 0x45e   : > { %2442 = vmatpush1.bf16.msra.mxu0 %v8891_v5  ;;  %v8914_v5 = vld [vmem:[%s10840_s3 + $0x68] sm:$0xff]  }
 0x45f   : > { %2443 = vmatprep.subr.bf16.mxu0 %v9048_v1 }
 0x462   : > { %2444 = vmatpush1.bf16.msra.mxu0 %v8892_v6  ;;  %v8916_v6 = vld [vmem:[%s10842_s5 + $0x578] sm:$0xff]  }
 0x465   : > { %2460 = vmatmul.mubr.bf16.vlgmr.msra.gmra.mrb[24].mxu0 %v9274_v61 }
 0x466   : > { %8368 = vmatprep.mubr.msk.bf16.mxu0 %vm959_vm0, %v8893_v8  ;;  %v8919_v8 = vld [vmem:[%s10842_s5 + $0x5c8] sm:$0xff]  }
 0x538   : > { %v2461_v11 = vpop.f32.mrb[24].mxu0 }
 0x539   : > { %v2462_v13 = vadd.f32 %v9829_v10, %v2461_v11  ;;  %v2463_v16 = vpop.f32.mrb[25].mxu0  ;;  %v8896_v10 = vld [vmem:[%s10842_s5 + $0x4f0] sm:$0xff]   ;;  %v8920_v11 = vld [vmem:[%s10842_s5 + $0x588] sm:$0xff]  }
 0x53a   : > { %v2464_v18 = vpop.f32.mrb[26].mxu0  ;;  %v8922_v16 = vld [vmem:[%s10842_s5 + $0x590] sm:$0xff]  }
 0x53b   : > { %v2465_v36 = vadd.f32 %v9837_v14, %v2464_v18  ;;  %v2466_v19 = vpop.f32.mrb[27].mxu0  ;;  %v8897_v14 = vld [vmem:[%s10840_s3 + $0x58] sm:$0xff]  }
 0x53c   : > { %v8923_v18 = vld [vmem:[%s10842_s5 + $0x5d8] sm:$0xff]   ;;  %v8925_v19 = vld [vmem:[%s10842_s5 + $0x5e0] sm:$0xff]  }
 0x53d   : > { %v2473_v21 = vpack.c.bf16 %v2465_v36, %v2462_v13  ;;  %v8921_v13 = vld [vmem:[%s10842_s5 + $0x5d0] sm:$0xff]   ;;  %v8924_v36 = vld [vmem:[%s10842_s5 + $0x598] sm:$0xff]  }
 0x53f   : > { %8366 = vmatprep.subr.bf16.mxu0 %v2473_v21 }
 0x540   : > { %8367 = vmatpush3.bf16.msra.mxu0 %v2473_v21  ;;  %v8926_v21 = vld [vmem:[%s10842_s5 + $0x5a0] sm:$0xff]  }
 0x541   : > { %8372 = vmatprep.subr.bf16.mxu0 %v9938_v0 }
 0x543   : > { %8369 = vmatmul.mubr.msk.bf16.vlgmr.msra.gmra.mrb[12].mxu0 %vm959_vm0, %v8894_v23  ;;  %v8927_v23 = vld [vmem:[%s10842_s5 + $0x5e8] sm:$0xff]  }
 0x544   : > { %8373 = vmatpush3.bf16.msra.mxu0 %v9938_v0  ;;  %8374 = vmatprep.mubr.msk.bf16.mxu0 %vm959_vm0, %v8895_v24  ;;  %v8900_v0 = vld [vmem:[%s10842_s5 + $0x4b8] sm:$0xff]   ;;  %v8928_v24 = vld [vmem:[%s10842_s5 + $0x5a8] sm:$0xff]  }
 0x545   : > { %8092 = vmatprep.subr.bf16.mxu0 %v8896_v10  ;;  %v8929_v10 = vld [vmem:[%s10842_s5 + $0x5f0] sm:$0xff]  }
 0x54f   : > { %8375 = vmatmul.mubr.msk.bf16.vlgmr.msra.gmra.mrb[12].mxu0 %vm959_vm0, %v8897_v14  ;;  %v8930_v14 = vld [vmem:[%s10842_s5 + $0x5b0] sm:$0xff]  }
 0x550   : > { %8093 = vmatpush3.bf16.msra.mxu0 %v8898_v25  ;;  %3134 = vmatprep.mubr.bf16.mxu0 %v9276_v62  ;;  %v8931_v25 = vld [vmem:[%s10840_s3 + $0x70] sm:$0xff]  }
 0x551   : > { %8094 = vmatprep.subr.bf16.mxu0 %v8899_v26 }
 0x554   : > { %8095 = vmatpush3.bf16.msra.mxu0 %v8900_v0 }
 0x555   : > { %8096 = vmatprep.subr.bf16.mxu0 %v8901_v27 }
 0x558   : > { %8097 = vmatpush3.bf16.msra.mxu0 %v8902_v28 }
 0x559   : > { %8098 = vmatprep.subr.bf16.mxu0 %v8903_v29 }
 0x55c   : > { %8099 = vmatpush3.bf16.msra.mxu0 %v8904_v30 }
 0x55d   : > { %8100 = vmatprep.subr.bf16.mxu0 %v8905_v31 }
 0x560   : > { %8101 = vmatpush3.bf16.msra.mxu0 %v8906_v32 }
 0x561   : > { %8102 = vmatprep.subr.bf16.mxu0 %v8907_v34 }
 0x564   : > { %8103 = vmatpush3.bf16.msra.mxu0 %v8908_v35  ;;  %v8933_v35 = vld [vmem:[%s10842_s5 + $0x680] sm:$0xff]  }
 0x565   : > { %8104 = vmatprep.subr.bf16.mxu0 %v8909_v38  ;;  %v8932_v38 = vld [vmem:[%s10840_s3 + $0x78] sm:$0xff]  }
 0x568   : > { %8105 = vmatpush3.bf16.msra.mxu0 %v8910_v41  ;;  %v8934_v41 = vld [vmem:[%s10842_s5 + $0x640] sm:$0xff]  }
 0x569   : > { %8106 = vmatprep.subr.bf16.mxu0 %v8911_v42  ;;  %v8937_v42 = vld [vmem:[%s10842_s5 + $0x690] sm:$0xff]  }
 0x56c   : > { %8107 = vmatpush3.bf16.msra.mxu0 %v8912_v43  ;;  %v8938_v43 = vld [vmem:[%s10842_s5 + $0x650] sm:$0xff]  }
 0x56f   : > { %3135 = vmatmul.mubr.bf16.vlgmr.msra.gmra.mrb[28].mxu0 %v9272_v60 }
 0x570   : > { %8380 = vmatprep.mubr.msk.bf16.mxu0 %vm959_vm0, %v8913_v45  ;;  %v8939_v45 = vld [vmem:[%s10842_s5 + $0x698] sm:$0xff]  }
 0x642   : > { %v8108_v47 = vpop.f32.mrb[28].mxu0 }
 0x643   : > { %v8109_v48 = vpop.f32.mrb[29].mxu0 }
 0x644   : > { %v8110_v55 = vadd.f32 %v8109_v48, %v8108_v47  ;;  %v8111_v59 = vpop.f32.mrb[30].mxu0  ;;  %v8940_v47 = vld [vmem:[%s10842_s5 + $0x658] sm:$0xff]   ;;  %v8941_v48 = vld [vmem:[%s10842_s5 + $0x6a0] sm:$0xff]  }
 0x645   : > { %v8112_v51 = vpop.f32.mrb[31].mxu0 }
 0x646   : > { %v3178_v54 = vadd.f32 %v8110_v55, %v9990_v20  ;;  %v8113_v56 = vadd.f32 %v8112_v51, %v8111_v59  ;;  %v8917_v20 = vld [vmem:[%s10842_s5 + $0x5c0] sm:$0xff]   ;;  %v8943_v59 = vld [vmem:[%s10842_s5 + $0x6a8] sm:$0xff]  }
 0x647   : > { %v8942_v55 = vld [vmem:[%s10842_s5 + $0x660] sm:$0xff]   ;;  %v8944_v51 = vld [vmem:[%s10842_s5 + $0x668] sm:$0xff]  }
 0x648   : > { %v3181_v58 = vadd.f32 %v8113_v56, %v9992_v22  ;;  %v8918_v22 = vld [vmem:[%s10842_s5 + $0x580] sm:$0xff]   ;;  %v8946_v56 = vld [vmem:[%s10842_s5 + $0x670] sm:$0xff]  }
 0x64a   : > { %v3189_v2 = vpack.c.bf16 %v3181_v58, %v3178_v54  ;;  %v8945_v54 = vld [vmem:[%s10842_s5 + $0x6b0] sm:$0xff]   ;;  %v8947_v58 = vld [vmem:[%s10842_s5 + $0x6b8] sm:$0xff]  }
 0x64c   : > { %8378 = vmatprep.subr.bf16.mxu0 %v3189_v2 }
 0x64d   : > { %8379 = vmatpush3.bf16.msra.mxu0 %v3189_v2  ;;  %v8948_v2 = vld [vmem:[%s10842_s5 + $0x678] sm:$0xff]  }
 0x64e   : > { %8117 = vmatprep.subr.bf16.mxu0 %v8915_v4  ;;  %v8949_v4 = vld [vmem:[%s10840_s3 + $0x80] sm:$0xff]  }
 0x650   : > { %8381 = vmatmul.mubr.msk.bf16.vlgmr.msra.gmra.mrb[12].mxu0 %vm959_vm0, %v8914_v5 }
 0x651   : > { %8118 = vmatpush3.bf16.msra.mxu0 %v8916_v6  ;;  %3492 = vmatprep.mubr.bf16.mxu0 %v9276_v62 }
 0x652   : > { %8119 = vmatprep.subr.bf16.mxu0 %v8917_v20 }
 0x655   : > { %8120 = vmatpush3.bf16.msra.mxu0 %v8918_v22 }
 0x656   : > { %8121 = vmatprep.subr.bf16.mxu0 %v8919_v8 }
 0x659   : > { %8122 = vmatpush3.bf16.msra.mxu0 %v8920_v11 }
 0x65a   : > { %8123 = vmatprep.subr.bf16.mxu0 %v8921_v13 }
 0x65d   : > { %8124 = vmatpush3.bf16.msra.mxu0 %v8922_v16 }
 0x65e   : > { %8125 = vmatprep.subr.bf16.mxu0 %v8923_v18 }
 0x661   : > { %8126 = vmatpush3.bf16.msra.mxu0 %v8924_v36  ;;  %v8951_v36 = vld [vmem:[%s10842_s5 + $0x748] sm:$0xff]  }
 0x662   : > { %8127 = vmatprep.subr.bf16.mxu0 %v8925_v19  ;;  %v8950_v19 = vld [vmem:[%s10840_s3 + $0x88] sm:$0xff]  }
 0x665   : > { %8128 = vmatpush3.bf16.msra.mxu0 %v8926_v21  ;;  %v8952_v21 = vld [vmem:[%s10842_s5 + $0x708] sm:$0xff]  }
 0x666   : > { %8129 = vmatprep.subr.bf16.mxu0 %v8927_v23  ;;  %v8955_v23 = vld [vmem:[%s10842_s5 + $0x758] sm:$0xff]  }
 0x669   : > { %8130 = vmatpush3.bf16.msra.mxu0 %v8928_v24  ;;  %v8956_v24 = vld [vmem:[%s10842_s5 + $0x718] sm:$0xff]  }
 0x66a   : > { %8131 = vmatprep.subr.bf16.mxu0 %v8929_v10  ;;  %v8957_v10 = vld [vmem:[%s10842_s5 + $0x760] sm:$0xff]  }
 0x66d   : > { %8132 = vmatpush3.bf16.msra.mxu0 %v8930_v14  ;;  %v8958_v14 = vld [vmem:[%s10842_s5 + $0x720] sm:$0xff]  }
 0x670   : > { %3493 = vmatmul.mubr.bf16.vlgmr.msra.gmra.mrb[32].mxu0 %v9272_v60 }
 0x671   : > { %8386 = vmatprep.mubr.msk.bf16.mxu0 %vm959_vm0, %v8931_v25  ;;  %v8959_v25 = vld [vmem:[%s10842_s5 + $0x768] sm:$0xff]  }
 0x743   : > { %v8133_v26 = vpop.f32.mrb[32].mxu0 }
 0x744   : > { %v8134_v0 = vpop.f32.mrb[33].mxu0 }
 0x745   : > { %v8135_v27 = vadd.f32 %v8134_v0, %v8133_v26  ;;  %v8136_v28 = vpop.f32.mrb[34].mxu0  ;;  %v8960_v26 = vld [vmem:[%s10842_s5 + $0x728] sm:$0xff]   ;;  %v8961_v0 = vld [vmem:[%s10842_s5 + $0x770] sm:$0xff]  }
 0x746   : > { %v8137_v29 = vpop.f32.mrb[35].mxu0 }
 0x747   : > { %v3536_v30 = vadd.f32 %v8135_v27, %v10050_v44  ;;  %v8138_v31 = vadd.f32 %v8137_v29, %v8136_v28  ;;  %v8935_v44 = vld [vmem:[%s10842_s5 + $0x688] sm:$0xff]   ;;  %v8962_v27 = vld [vmem:[%s10842_s5 + $0x730] sm:$0xff]   ;;  %v8963_v28 = vld [vmem:[%s10842_s5 + $0x778] sm:$0xff]  }
 0x748   : > { %v8964_v29 = vld [vmem:[%s10842_s5 + $0x738] sm:$0xff]  }
 0x749   : > { %v3539_v32 = vadd.f32 %v8138_v31, %v10052_v46  ;;  %v8936_v46 = vld [vmem:[%s10842_s5 + $0x648] sm:$0xff]   ;;  %v8966_v31 = vld [vmem:[%s10842_s5 + $0x740] sm:$0xff]  }
 0x74b   : > { %v3547_v34 = vpack.c.bf16 %v3539_v32, %v3536_v30  ;;  %v8965_v30 = vld [vmem:[%s10842_s5 + $0x780] sm:$0xff]   ;;  %v8967_v32 = vld [vmem:[%s10840_s3 + $0x90] sm:$0xff]  }
 0x74d   : > { %8384 = vmatprep.subr.bf16.mxu0 %v3547_v34 }
 0x74e   : > { %8385 = vmatpush3.bf16.msra.mxu0 %v3547_v34 }
 0x74f   : > { %8142 = vmatprep.subr.bf16.mxu0 %v8933_v35 }
 0x751   : > { %8387 = vmatmul.mubr.msk.bf16.vlgmr.msra.gmra.mrb[12].mxu0 %vm959_vm0, %v8932_v38 }
 0x752   : > { %8143 = vmatpush3.bf16.msra.mxu0 %v8934_v41  ;;  %3850 = vmatprep.mubr.bf16.mxu0 %v9276_v62 }
 0x753   : > { %8144 = vmatprep.subr.bf16.mxu0 %v8935_v44 }
 0x756   : > { %8145 = vmatpush3.bf16.msra.mxu0 %v8936_v46 }
 0x757   : > { %8146 = vmatprep.subr.bf16.mxu0 %v8937_v42 }
 0x75a   : > { %8147 = vmatpush3.bf16.msra.mxu0 %v8938_v43 }
 0x75b   : > { %8148 = vmatprep.subr.bf16.mxu0 %v8939_v45 }
 0x75e   : > { %8149 = vmatpush3.bf16.msra.mxu0 %v8940_v47  ;;  %v8969_v47 = vld [vmem:[%s10842_s5 + $0x810] sm:$0xff]  }
 0x75f   : > { %8150 = vmatprep.subr.bf16.mxu0 %v8941_v48  ;;  %v8968_v48 = vld [vmem:[%s10840_s3 + $0x98] sm:$0xff]  }
 0x762   : > { %8151 = vmatpush3.bf16.msra.mxu0 %v8942_v55  ;;  %v8970_v55 = vld [vmem:[%s10842_s5 + $0x7d0] sm:$0xff]  }
 0x763   : > { %8152 = vmatprep.subr.bf16.mxu0 %v8943_v59  ;;  %v8973_v59 = vld [vmem:[%s10842_s5 + $0x820] sm:$0xff]  }
 0x766   : > { %8153 = vmatpush3.bf16.msra.mxu0 %v8944_v51  ;;  %v8974_v51 = vld [vmem:[%s10842_s5 + $0x7e0] sm:$0xff]  }
 0x767   : > { %8154 = vmatprep.subr.bf16.mxu0 %v8945_v54  ;;  %v8975_v54 = vld [vmem:[%s10842_s5 + $0x828] sm:$0xff]  }
 0x76a   : > { %8155 = vmatpush3.bf16.msra.mxu0 %v8946_v56  ;;  %v8976_v56 = vld [vmem:[%s10842_s5 + $0x7e8] sm:$0xff]  }
 0x76b   : > { %8156 = vmatprep.subr.bf16.mxu0 %v8947_v58  ;;  %v8977_v58 = vld [vmem:[%s10842_s5 + $0x830] sm:$0xff]  }
 0x76e   : > { %8157 = vmatpush3.bf16.msra.mxu0 %v8948_v2  ;;  %v8978_v2 = vld [vmem:[%s10842_s5 + $0x7f0] sm:$0xff]  }
 0x771   : > { %3851 = vmatmul.mubr.bf16.vlgmr.msra.gmra.mrb[36].mxu0 %v9272_v60 }
 0x772   : > { %8392 = vmatprep.mubr.msk.bf16.mxu0 %vm959_vm0, %v8949_v4  ;;  %v8979_v4 = vld [vmem:[%s10842_s5 + $0x838] sm:$0xff]  }
 0x844   : > { %v8158_v5 = vpop.f32.mrb[36].mxu0 }
 0x845   : > { %v8159_v6 = vpop.f32.mrb[37].mxu0 }
 0x846   : > { %v8160_v20 = vadd.f32 %v8159_v6, %v8158_v5  ;;  %v8161_v22 = vpop.f32.mrb[38].mxu0  ;;  %v8980_v5 = vld [vmem:[%s10842_s5 + $0x7f8] sm:$0xff]   ;;  %v8981_v6 = vld [vmem:[%s10842_s5 + $0x840] sm:$0xff]  }
 0x847   : > { %v8162_v8 = vpop.f32.mrb[39].mxu0 }
 0x848   : > { %v3894_v11 = vadd.f32 %v8160_v20, %v10101_v9  ;;  %v8163_v13 = vadd.f32 %v8162_v8, %v8161_v22  ;;  %v8953_v9 = vld [vmem:[%s10842_s5 + $0x750] sm:$0xff]   ;;  %v8982_v20 = vld [vmem:[%s10842_s5 + $0x800] sm:$0xff]   ;;  %v8983_v22 = vld [vmem:[%s10842_s5 + $0x848] sm:$0xff]  }
 0x849   : > { %v8984_v8 = vld [vmem:[%s10842_s5 + $0x808] sm:$0xff]  }
 0x84a   : > { %v3897_v16 = vadd.f32 %v8163_v13, %v10104_v15  ;;  %v8954_v15 = vld [vmem:[%s10842_s5 + $0x710] sm:$0xff]  }
 0x84c   : > { %v3905_v18 = vpack.c.bf16 %v3897_v16, %v3894_v11  ;;  %v8985_v11 = vld [vmem:[%s10840_s3 + $0xa0] sm:$0xff]  }
 0x84e   : > { %8390 = vmatprep.subr.bf16.mxu0 %v3905_v18 }
 0x84f   : > { %8391 = vmatpush3.bf16.msra.mxu0 %v3905_v18 }
 0x850   : > { %8167 = vmatprep.subr.bf16.mxu0 %v8951_v36 }
 0x852   : > { %8393 = vmatmul.mubr.msk.bf16.vlgmr.msra.gmra.mrb[12].mxu0 %vm959_vm0, %v8950_v19 }
 0x853   : > { %8168 = vmatpush3.bf16.msra.mxu0 %v8952_v21  ;;  %4208 = vmatprep.mubr.bf16.mxu0 %v9276_v62 }
 0x854   : > { %8169 = vmatprep.subr.bf16.mxu0 %v8953_v9 }
 0x857   : > { %8170 = vmatpush3.bf16.msra.mxu0 %v8954_v15 }
 0x858   : > { %8171 = vmatprep.subr.bf16.mxu0 %v8955_v23 }
 0x85b   : > { %8172 = vmatpush3.bf16.msra.mxu0 %v8956_v24  ;;  %v8986_v24 = vld [vmem:[%s10840_s3 + $0xa8] sm:$0xff]  }
 0x85c   : > { %8173 = vmatprep.subr.bf16.mxu0 %v8957_v10  ;;  %v8987_v10 = vld [vmem:[%s10842_s5 + $0x918] sm:$0xff]  }
 0x85f   : > { %8174 = vmatpush3.bf16.msra.mxu0 %v8958_v14  ;;  %v8990_v14 = vld [vmem:[%s10842_s5 + $0x930] sm:$0xff]  }
 0x860   : > { %8175 = vmatprep.subr.bf16.mxu0 %v8959_v25  ;;  %v8991_v25 = vld [vmem:[%s10842_s5 + $0x938] sm:$0xff]  }
 0x863   : > { %8176 = vmatpush3.bf16.msra.mxu0 %v8960_v26  ;;  %v8992_v26 = vld [vmem:[%s10842_s5 + $0x940] sm:$0xff]  }
 0x864   : > { %8177 = vmatprep.subr.bf16.mxu0 %v8961_v0  ;;  %v8993_v0 = vld [vmem:[%s10842_s5 + $0x948] sm:$0xff]  }
 0x867   : > { %8178 = vmatpush3.bf16.msra.mxu0 %v8962_v27  ;;  %v8994_v27 = vld [vmem:[%s10842_s5 + $0x950] sm:$0xff]  }
 0x868   : > { %8179 = vmatprep.subr.bf16.mxu0 %v8963_v28  ;;  %v8995_v28 = vld [vmem:[%s10842_s5 + $0x958] sm:$0xff]  }
 0x86b   : > { %8180 = vmatpush3.bf16.msra.mxu0 %v8964_v29  ;;  %v8996_v29 = vld [vmem:[%s10840_s3 + $0xb0] sm:$0xff]  }
 0x86c   : > { %8181 = vmatprep.subr.bf16.mxu0 %v8965_v30 }
 0x86f   : > { %8182 = vmatpush3.bf16.msra.mxu0 %v8966_v31 }
 0x872   : > { %4209 = vmatmul.mubr.bf16.vlgmr.msra.gmra.mrb[40].mxu0 %v9272_v60 }
 0x873   : > { %8398 = vmatprep.mubr.msk.bf16.mxu0 %vm959_vm0, %v8967_v32 }
 0x945   : > { %v8183_v34 = vpop.f32.mrb[40].mxu0 }
 0x946   : > { %v8184_v35 = vpop.f32.mrb[41].mxu0 }
 0x947   : > { %v8185_v38 = vadd.f32 %v8184_v35, %v8183_v34  ;;  %v8186_v41 = vpop.f32.mrb[42].mxu0 }
 0x948   : > { %v8187_v44 = vpop.f32.mrb[43].mxu0 }
 0x949   : > { %v4252_v46 = vadd.f32 %v8185_v38, %v10182_v37  ;;  %v8188_v42 = vadd.f32 %v8187_v44, %v8186_v41  ;;  %v8971_v37 = vld [vmem:[%s10842_s5 + $0x818] sm:$0xff]  }
 0x94a   : > { %v8997_v44 = vld [vmem:[%s10840_s3 + $0xb8] sm:$0xff]  }
 0x94b   : > { %v4255_v43 = vadd.f32 %v8188_v42, %v10185_v39  ;;  %v8972_v39 = vld [vmem:[%s10842_s5 + $0x7d8] sm:$0xff]  }
 0x94c   : > { %v9001_v42 = vld [vmem:[%s10842_s5 + $0x9f8] sm:$0xff]  }
 0x94d   : > { %v4263_v45 = vpack.c.bf16 %v4255_v43, %v4252_v46  ;;  %v8998_v46 = vld [vmem:[%s10842_s5 + $0x9e0] sm:$0xff]  }
 0x94e   : > { %v9002_v43 = vld [vmem:[%s10842_s5 + $0xa00] sm:$0xff]  }
 0x94f   : > { %8396 = vmatprep.subr.bf16.mxu0 %v4263_v45 }
 0x950   : > { %8397 = vmatpush3.bf16.msra.mxu0 %v4263_v45  ;;  %v9003_v45 = vld [vmem:[%s10842_s5 + $0xa08] sm:$0xff]  }
 0x951   : > { %8192 = vmatprep.subr.bf16.mxu0 %v8969_v47  ;;  %v9004_v47 = vld [vmem:[%s10842_s5 + $0xa10] sm:$0xff]  }
 0x953   : > { %8399 = vmatmul.mubr.msk.bf16.vlgmr.msra.gmra.mrb[12].mxu0 %vm959_vm0, %v8968_v48  ;;  %v9005_v48 = vld [vmem:[%s10842_s5 + $0xa18] sm:$0xff]  }
 0x954   : > { %8193 = vmatpush3.bf16.msra.mxu0 %v8970_v55  ;;  %4566 = vmatprep.mubr.bf16.mxu0 %v9276_v62  ;;  %v9006_v55 = vld [vmem:[%s10842_s5 + $0xa20] sm:$0xff]  }
 0x955   : > { %8194 = vmatprep.subr.bf16.mxu0 %v8971_v37  ;;  %v9007_v37 = vld [vmem:[%s10840_s3 + $0xc0] sm:$0xff]  }
 0x958   : > { %8195 = vmatpush3.bf16.msra.mxu0 %v8972_v39 }
 0x959   : > { %8196 = vmatprep.subr.bf16.mxu0 %v8973_v59 }
 0x95c   : > { %8197 = vmatpush3.bf16.msra.mxu0 %v8974_v51 }
 0x95d   : > { %8198 = vmatprep.subr.bf16.mxu0 %v8975_v54 }
 0x960   : > { %8199 = vmatpush3.bf16.msra.mxu0 %v8976_v56 }
 0x961   : > { %8200 = vmatprep.subr.bf16.mxu0 %v8977_v58 }
 0x964   : > { %8201 = vmatpush3.bf16.msra.mxu0 %v8978_v2 }
 0x965   : > { %8202 = vmatprep.subr.bf16.mxu0 %v8979_v4  ;;  %v9008_v4 = vld [vmem:[%s10840_s3 + $0xc8] sm:$0xff]  }
 0x968   : > { %8203 = vmatpush3.bf16.msra.mxu0 %v8980_v5  ;;  %v9009_v5 = vld [vmem:[%s10842_s5 + $0xaa8] sm:$0xff]  }
 0x969   : > { %8204 = vmatprep.subr.bf16.mxu0 %v8981_v6  ;;  %v9012_v6 = vld [vmem:[%s10842_s5 + $0xac0] sm:$0xff]  }
 0x96c   : > { %8205 = vmatpush3.bf16.msra.mxu0 %v8982_v20  ;;  %v9014_v20 = vld [vmem:[%s10842_s5 + $0xad0] sm:$0xff]  }
 0x96d   : > { %8206 = vmatprep.subr.bf16.mxu0 %v8983_v22  ;;  %v9015_v22 = vld [vmem:[%s10842_s5 + $0xad8] sm:$0xff]  }
 0x970   : > { %8207 = vmatpush3.bf16.msra.mxu0 %v8984_v8  ;;  %v9016_v8 = vld [vmem:[%s10842_s5 + $0xae0] sm:$0xff]  }
 0x973   : > { %4567 = vmatmul.mubr.bf16.vlgmr.msra.gmra.mrb[44].mxu0 %v9272_v60 }
 0x974   : > { %8404 = vmatprep.mubr.msk.bf16.mxu0 %vm959_vm0, %v8985_v11  ;;  %v9017_v11 = vld [vmem:[%s10842_s5 + $0xae8] sm:$0xff]  }
 0xa46   : > { %v8208_v13 = vpop.f32.mrb[44].mxu0 }
 0xa47   : > { %v8209_v16 = vpop.f32.mrb[45].mxu0 }
 0xa48   : > { %v8210_v18 = vadd.f32 %v8209_v16, %v8208_v13  ;;  %v8211_v36 = vpop.f32.mrb[46].mxu0  ;;  %v9018_v13 = vld [vmem:[%s10840_s3 + $0xd0] sm:$0xff]  }
 0xa49   : > { %v8212_v19 = vpop.f32.mrb[47].mxu0 }
 0xa4a   : > { %v4610_v21 = vadd.f32 %v8210_v18, %v10213_v50  ;;  %v8213_v9 = vadd.f32 %v8212_v19, %v8211_v36  ;;  %v8988_v50 = vld [vmem:[%s10842_s5 + $0x920] sm:$0xff]  }
 0xa4c   : > { %v4613_v15 = vadd.f32 %v8213_v9, %v10215_v52  ;;  %v8989_v52 = vld [vmem:[%s10842_s5 + $0x928] sm:$0xff]  }
 0xa4e   : > { %v4621_v23 = vpack.c.bf16 %v4613_v15, %v4610_v21 }
 0xa50   : > { %8402 = vmatprep.subr.bf16.mxu0 %v4621_v23 }
 0xa51   : > { %8403 = vmatpush3.bf16.msra.mxu0 %v4621_v23  ;;  %v9023_v23 = vld [vmem:[%s10842_s5 + $0xbb8] sm:$0xff]  }
 0xa52   : > { %4933 = vmatprep.subr.bf16.mxu0 %v9048_v1 }
 0xa54   : > { %8405 = vmatmul.mubr.msk.bf16.vlgmr.msra.gmra.mrb[12].mxu0 %vm959_vm0, %v8986_v24  ;;  %v9024_v24 = vld [vmem:[%s10842_s5 + $0xc00] sm:$0xff]  }
 0xa55   : > { %4934 = vmatpush1.bf16.msra.mxu0 %v8987_v10  ;;  %7593 = vmatprep.mubr.msk.bf16.mxu0 %vm959_vm0, %v9278_v63  ;;  %v9026_v10 = vld [vmem:[%s10842_s5 + $0xc08] sm:$0xff]  }
 0xa56   : > { %4935 = vmatprep.subr.bf16.mxu0 %v9048_v1 }
 0xa59   : > { %4936 = vmatpush1.bf16.msra.mxu0 %v8988_v50  ;;  %v9027_v50 = vld [vmem:[%s10842_s5 + $0xbc8] sm:$0xff]  }
 0xa5a   : > { %4937 = vmatprep.subr.bf16.mxu0 %v9048_v1 }
 0xa5d   : > { %4938 = vmatpush1.bf16.msra.mxu0 %v8989_v52  ;;  %v9028_v52 = vld [vmem:[%s10842_s5 + $0xc10] sm:$0xff]  }
 0xa5e   : > { %4939 = vmatprep.subr.bf16.mxu0 %v9048_v1 }
 0xa61   : > { %4940 = vmatpush1.bf16.msra.mxu0 %v8990_v14  ;;  %v9030_v14 = vld [vmem:[%s10842_s5 + $0xc18] sm:$0xff]  }
 0xa62   : > { %4941 = vmatprep.subr.bf16.mxu0 %v9048_v1 }
 0xa65   : > { %4942 = vmatpush1.bf16.msra.mxu0 %v8991_v25  ;;  %v9031_v25 = vld [vmem:[%s10842_s5 + $0xbd8] sm:$0xff]  }
 0xa66   : > { %4943 = vmatprep.subr.bf16.mxu0 %v9048_v1 }
 0xa69   : > { %4944 = vmatpush1.bf16.msra.mxu0 %v8992_v26  ;;  %v9032_v26 = vld [vmem:[%s10842_s5 + $0xc20] sm:$0xff]  }
 0xa6a   : > { %4945 = vmatprep.subr.bf16.mxu0 %v9048_v1 }
 0xa6d   : > { %4946 = vmatpush1.bf16.msra.mxu0 %v8993_v0  ;;  %v9033_v0 = vld [vmem:[%s10842_s5 + $0xbe0] sm:$0xff]  }
 0xa6e   : > { %4947 = vmatprep.subr.bf16.mxu0 %v9048_v1 }
 0xa71   : > { %4948 = vmatpush1.bf16.msra.mxu0 %v8994_v27  ;;  %v9034_v27 = vld [vmem:[%s10842_s5 + $0xc28] sm:$0xff]  }
 0xa72   : > { %4949 = vmatprep.subr.bf16.mxu0 %v9048_v1 }
 0xa75   : > { %4950 = vmatpush1.bf16.msra.mxu0 %v8995_v28  ;;  %v9035_v28 = vld [vmem:[%s10842_s5 + $0xbe8] sm:$0xff]  }
 0xa78   : > { %4966 = vmatmul.mubr.bf16.vlgmr.msra.gmra.mrb[48].mxu0 %v9274_v61 }
 0xa79   : > { %8410 = vmatprep.mubr.msk.bf16.mxu0 %vm959_vm0, %v8996_v29  ;;  %v9036_v29 = vld [vmem:[%s10842_s5 + $0xc30] sm:$0xff]  }
 0xb4b   : > { %v4967_v30 = vpop.f32.mrb[48].mxu0 }
 0xb4c   : > { %v4968_v31 = vadd.f32 %v10217_v57, %v4967_v30  ;;  %v4969_v32 = vpop.f32.mrb[49].mxu0  ;;  %v8999_v57 = vld [vmem:[%s10842_s5 + $0x9e8] sm:$0xff]   ;;  %v9037_v30 = vld [vmem:[%s10842_s5 + $0xbf0] sm:$0xff]  }
 0xb4d   : > { %v4970_v34 = vpop.f32.mrb[50].mxu0  ;;  %v6481_v32 = vld [vmem:[%s10841_s4] sm:$0xff] }
 0xb4e   : > { %v4971_v35 = vadd.f32 %v10219_v3, %v4970_v34  ;;  %v4972_v38 = vpop.f32.mrb[51].mxu0  ;;  %v9000_v3 = vld [vmem:[%s10842_s5 + $0x9f0] sm:$0xff]   ;;  %6487 = vperm.xlu1 %8508, %v6481_v32   ;;  %v6482_v34 = vld [vmem:[%s10841_s4 + $0x8] sm:$0xff] }
 0xb50   : > { %v4979_v41 = vpack.c.bf16 %v4971_v35, %v4968_v31  ;;  %v9038_v31 = vld [vmem:[%s10840_s3 + $0xf0] sm:$0xff]  }
 0xb52   : > { %8408 = vmatprep.subr.bf16.mxu0 %v4979_v41  ;;  %6492 = vperm.xlu1 %8508, %v6482_v34  }
 0xb53   : > { %8409 = vmatpush3.bf16.msra.mxu0 %v4979_v41 }
 0xb54   : > { %5291 = vmatprep.subr.bf16.mxu0 %v9048_v1 }
 0xb56   : > { %8411 = vmatmul.mubr.msk.bf16.vlgmr.msra.gmra.mrb[12].mxu0 %vm959_vm0, %v8997_v44 }
 0xb57   : > { %5292 = vmatpush1.bf16.msra.mxu0 %v8998_v46  ;;  %7677 = vmatprep.mubr.msk.bf16.mxu0 %vm959_vm0, %v9278_v63 }
 0xb58   : > { %5293 = vmatprep.subr.bf16.mxu0 %v9048_v1 }
 0xb5b   : > { %5294 = vmatpush1.bf16.msra.mxu0 %v8999_v57 }
 0xb5c   : > { %5295 = vmatprep.subr.bf16.mxu0 %v9048_v1 }
 0xb5f   : > { %5296 = vmatpush1.bf16.msra.mxu0 %v9000_v3 }
 0xb60   : > { %5297 = vmatprep.subr.bf16.mxu0 %v9048_v1 }
 0xb63   : > { %5298 = vmatpush1.bf16.msra.mxu0 %v9001_v42 }
 0xb64   : > { %5299 = vmatprep.subr.bf16.mxu0 %v9048_v1 }
 0xb67   : > { %5300 = vmatpush1.bf16.msra.mxu0 %v9002_v43 }
 0xb68   : > { %5301 = vmatprep.subr.bf16.mxu0 %v9048_v1 }
 0xb6b   : > { %5302 = vmatpush1.bf16.msra.mxu0 %v9003_v45  ;;  %v9039_v45 = vld [vmem:[%s10840_s3 + $0xf8] sm:$0xff]  }
 0xb6c   : > { %5303 = vmatprep.subr.bf16.mxu0 %v9048_v1 }
 0xb6f   : > { %5304 = vmatpush1.bf16.msra.mxu0 %v9004_v47 }
 0xb70   : > { %5305 = vmatprep.subr.bf16.mxu0 %v9048_v1 }
 0xb73   : > { %5306 = vmatpush1.bf16.msra.mxu0 %v9005_v48 }
 0xb74   : > { %5307 = vmatprep.subr.bf16.mxu0 %v9048_v1 }
 0xb77   : > { %5308 = vmatpush1.bf16.msra.mxu0 %v9006_v55  ;;  %v6498_v55 = vpop.permute.xlu0 %6497 }
 0xb7a   : > { %5324 = vmatmul.mubr.bf16.vlgmr.msra.gmra.mrb[52].mxu0 %v9274_v61 }
 0xb7b   : > { %8416 = vmatprep.mubr.msk.bf16.mxu0 %vm959_vm0, %v9007_v37 }
 0xbcd   : > { %v6488_v47 = vpop.permute.xlu1 %6487 }
 0xbd1   : > { %v6493_v48 = vpop.permute.xlu1 %6492 }
 0xc4d   : > { %v5325_v39 = vpop.f32.mrb[52].mxu0 }
 0xc4e   : > { %v5326_v59 = vadd.f32 %v10224_v7, %v5325_v39  ;;  %v5327_v51 = vpop.f32.mrb[53].mxu0  ;;  %v9010_v7 = vld [vmem:[%s10842_s5 + $0xab0] sm:$0xff]  }
 0xc4f   : > { %v5328_v54 = vpop.f32.mrb[54].mxu0 }
 0xc50   : > { %v5329_v56 = vadd.f32 %v10227_v12, %v5328_v54  ;;  %v5330_v58 = vpop.f32.mrb[55].mxu0  ;;  %v9011_v12 = vld [vmem:[%s10842_s5 + $0xab8] sm:$0xff]  }
 0xc52   : > { %v5337_v2 = vpack.c.bf16 %v5329_v56, %v5326_v59 }
 0xc54   : > { %8414 = vmatprep.subr.bf16.mxu0 %v5337_v2 }
 0xc55   : > { %8415 = vmatpush3.bf16.msra.mxu0 %v5337_v2 }
 0xc56   : > { %5649 = vmatprep.subr.bf16.mxu0 %v9048_v1 }
 0xc58   : > { %8417 = vmatmul.mubr.msk.bf16.vlgmr.msra.gmra.mrb[12].mxu0 %vm959_vm0, %v9008_v4 }
 0xc59   : > { %5650 = vmatpush1.bf16.msra.mxu0 %v9009_v5  ;;  %7761 = vmatprep.mubr.msk.bf16.mxu0 %vm959_vm0, %v9278_v63  ;;  %v9013_v63 = vld [vmem:[%s10842_s5 + $0xac8] sm:$0xff]  }
 0xc5a   : > { %5651 = vmatprep.subr.bf16.mxu0 %v9048_v1 }
 0xc5d   : > { %5652 = vmatpush1.bf16.msra.mxu0 %v9010_v7 }
 0xc5e   : > { %5653 = vmatprep.subr.bf16.mxu0 %v9048_v1 }
 0xc61   : > { %5654 = vmatpush1.bf16.msra.mxu0 %v9011_v12 }
 0xc62   : > { %5655 = vmatprep.subr.bf16.mxu0 %v9048_v1 }
 0xc65   : > { %5656 = vmatpush1.bf16.msra.mxu0 %v9012_v6 }
 0xc66   : > { %5657 = vmatprep.subr.bf16.mxu0 %v9048_v1 }
 0xc69   : > { %5658 = vmatpush1.bf16.msra.mxu0 %v9013_v63 }
 0xc6a   : > { %5659 = vmatprep.subr.bf16.mxu0 %v9048_v1 }
 0xc6d   : > { %5660 = vmatpush1.bf16.msra.mxu0 %v9014_v20 }
 0xc6e   : > { %5661 = vmatprep.subr.bf16.mxu0 %v9048_v1 }
 0xc71   : > { %5662 = vmatpush1.bf16.msra.mxu0 %v9015_v22 }
 0xc72   : > { %5663 = vmatprep.subr.bf16.mxu0 %v9048_v1 }
 0xc75   : > { %5664 = vmatpush1.bf16.msra.mxu0 %v9016_v8 }
 0xc76   : > { %5665 = vmatprep.subr.bf16.mxu0 %v9048_v1  ;;  %v9019_v1 = vld [vmem:[%s10840_s3 + $0xd8] sm:$0xff]  }
 0xc79   : > { %5666 = vmatpush1.bf16.msra.mxu0 %v9017_v11 }
 0xc7c   : > { %5682 = vmatmul.mubr.bf16.vlgmr.msra.gmra.mrb[56].mxu0 %v9274_v61  ;;  %v9020_v61 = vld [vmem:[%s10840_s3 + $0xe0] sm:$0xff]  }
 0xc7d   : > { %8422 = vmatprep.mubr.msk.bf16.mxu0 %vm959_vm0, %v9018_v13 }
 0xd4f   : > { %v5683_v16 = vpop.f32.mrb[56].mxu0 }
 0xd50   : > { %v5684_v18 = vadd.f32 %v10229_v17, %v5683_v16  ;;  %v5685_v36 = vpop.f32.mrb[57].mxu0  ;;  %v9021_v17 = vld [vmem:[%s10842_s5 + $0xbf8] sm:$0xff]  }
 0xd51   : > { %v5686_v19 = vpop.f32.mrb[58].mxu0 }
 0xd52   : > { %v5687_v21 = vadd.f32 %v10231_v40, %v5686_v19  ;;  %v5688_v9 = vpop.f32.mrb[59].mxu0  ;;  %v9022_v40 = vld [vmem:[%s10840_s3 + $0xe8] sm:$0xff]  }
 0xd54   : > { %v5695_v15 = vpack.c.bf16 %v5687_v21, %v5684_v18 }
 0xd56   : > { %8420 = vmatprep.subr.bf16.mxu0 %v5695_v15 }
 0xd57   : > { %8421 = vmatpush3.bf16.msra.mxu0 %v5695_v15 }
 0xd58   : > { %8426 = vmatprep.subr.bf16.mxu0 %v10233_v33 }
 0xd5a   : > { %8423 = vmatmul.mubr.msk.bf16.vlgmr.msra.gmra.mrb[12].mxu0 %vm959_vm0, %v9019_v1 }
 0xd5b   : > { %8427 = vmatpush3.bf16.msra.mxu0 %v10233_v33  ;;  %8428 = vmatprep.mubr.msk.bf16.mxu0 %vm959_vm0, %v9020_v61  ;;  %v9025_v33 = vld [vmem:[%s10842_s5 + $0xbc0] sm:$0xff]  }
 0xd5c   : > { %8317 = vmatprep.subr.bf16.mxu0 %v9021_v17 }
 0xd66   : > { %8429 = vmatmul.mubr.msk.bf16.vlgmr.msra.gmra.mrb[12].mxu0 %vm959_vm0, %v9022_v40 }
 0xd67   : > { %8318 = vmatpush3.bf16.msra.mxu0 %v9023_v23  ;;  %6356 = vmatprep.mubr.bf16.mxu0 %v9276_v62  ;;  %v9029_v62 = vld [vmem:[%s10842_s5 + $0xbd0] sm:$0xff]  }
 0xd68   : > { %8319 = vmatprep.subr.bf16.mxu0 %v9024_v24 }
 0xd6b   : > { %8320 = vmatpush3.bf16.msra.mxu0 %v9025_v33 }
 0xd6c   : > { %8321 = vmatprep.subr.bf16.mxu0 %v9026_v10 }
 0xd6f   : > { %8322 = vmatpush3.bf16.msra.mxu0 %v9027_v50 }
 0xd70   : > { %8323 = vmatprep.subr.bf16.mxu0 %v9028_v52 }
 0xd73   : > { %8324 = vmatpush3.bf16.msra.mxu0 %v9029_v62 }
 0xd74   : > { %8325 = vmatprep.subr.bf16.mxu0 %v9030_v14 }
 0xd77   : > { %8326 = vmatpush3.bf16.msra.mxu0 %v9031_v25 }
 0xd78   : > { %8327 = vmatprep.subr.bf16.mxu0 %v9032_v26 }
 0xd7b   : > { %8328 = vmatpush3.bf16.msra.mxu0 %v9033_v0 }
 0xd7c   : > { %8329 = vmatprep.subr.bf16.mxu0 %v9034_v27 }
 0xd7f   : > { %8330 = vmatpush3.bf16.msra.mxu0 %v9035_v28 }
 0xd80   : > { %8331 = vmatprep.subr.bf16.mxu0 %v9036_v29 }
 0xd83   : > { %8332 = vmatpush3.bf16.msra.mxu0 %v9037_v30 }
 0xd86   : > { %6357 = vmatmul.mubr.bf16.vlgmr.msra.gmra.mrb[60].mxu0 %v9272_v60  ;;  %v6484_v60 = vld [vmem:[%s10841_s4 + $0x18] sm:$0xff] }
 0xd87   : > { %8434 = vmatprep.mubr.msk.bf16.mxu0 %vm959_vm0, %v9038_v31  ;;  %6502 = vperm.xlu1 %8508, %v6484_v60  }
 0xe59   : > { %v8333_v35 = vpop.f32.mrb[60].mxu0 }
 0xe5a   : > { %v8334_v38 = vpop.f32.mrb[61].mxu0 }
 0xe5b   : > { %v8335_v41 = vadd.f32 %v8334_v38, %v8333_v35  ;;  %v8336_v44 = vpop.f32.mrb[62].mxu0 }
 0xe5c   : > { %v8337_v46 = vpop.f32.mrb[63].mxu0 }
 0xe5d   : > { %v6400_v57 = vadd.f32 %v8335_v41, %v10254_v49  ;;  %v8338_v3 = vadd.f32 %v8337_v46, %v8336_v44  ;;  %v6503_v49 = vpop.permute.xlu1 %6502 }
 0xe5f   : > { %v6403_v42 = vadd.f32 %v8338_v3, %v10257_v53 }
 0xe61   : > { %v6411_v43 = vpack.c.bf16 %v6403_v42, %v6400_v57 }
 0xe63   : > { %8432 = vmatprep.subr.bf16.mxu0 %v6411_v43 }
 0xe64   : > { %8433 = vmatpush3.bf16.msra.mxu0 %v6411_v43 }
 0xe67   : > { %8435 = vmatmul.mubr.msk.bf16.vlgmr.msra.gmra.mrb[12].mxu0 %vm959_vm0, %v9039_v45 }
 0xf3a   : > { %v8436_v37 = vpop.f32.mrb[12].mxu0 }
 0xf3b   : > { %v6507_v39 = vadd.f32 %v8436_v37, %v6498_v55  ;;  %v6462_v59 = vpop.f32.mrb[13].mxu0 }
 0xf3c   : > { %v6505_v53 = vadd.f32 %v6488_v47, %v6462_v59  ;;  %v8437_v51 = vpop.f32.mrb[14].mxu0 }
 0xf3d   : > { %v6511_v54 = vmax.f32 %v6507_v39, 0.0  ;;  %v6508_v56 = vadd.f32 %v8437_v51, %v6503_v49  ;;  %v6465_v58 = vpop.f32.mrb[15].mxu0 }
 0xf3e   : > { %v6509_v2 = vmax.f32 %v6505_v53, 0.0  ;;  %v6506_v4 = vadd.f32 %v6493_v48, %v6465_v58 }
 0xf3f   : > { %6516 = vst.msk [vmem:[%s251_s30 + $0x10] sm:$0xff] %vm6513_vm1, %v6511_v54  ;;  %v6512_v5 = vmax.f32 %v6508_v56, 0.0 }
 0xf40   : > { %6514 = vst.msk [vmem:[%s251_s30] sm:$0xff] %vm6513_vm1, %v6509_v2  ;;  %v6510_v7 = vmax.f32 %v6506_v4, 0.0 }
 0xf41   : > { %6517 = vst.msk [vmem:[%s251_s30 + $0x18] sm:$0xff] %vm6513_vm1, %v6512_v5 }
 0xf42   : > { %6515 = vst.msk [vmem:[%s251_s30 + $0x8] sm:$0xff] %vm6513_vm1, %v6510_v7 }
 0xf43 PF: > { %s16_s21 = sadd.s32 1, %s9046_s21  }
 0xf44   : > { %p13_p4 = scmp.ge.s32.totalorder %s16_s21, 4  }
 0xf46   :  { %15 = sbr.rel (!%p13_p4) target bundleno = 1 (0x1), region = 104 }

</bundles_post_ra>
